<compile_context>
chip_gen: v7x
topology: tpu7x:2x2x1
jax: 0.10.0
libtpu: 0.0.40
codegen_flags: <defaults>
</compile_context>

<pallas_src>
import functools

import jax
import jax.numpy as jnp
from jax.experimental import pallas as pl
from jax.experimental.pallas import tpu as pltpu  # noqa: F401  (kept for TPU backend use)

# ----------------------------- model hyper-params -----------------------------
D_MODEL = 32      # E
NHEAD = 4
DIM_FF = 64       # F
NUM_LAYERS = 2
NUM_QUERIES = 8   # L (tgt sequence length)
MEM_LEN = 16      # S (memory sequence length)
BATCH = 2         # N
LN_EPS = 1e-5


# --------------------------------- kernel math ---------------------------------
def _layernorm(x, gamma, beta):
    # x: (R, E); gamma/beta: (1, E)
    mu = jnp.mean(x, axis=-1, keepdims=True)
    var = jnp.mean((x - mu) ** 2, axis=-1, keepdims=True)
    return (x - mu) * jax.lax.rsqrt(var + LN_EPS) * gamma + beta


def _mha_core(q, k, v, wo, bo, bias, nhead):
    """Multi-head attention over flattened batch rows.

    q: (R, E), k/v: (C, E); bias: (R, C) additive block-diagonal batch mask
    (0 for same batch element, -1e9 otherwise), which makes the flattened-batch
    attention exactly equal to per-batch attention.
    """
    E = q.shape[-1]
    dh = E // nhead
    scale = 1.0 / float(dh) ** 0.5
    heads = []
    for h in range(nhead):                                   # static unroll
        sl = slice(h * dh, (h + 1) * dh)
        logits = jnp.dot(q[:, sl] * scale, k[:, sl].T,
                         preferred_element_type=jnp.float32) + bias
        m = jnp.max(logits, axis=-1, keepdims=True)
        p = jnp.exp(logits - m)
        denom = jnp.sum(p, axis=-1, keepdims=True)
        p = p * pl.reciprocal(denom, approx=True)            # EUP slot, ~free
        heads.append(jnp.dot(p, v[:, sl], preferred_element_type=jnp.float32))
    o = jnp.concatenate(heads, axis=-1)                      # (R, E)
    return jnp.dot(o, wo, preferred_element_type=jnp.float32) + bo


def _decoder_kernel(tgt_ref, mem_ref, qpos_ref, pos_ref, bias_self_ref, bias_cross_ref,
                    sa_wqk_ref, sa_bqk_ref, sa_wv_ref, sa_bv_ref, sa_wo_ref, sa_bo_ref,
                    ca_wq_ref, ca_bq_ref, ca_wk_ref, ca_bk_ref, ca_wv_ref, ca_bv_ref,
                    ca_wo_ref, ca_bo_ref,
                    ln_ref, w1_ref, b1_ref, w2_ref, b2_ref,
                    out_ref, *, nhead, num_layers, collect_intermediate):
    x = tgt_ref[...]            # (L*N, E)  rows ordered (l, n)
    mem = mem_ref[...]          # (S*N, E)
    qpos = qpos_ref[...]
    pos = pos_ref[...]
    bias_self = bias_self_ref[...]    # (L*N, L*N)
    bias_cross = bias_cross_ref[...]  # (L*N, S*N)
    ln = ln_ref[...]            # (8, E): [g1,b1,g2,b2,g3,b3,g_final,b_final]
    E = x.shape[-1]

    # Cross-attention K/V depend only on memory and the (layer-shared) weights:
    # compute once, reuse across all layers.
    k_ca = (jnp.dot(mem + pos, ca_wk_ref[...], preferred_element_type=jnp.float32)
            + ca_bk_ref[...])
    v_ca = (jnp.dot(mem, ca_wv_ref[...], preferred_element_type=jnp.float32)
            + ca_bv_ref[...])

    for layer in range(num_layers):   # deepcopy-cloned layers -> identical params
        # ---- self-attention block (post-norm) ----
        qk_in = x + qpos
        qk = (jnp.dot(qk_in, sa_wqk_ref[...], preferred_element_type=jnp.float32)
              + sa_bqk_ref[...])                                   # packed Q|K
        v_sa = (jnp.dot(x, sa_wv_ref[...], preferred_element_type=jnp.float32)
                + sa_bv_ref[...])
        sa = _mha_core(qk[:, :E], qk[:, E:], v_sa,
                       sa_wo_ref[...], sa_bo_ref[...], bias_self, nhead)
        x = _layernorm(x + sa, ln[0:1], ln[1:2])

        # ---- cross-attention block ----
        q_ca = (jnp.dot(x + qpos, ca_wq_ref[...], preferred_element_type=jnp.float32)
                + ca_bq_ref[...])
        ca = _mha_core(q_ca, k_ca, v_ca, ca_wo_ref[...], ca_bo_ref[...],
                       bias_cross, nhead)
        x = _layernorm(x + ca, ln[2:3], ln[3:4])

        # ---- feed-forward block (ReLU) ----
        h = jnp.maximum(
            jnp.dot(x, w1_ref[...], preferred_element_type=jnp.float32) + b1_ref[...],
            0.0)
        f = jnp.dot(h, w2_ref[...], preferred_element_type=jnp.float32) + b2_ref[...]
        x = _layernorm(x + f, ln[4:5], ln[5:6])

        if collect_intermediate:
            out_ref[layer] = _layernorm(x, ln[6:7], ln[7:8])

    if not collect_intermediate:
        out_ref[...] = _layernorm(x, ln[6:7], ln[7:8])


# ----------------------------------- wrapper -----------------------------------
def transformer_decoder(tgt, memory, query_pos, pos, layer_params, norm_params,
                        num_layers=NUM_LAYERS, return_intermediate=False):
    """tgt/query_pos: (L, N, E); memory/pos: (S, N, E).

    Returns (1, L, N, E) when return_intermediate=False (matches
    output.unsqueeze(0)), else (num_layers, L, N, E).
    """
    L, N, E = tgt.shape
    S = memory.shape[0]
    R, C = L * N, S * N

    # Free (row-major) flattening of the first two dims -- no transposes needed:
    # the block-diagonal batch mask below keeps attention per batch element.
    x = tgt.reshape(R, E)
    mem = memory.reshape(C, E)
    qp = query_pos.reshape(R, E)
    ps = pos.reshape(C, E)

    rb = jnp.arange(R, dtype=jnp.int32) % N          # batch id of each tgt row
    cbr = jnp.arange(R, dtype=jnp.int32) % N         # batch id of each tgt col
    cbc = jnp.arange(C, dtype=jnp.int32) % N         # batch id of each mem col
    bias_self = jnp.where(rb[:, None] == cbr[None, :], 0.0, -1e9).astype(jnp.float32)
    bias_cross = jnp.where(rb[:, None] == cbc[None, :], 0.0, -1e9).astype(jnp.float32)

    gamma, beta = norm_params
    ln_all = jnp.concatenate([layer_params["ln"], gamma, beta], axis=0)   # (8, E)

    if return_intermediate:
        out_shape = jax.ShapeDtypeStruct((num_layers, R, E), jnp.float32)
    else:
        out_shape = jax.ShapeDtypeStruct((R, E), jnp.float32)

    kernel = functools.partial(_decoder_kernel, nhead=NHEAD, num_layers=num_layers,
                               collect_intermediate=return_intermediate)

    out = pl.pallas_call(kernel, out_shape=out_shape)(
        x, mem, qp, ps, bias_self, bias_cross,
        layer_params["sa_wqk"], layer_params["sa_bqk"],
        layer_params["sa_wv"], layer_params["sa_bv"],
        layer_params["sa_wo"], layer_params["sa_bo"],
        layer_params["ca_wq"], layer_params["ca_bq"],
        layer_params["ca_wk"], layer_params["ca_bk"],
        layer_params["ca_wv"], layer_params["ca_bv"],
        layer_params["ca_wo"], layer_params["ca_bo"],
        ln_all, layer_params["w1"], layer_params["b1"],
        layer_params["w2"], layer_params["b2"])

    if return_intermediate:
        return out.reshape(num_layers, L, N, E)
    return out.reshape(L, N, E)[None]                 # (1, L, N, E)


# ------------------------------------- main -------------------------------------
def _init_params(key):
    E, Fd = D_MODEL, DIM_FF
    ks = jax.random.split(key, 18)
    s = 0.1
    rnd = lambda k, shape: jax.random.normal(k, shape, jnp.float32) * s
    layer_params = {
        # self-attention: packed Q|K projection (E, 2E), separate V, out proj
        "sa_wqk": rnd(ks[0], (E, 2 * E)), "sa_bqk": rnd(ks[1], (1, 2 * E)),
        "sa_wv": rnd(ks[2], (E, E)), "sa_bv": rnd(ks[3], (1, E)),
        "sa_wo": rnd(ks[4], (E, E)), "sa_bo": rnd(ks[5], (1, E)),
        # cross-attention
        "ca_wq": rnd(ks[6], (E, E)), "ca_bq": rnd(ks[7], (1, E)),
        "ca_wk": rnd(ks[8], (E, E)), "ca_bk": rnd(ks[9], (1, E)),
        "ca_wv": rnd(ks[10], (E, E)), "ca_bv": rnd(ks[11], (1, E)),
        "ca_wo": rnd(ks[12], (E, E)), "ca_bo": rnd(ks[13], (1, E)),
        # layernorm params initialized like nn.LayerNorm: gamma=1, beta=0
        "ln": jnp.stack([jnp.ones((E,)), jnp.zeros((E,)),
                         jnp.ones((E,)), jnp.zeros((E,)),
                         jnp.ones((E,)), jnp.zeros((E,))]).astype(jnp.float32),
        # feed-forward
        "w1": rnd(ks[14], (E, Fd)), "b1": rnd(ks[15], (1, Fd)),
        "w2": rnd(ks[16], (Fd, E)), "b2": rnd(ks[17], (1, E)),
    }
    norm_params = (jnp.ones((1, E), jnp.float32), jnp.zeros((1, E), jnp.float32))
    return layer_params, norm_params


if __name__ == "__main__":
    key = jax.random.PRNGKey(0)
    k_tgt, k_mem, k_qp, k_pos, k_par = jax.random.split(key, 5)

    # PyTorch-style seq-first inputs
    tgt = jax.random.normal(k_tgt, (NUM_QUERIES, BATCH, D_MODEL), jnp.float32)
    memory = jax.random.normal(k_mem, (MEM_LEN, BATCH, D_MODEL), jnp.float32)
    query_pos = jax.random.normal(k_qp, (NUM_QUERIES, BATCH, D_MODEL), jnp.float32)
    pos = jax.random.normal(k_pos, (MEM_LEN, BATCH, D_MODEL), jnp.float32)

    layer_params, norm_params = _init_params(k_par)

    out = transformer_decoder(tgt, memory, query_pos, pos, layer_params, norm_params,
                              num_layers=NUM_LAYERS, return_intermediate=False)
    out = jax.block_until_ready(out)

    assert out.shape == (1, NUM_QUERIES, BATCH, D_MODEL), out.shape
    assert jnp.all(jnp.isfinite(out))
    print("KERNEL_OK")
</pallas_src>

<mosaic_0001>
module attributes {stable_mosaic.version = 11 : i64} {
  func.func @_decoder_kernel(%arg0: memref<16x32xf32, #tpu.memory_space<vmem>>, %arg1: memref<32x32xf32, #tpu.memory_space<vmem>>, %arg2: memref<16x32xf32, #tpu.memory_space<vmem>>, %arg3: memref<32x32xf32, #tpu.memory_space<vmem>>, %arg4: memref<16x16xf32, #tpu.memory_space<vmem>>, %arg5: memref<16x32xf32, #tpu.memory_space<vmem>>, %arg6: memref<32x64xf32, #tpu.memory_space<vmem>>, %arg7: memref<1x64xf32, #tpu.memory_space<vmem>>, %arg8: memref<32x32xf32, #tpu.memory_space<vmem>>, %arg9: memref<1x32xf32, #tpu.memory_space<vmem>>, %arg10: memref<32x32xf32, #tpu.memory_space<vmem>>, %arg11: memref<1x32xf32, #tpu.memory_space<vmem>>, %arg12: memref<32x32xf32, #tpu.memory_space<vmem>>, %arg13: memref<1x32xf32, #tpu.memory_space<vmem>>, %arg14: memref<32x32xf32, #tpu.memory_space<vmem>>, %arg15: memref<1x32xf32, #tpu.memory_space<vmem>>, %arg16: memref<32x32xf32, #tpu.memory_space<vmem>>, %arg17: memref<1x32xf32, #tpu.memory_space<vmem>>, %arg18: memref<32x32xf32, #tpu.memory_space<vmem>>, %arg19: memref<1x32xf32, #tpu.memory_space<vmem>>, %arg20: memref<8x32xf32, #tpu.memory_space<vmem>>, %arg21: memref<32x64xf32, #tpu.memory_space<vmem>>, %arg22: memref<1x64xf32, #tpu.memory_space<vmem>>, %arg23: memref<64x32xf32, #tpu.memory_space<vmem>>, %arg24: memref<1x32xf32, #tpu.memory_space<vmem>>, %arg25: memref<16x32xf32, #tpu.memory_space<vmem>>) attributes {dimension_semantics = [], scalar_prefetch = 0 : i64, scratch_operands = 0 : i64, tpu.core_type = #tpu.core_type<tc>} {
    %c0 = arith.constant 0 : index
    %c0_0 = arith.constant 0 : index
    %0 = vector.load %arg0[%c0, %c0_0] : memref<16x32xf32, #tpu.memory_space<vmem>>, vector<16x32xf32>
    %c0_1 = arith.constant 0 : index
    %c0_2 = arith.constant 0 : index
    %1 = vector.load %arg1[%c0_1, %c0_2] : memref<32x32xf32, #tpu.memory_space<vmem>>, vector<32x32xf32>
    %c0_3 = arith.constant 0 : index
    %c0_4 = arith.constant 0 : index
    %2 = vector.load %arg2[%c0_3, %c0_4] : memref<16x32xf32, #tpu.memory_space<vmem>>, vector<16x32xf32>
    %c0_5 = arith.constant 0 : index
    %c0_6 = arith.constant 0 : index
    %3 = vector.load %arg3[%c0_5, %c0_6] : memref<32x32xf32, #tpu.memory_space<vmem>>, vector<32x32xf32>
    %c0_7 = arith.constant 0 : index
    %c0_8 = arith.constant 0 : index
    %4 = vector.load %arg4[%c0_7, %c0_8] : memref<16x16xf32, #tpu.memory_space<vmem>>, vector<16x16xf32>
    %c0_9 = arith.constant 0 : index
    %c0_10 = arith.constant 0 : index
    %5 = vector.load %arg5[%c0_9, %c0_10] : memref<16x32xf32, #tpu.memory_space<vmem>>, vector<16x32xf32>
    %c0_11 = arith.constant 0 : index
    %c0_12 = arith.constant 0 : index
    %6 = vector.load %arg20[%c0_11, %c0_12] : memref<8x32xf32, #tpu.memory_space<vmem>>, vector<8x32xf32>
    %7 = arith.addf %1, %3 : vector<32x32xf32>
    %c0_13 = arith.constant 0 : index
    %c0_14 = arith.constant 0 : index
    %8 = vector.load %arg14[%c0_13, %c0_14] : memref<32x32xf32, #tpu.memory_space<vmem>>, vector<32x32xf32>
    %cst = arith.constant dense<0.000000e+00> : vector<32x32xf32>
    %9 = tpu.matmul %7, %8, %cst {dimension_numbers = #tpu.dot_dimension_numbers<[1], [0], [0], [1], [0, 0, 1, 1], [], []>} : vector<32x32xf32>, vector<32x32xf32>, vector<32x32xf32> -> vector<32x32xf32>
    %c0_15 = arith.constant 0 : index
    %c0_16 = arith.constant 0 : index
    %10 = vector.load %arg15[%c0_15, %c0_16] : memref<1x32xf32, #tpu.memory_space<vmem>>, vector<1x32xf32>
    %11 = vector.broadcast %10 : vector<1x32xf32> to vector<32x32xf32>
    %12 = arith.addf %9, %11 : vector<32x32xf32>
    %c0_17 = arith.constant 0 : index
    %c0_18 = arith.constant 0 : index
    %13 = vector.load %arg16[%c0_17, %c0_18] : memref<32x32xf32, #tpu.memory_space<vmem>>, vector<32x32xf32>
    %cst_19 = arith.constant dense<0.000000e+00> : vector<32x32xf32>
    %14 = tpu.matmul %1, %13, %cst_19 {dimension_numbers = #tpu.dot_dimension_numbers<[1], [0], [0], [1], [0, 0, 1, 1], [], []>} : vector<32x32xf32>, vector<32x32xf32>, vector<32x32xf32> -> vector<32x32xf32>
    %c0_20 = arith.constant 0 : index
    %c0_21 = arith.constant 0 : index
    %15 = vector.load %arg17[%c0_20, %c0_21] : memref<1x32xf32, #tpu.memory_space<vmem>>, vector<1x32xf32>
    %16 = vector.broadcast %15 : vector<1x32xf32> to vector<32x32xf32>
    %17 = arith.addf %14, %16 : vector<32x32xf32>
    %18 = arith.addf %0, %2 : vector<16x32xf32>
    %c0_22 = arith.constant 0 : index
    %c0_23 = arith.constant 0 : index
    %19 = vector.load %arg6[%c0_22, %c0_23] : memref<32x64xf32, #tpu.memory_space<vmem>>, vector<32x64xf32>
    %cst_24 = arith.constant dense<0.000000e+00> : vector<16x64xf32>
    %20 = tpu.matmul %18, %19, %cst_24 {dimension_numbers = #tpu.dot_dimension_numbers<[1], [0], [0], [1], [0, 0, 1, 1], [], []>} : vector<16x32xf32>, vector<32x64xf32>, vector<16x64xf32> -> vector<16x64xf32>
    %c0_25 = arith.constant 0 : index
    %c0_26 = arith.constant 0 : index
    %21 = vector.load %arg7[%c0_25, %c0_26] : memref<1x64xf32, #tpu.memory_space<vmem>>, vector<1x64xf32>
    %22 = vector.broadcast %21 : vector<1x64xf32> to vector<16x64xf32>
    %23 = arith.addf %20, %22 : vector<16x64xf32>
    %c0_27 = arith.constant 0 : index
    %c0_28 = arith.constant 0 : index
    %24 = vector.load %arg8[%c0_27, %c0_28] : memref<32x32xf32, #tpu.memory_space<vmem>>, vector<32x32xf32>
    %cst_29 = arith.constant dense<0.000000e+00> : vector<16x32xf32>
    %25 = tpu.matmul %0, %24, %cst_29 {dimension_numbers = #tpu.dot_dimension_numbers<[1], [0], [0], [1], [0, 0, 1, 1], [], []>} : vector<16x32xf32>, vector<32x32xf32>, vector<16x32xf32> -> vector<16x32xf32>
    %c0_30 = arith.constant 0 : index
    %c0_31 = arith.constant 0 : index
    %26 = vector.load %arg9[%c0_30, %c0_31] : memref<1x32xf32, #tpu.memory_space<vmem>>, vector<1x32xf32>
    %27 = vector.broadcast %26 : vector<1x32xf32> to vector<16x32xf32>
    %28 = arith.addf %25, %27 : vector<16x32xf32>
    %29 = vector.extract_strided_slice %23 {offsets = [0, 0], sizes = [16, 32], strides = [1, 1]} : vector<16x64xf32> to vector<16x32xf32>
    %30 = vector.extract_strided_slice %23 {offsets = [0, 32], sizes = [16, 32], strides = [1, 1]} : vector<16x64xf32> to vector<16x32xf32>
    %c0_32 = arith.constant 0 : index
    %c0_33 = arith.constant 0 : index
    %31 = vector.load %arg10[%c0_32, %c0_33] : memref<32x32xf32, #tpu.memory_space<vmem>>, vector<32x32xf32>
    %c0_34 = arith.constant 0 : index
    %c0_35 = arith.constant 0 : index
    %32 = vector.load %arg11[%c0_34, %c0_35] : memref<1x32xf32, #tpu.memory_space<vmem>>, vector<1x32xf32>
    %33 = vector.extract_strided_slice %29 {offsets = [0, 0], sizes = [16, 8], strides = [1, 1]} : vector<16x32xf32> to vector<16x8xf32>
    %cst_36 = arith.constant 0.353553385 : f32
    %34 = vector.broadcast %cst_36 : f32 to vector<16x8xf32>
    %35 = arith.mulf %33, %34 : vector<16x8xf32>
    %36 = vector.extract_strided_slice %30 {offsets = [0, 0], sizes = [16, 8], strides = [1, 1]} : vector<16x32xf32> to vector<16x8xf32>
    %37 = tpu.transpose %36, [1, 0] : vector<16x8xf32> -> vector<8x16xf32>
    %cst_37 = arith.constant dense<0.000000e+00> : vector<16x16xf32>
    %38 = tpu.matmul %35, %37, %cst_37 {dimension_numbers = #tpu.dot_dimension_numbers<[1], [0], [0], [1], [0, 0, 1, 1], [], []>} : vector<16x8xf32>, vector<8x16xf32>, vector<16x16xf32> -> vector<16x16xf32>
    %39 = arith.addf %38, %4 : vector<16x16xf32>
    %cst_38 = arith.constant dense<0xFF800000> : vector<16xf32>
    %40 = vector.multi_reduction <maximumf>, %39, %cst_38 [1] : vector<16x16xf32> to vector<16xf32>
    %41 = vector.shape_cast %40 : vector<16xf32> to vector<16x1xf32>
    %42 = vector.broadcast %41 : vector<16x1xf32> to vector<16x16xf32>
    %43 = arith.subf %39, %42 : vector<16x16xf32>
    %44 = math.exp %43 : vector<16x16xf32>
    %cst_39 = arith.constant dense<0.000000e+00> : vector<16xf32>
    %45 = vector.multi_reduction <add>, %44, %cst_39 [1] : vector<16x16xf32> to vector<16xf32>
    %46 = vector.shape_cast %45 : vector<16xf32> to vector<16x1xf32>
    %47 = tpu.reciprocal %46 {approx = true} : vector<16x1xf32> -> vector<16x1xf32>
    %48 = vector.broadcast %47 : vector<16x1xf32> to vector<16x16xf32>
    %49 = arith.mulf %44, %48 : vector<16x16xf32>
    %50 = vector.extract_strided_slice %28 {offsets = [0, 0], sizes = [16, 8], strides = [1, 1]} : vector<16x32xf32> to vector<16x8xf32>
    %cst_40 = arith.constant dense<0.000000e+00> : vector<16x8xf32>
    %51 = tpu.matmul %49, %50, %cst_40 {dimension_numbers = #tpu.dot_dimension_numbers<[1], [0], [0], [1], [0, 0, 1, 1], [], []>} : vector<16x16xf32>, vector<16x8xf32>, vector<16x8xf32> -> vector<16x8xf32>
    %52 = vector.extract_strided_slice %29 {offsets = [0, 8], sizes = [16, 8], strides = [1, 1]} : vector<16x32xf32> to vector<16x8xf32>
    %cst_41 = arith.constant 0.353553385 : f32
    %53 = vector.broadcast %cst_41 : f32 to vector<16x8xf32>
    %54 = arith.mulf %52, %53 : vector<16x8xf32>
    %55 = vector.extract_strided_slice %30 {offsets = [0, 8], sizes = [16, 8], strides = [1, 1]} : vector<16x32xf32> to vector<16x8xf32>
    %56 = tpu.transpose %55, [1, 0] : vector<16x8xf32> -> vector<8x16xf32>
    %cst_42 = arith.constant dense<0.000000e+00> : vector<16x16xf32>
    %57 = tpu.matmul %54, %56, %cst_42 {dimension_numbers = #tpu.dot_dimension_numbers<[1], [0], [0], [1], [0, 0, 1, 1], [], []>} : vector<16x8xf32>, vector<8x16xf32>, vector<16x16xf32> -> vector<16x16xf32>
    %58 = arith.addf %57, %4 : vector<16x16xf32>
    %cst_43 = arith.constant dense<0xFF800000> : vector<16xf32>
    %59 = vector.multi_reduction <maximumf>, %58, %cst_43 [1] : vector<16x16xf32> to vector<16xf32>
    %60 = vector.shape_cast %59 : vector<16xf32> to vector<16x1xf32>
    %61 = vector.broadcast %60 : vector<16x1xf32> to vector<16x16xf32>
    %62 = arith.subf %58, %61 : vector<16x16xf32>
    %63 = math.exp %62 : vector<16x16xf32>
    %cst_44 = arith.constant dense<0.000000e+00> : vector<16xf32>
    %64 = vector.multi_reduction <add>, %63, %cst_44 [1] : vector<16x16xf32> to vector<16xf32>
    %65 = vector.shape_cast %64 : vector<16xf32> to vector<16x1xf32>
    %66 = tpu.reciprocal %65 {approx = true} : vector<16x1xf32> -> vector<16x1xf32>
    %67 = vector.broadcast %66 : vector<16x1xf32> to vector<16x16xf32>
    %68 = arith.mulf %63, %67 : vector<16x16xf32>
    %69 = vector.extract_strided_slice %28 {offsets = [0, 8], sizes = [16, 8], strides = [1, 1]} : vector<16x32xf32> to vector<16x8xf32>
    %cst_45 = arith.constant dense<0.000000e+00> : vector<16x8xf32>
    %70 = tpu.matmul %68, %69, %cst_45 {dimension_numbers = #tpu.dot_dimension_numbers<[1], [0], [0], [1], [0, 0, 1, 1], [], []>} : vector<16x16xf32>, vector<16x8xf32>, vector<16x8xf32> -> vector<16x8xf32>
    %71 = vector.extract_strided_slice %29 {offsets = [0, 16], sizes = [16, 8], strides = [1, 1]} : vector<16x32xf32> to vector<16x8xf32>
    %cst_46 = arith.constant 0.353553385 : f32
    %72 = vector.broadcast %cst_46 : f32 to vector<16x8xf32>
    %73 = arith.mulf %71, %72 : vector<16x8xf32>
    %74 = vector.extract_strided_slice %30 {offsets = [0, 16], sizes = [16, 8], strides = [1, 1]} : vector<16x32xf32> to vector<16x8xf32>
    %75 = tpu.transpose %74, [1, 0] : vector<16x8xf32> -> vector<8x16xf32>
    %cst_47 = arith.constant dense<0.000000e+00> : vector<16x16xf32>
    %76 = tpu.matmul %73, %75, %cst_47 {dimension_numbers = #tpu.dot_dimension_numbers<[1], [0], [0], [1], [0, 0, 1, 1], [], []>} : vector<16x8xf32>, vector<8x16xf32>, vector<16x16xf32> -> vector<16x16xf32>
    %77 = arith.addf %76, %4 : vector<16x16xf32>
    %cst_48 = arith.constant dense<0xFF800000> : vector<16xf32>
    %78 = vector.multi_reduction <maximumf>, %77, %cst_48 [1] : vector<16x16xf32> to vector<16xf32>
    %79 = vector.shape_cast %78 : vector<16xf32> to vector<16x1xf32>
    %80 = vector.broadcast %79 : vector<16x1xf32> to vector<16x16xf32>
    %81 = arith.subf %77, %80 : vector<16x16xf32>
    %82 = math.exp %81 : vector<16x16xf32>
    %cst_49 = arith.constant dense<0.000000e+00> : vector<16xf32>
    %83 = vector.multi_reduction <add>, %82, %cst_49 [1] : vector<16x16xf32> to vector<16xf32>
    %84 = vector.shape_cast %83 : vector<16xf32> to vector<16x1xf32>
    %85 = tpu.reciprocal %84 {approx = true} : vector<16x1xf32> -> vector<16x1xf32>
    %86 = vector.broadcast %85 : vector<16x1xf32> to vector<16x16xf32>
    %87 = arith.mulf %82, %86 : vector<16x16xf32>
    %88 = vector.extract_strided_slice %28 {offsets = [0, 16], sizes = [16, 8], strides = [1, 1]} : vector<16x32xf32> to vector<16x8xf32>
    %cst_50 = arith.constant dense<0.000000e+00> : vector<16x8xf32>
    %89 = tpu.matmul %87, %88, %cst_50 {dimension_numbers = #tpu.dot_dimension_numbers<[1], [0], [0], [1], [0, 0, 1, 1], [], []>} : vector<16x16xf32>, vector<16x8xf32>, vector<16x8xf32> -> vector<16x8xf32>
    %90 = vector.extract_strided_slice %29 {offsets = [0, 24], sizes = [16, 8], strides = [1, 1]} : vector<16x32xf32> to vector<16x8xf32>
    %cst_51 = arith.constant 0.353553385 : f32
    %91 = vector.broadcast %cst_51 : f32 to vector<16x8xf32>
    %92 = arith.mulf %90, %91 : vector<16x8xf32>
    %93 = vector.extract_strided_slice %30 {offsets = [0, 24], sizes = [16, 8], strides = [1, 1]} : vector<16x32xf32> to vector<16x8xf32>
    %94 = tpu.transpose %93, [1, 0] : vector<16x8xf32> -> vector<8x16xf32>
    %cst_52 = arith.constant dense<0.000000e+00> : vector<16x16xf32>
    %95 = tpu.matmul %92, %94, %cst_52 {dimension_numbers = #tpu.dot_dimension_numbers<[1], [0], [0], [1], [0, 0, 1, 1], [], []>} : vector<16x8xf32>, vector<8x16xf32>, vector<16x16xf32> -> vector<16x16xf32>
    %96 = arith.addf %95, %4 : vector<16x16xf32>
    %cst_53 = arith.constant dense<0xFF800000> : vector<16xf32>
    %97 = vector.multi_reduction <maximumf>, %96, %cst_53 [1] : vector<16x16xf32> to vector<16xf32>
    %98 = vector.shape_cast %97 : vector<16xf32> to vector<16x1xf32>
    %99 = vector.broadcast %98 : vector<16x1xf32> to vector<16x16xf32>
    %100 = arith.subf %96, %99 : vector<16x16xf32>
    %101 = math.exp %100 : vector<16x16xf32>
    %cst_54 = arith.constant dense<0.000000e+00> : vector<16xf32>
    %102 = vector.multi_reduction <add>, %101, %cst_54 [1] : vector<16x16xf32> to vector<16xf32>
    %103 = vector.shape_cast %102 : vector<16xf32> to vector<16x1xf32>
    %104 = tpu.reciprocal %103 {approx = true} : vector<16x1xf32> -> vector<16x1xf32>
    %105 = vector.broadcast %104 : vector<16x1xf32> to vector<16x16xf32>
    %106 = arith.mulf %101, %105 : vector<16x16xf32>
    %107 = vector.extract_strided_slice %28 {offsets = [0, 24], sizes = [16, 8], strides = [1, 1]} : vector<16x32xf32> to vector<16x8xf32>
    %cst_55 = arith.constant dense<0.000000e+00> : vector<16x8xf32>
    %108 = tpu.matmul %106, %107, %cst_55 {dimension_numbers = #tpu.dot_dimension_numbers<[1], [0], [0], [1], [0, 0, 1, 1], [], []>} : vector<16x16xf32>, vector<16x8xf32>, vector<16x8xf32> -> vector<16x8xf32>
    %109 = tpu.concatenate %51, %70, %89, %108 in 1 : vector<16x8xf32>, vector<16x8xf32>, vector<16x8xf32>, vector<16x8xf32> -> vector<16x32xf32>
    %cst_56 = arith.constant dense<0.000000e+00> : vector<16x32xf32>
    %110 = tpu.matmul %109, %31, %cst_56 {dimension_numbers = #tpu.dot_dimension_numbers<[1], [0], [0], [1], [0, 0, 1, 1], [], []>} : vector<16x32xf32>, vector<32x32xf32>, vector<16x32xf32> -> vector<16x32xf32>
    %111 = vector.broadcast %32 : vector<1x32xf32> to vector<16x32xf32>
    %112 = arith.addf %110, %111 : vector<16x32xf32>
    %113 = arith.addf %0, %112 : vector<16x32xf32>
    %114 = vector.extract_strided_slice %6 {offsets = [0, 0], sizes = [1, 32], strides = [1, 1]} : vector<8x32xf32> to vector<1x32xf32>
    %115 = vector.extract_strided_slice %6 {offsets = [1, 0], sizes = [1, 32], strides = [1, 1]} : vector<8x32xf32> to vector<1x32xf32>
    %cst_57 = arith.constant dense<0.000000e+00> : vector<16xf32>
    %116 = vector.multi_reduction <add>, %113, %cst_57 [1] : vector<16x32xf32> to vector<16xf32>
    %117 = vector.shape_cast %116 : vector<16xf32> to vector<16x1xf32>
    %cst_58 = arith.constant 3.200000e+01 : f32
    %118 = vector.broadcast %cst_58 : f32 to vector<16x1xf32>
    %119 = arith.divf %117, %118 : vector<16x1xf32>
    %120 = vector.broadcast %119 : vector<16x1xf32> to vector<16x32xf32>
    %121 = arith.subf %113, %120 : vector<16x32xf32>
    %122 = arith.mulf %121, %121 : vector<16x32xf32>
    %cst_59 = arith.constant dense<0.000000e+00> : vector<16xf32>
    %123 = vector.multi_reduction <add>, %122, %cst_59 [1] : vector<16x32xf32> to vector<16xf32>
    %124 = vector.shape_cast %123 : vector<16xf32> to vector<16x1xf32>
    %cst_60 = arith.constant 3.200000e+01 : f32
    %125 = vector.broadcast %cst_60 : f32 to vector<16x1xf32>
    %126 = arith.divf %124, %125 : vector<16x1xf32>
    %127 = vector.broadcast %119 : vector<16x1xf32> to vector<16x32xf32>
    %128 = arith.subf %113, %127 : vector<16x32xf32>
    %cst_61 = arith.constant 9.99999974E-6 : f32
    %129 = vector.broadcast %cst_61 : f32 to vector<16x1xf32>
    %130 = arith.addf %126, %129 : vector<16x1xf32>
    %131 = math.rsqrt %130 : vector<16x1xf32>
    %132 = vector.broadcast %131 : vector<16x1xf32> to vector<16x32xf32>
    %133 = arith.mulf %128, %132 : vector<16x32xf32>
    %134 = vector.broadcast %114 : vector<1x32xf32> to vector<16x32xf32>
    %135 = arith.mulf %133, %134 : vector<16x32xf32>
    %136 = vector.broadcast %115 : vector<1x32xf32> to vector<16x32xf32>
    %137 = arith.addf %135, %136 : vector<16x32xf32>
    %138 = arith.addf %137, %2 : vector<16x32xf32>
    %c0_62 = arith.constant 0 : index
    %c0_63 = arith.constant 0 : index
    %139 = vector.load %arg12[%c0_62, %c0_63] : memref<32x32xf32, #tpu.memory_space<vmem>>, vector<32x32xf32>
    %cst_64 = arith.constant dense<0.000000e+00> : vector<16x32xf32>
    %140 = tpu.matmul %138, %139, %cst_64 {dimension_numbers = #tpu.dot_dimension_numbers<[1], [0], [0], [1], [0, 0, 1, 1], [], []>} : vector<16x32xf32>, vector<32x32xf32>, vector<16x32xf32> -> vector<16x32xf32>
    %c0_65 = arith.constant 0 : index
    %c0_66 = arith.constant 0 : index
    %141 = vector.load %arg13[%c0_65, %c0_66] : memref<1x32xf32, #tpu.memory_space<vmem>>, vector<1x32xf32>
    %142 = vector.broadcast %141 : vector<1x32xf32> to vector<16x32xf32>
    %143 = arith.addf %140, %142 : vector<16x32xf32>
    %c0_67 = arith.constant 0 : index
    %c0_68 = arith.constant 0 : index
    %144 = vector.load %arg18[%c0_67, %c0_68] : memref<32x32xf32, #tpu.memory_space<vmem>>, vector<32x32xf32>
    %c0_69 = arith.constant 0 : index
    %c0_70 = arith.constant 0 : index
    %145 = vector.load %arg19[%c0_69, %c0_70] : memref<1x32xf32, #tpu.memory_space<vmem>>, vector<1x32xf32>
    %146 = vector.extract_strided_slice %143 {offsets = [0, 0], sizes = [16, 8], strides = [1, 1]} : vector<16x32xf32> to vector<16x8xf32>
    %cst_71 = arith.constant 0.353553385 : f32
    %147 = vector.broadcast %cst_71 : f32 to vector<16x8xf32>
    %148 = arith.mulf %146, %147 : vector<16x8xf32>
    %149 = vector.extract_strided_slice %12 {offsets = [0, 0], sizes = [32, 8], strides = [1, 1]} : vector<32x32xf32> to vector<32x8xf32>
    %150 = tpu.transpose %149, [1, 0] : vector<32x8xf32> -> vector<8x32xf32>
    %cst_72 = arith.constant dense<0.000000e+00> : vector<16x32xf32>
    %151 = tpu.matmul %148, %150, %cst_72 {dimension_numbers = #tpu.dot_dimension_numbers<[1], [0], [0], [1], [0, 0, 1, 1], [], []>} : vector<16x8xf32>, vector<8x32xf32>, vector<16x32xf32> -> vector<16x32xf32>
    %152 = arith.addf %151, %5 : vector<16x32xf32>
    %cst_73 = arith.constant dense<0xFF800000> : vector<16xf32>
    %153 = vector.multi_reduction <maximumf>, %152, %cst_73 [1] : vector<16x32xf32> to vector<16xf32>
    %154 = vector.shape_cast %153 : vector<16xf32> to vector<16x1xf32>
    %155 = vector.broadcast %154 : vector<16x1xf32> to vector<16x32xf32>
    %156 = arith.subf %152, %155 : vector<16x32xf32>
    %157 = math.exp %156 : vector<16x32xf32>
    %cst_74 = arith.constant dense<0.000000e+00> : vector<16xf32>
    %158 = vector.multi_reduction <add>, %157, %cst_74 [1] : vector<16x32xf32> to vector<16xf32>
    %159 = vector.shape_cast %158 : vector<16xf32> to vector<16x1xf32>
    %160 = tpu.reciprocal %159 {approx = true} : vector<16x1xf32> -> vector<16x1xf32>
    %161 = vector.broadcast %160 : vector<16x1xf32> to vector<16x32xf32>
    %162 = arith.mulf %157, %161 : vector<16x32xf32>
    %163 = vector.extract_strided_slice %17 {offsets = [0, 0], sizes = [32, 8], strides = [1, 1]} : vector<32x32xf32> to vector<32x8xf32>
    %cst_75 = arith.constant dense<0.000000e+00> : vector<16x8xf32>
    %164 = tpu.matmul %162, %163, %cst_75 {dimension_numbers = #tpu.dot_dimension_numbers<[1], [0], [0], [1], [0, 0, 1, 1], [], []>} : vector<16x32xf32>, vector<32x8xf32>, vector<16x8xf32> -> vector<16x8xf32>
    %165 = vector.extract_strided_slice %143 {offsets = [0, 8], sizes = [16, 8], strides = [1, 1]} : vector<16x32xf32> to vector<16x8xf32>
    %cst_76 = arith.constant 0.353553385 : f32
    %166 = vector.broadcast %cst_76 : f32 to vector<16x8xf32>
    %167 = arith.mulf %165, %166 : vector<16x8xf32>
    %168 = vector.extract_strided_slice %12 {offsets = [0, 8], sizes = [32, 8], strides = [1, 1]} : vector<32x32xf32> to vector<32x8xf32>
    %169 = tpu.transpose %168, [1, 0] : vector<32x8xf32> -> vector<8x32xf32>
    %cst_77 = arith.constant dense<0.000000e+00> : vector<16x32xf32>
    %170 = tpu.matmul %167, %169, %cst_77 {dimension_numbers = #tpu.dot_dimension_numbers<[1], [0], [0], [1], [0, 0, 1, 1], [], []>} : vector<16x8xf32>, vector<8x32xf32>, vector<16x32xf32> -> vector<16x32xf32>
    %171 = arith.addf %170, %5 : vector<16x32xf32>
    %cst_78 = arith.constant dense<0xFF800000> : vector<16xf32>
    %172 = vector.multi_reduction <maximumf>, %171, %cst_78 [1] : vector<16x32xf32> to vector<16xf32>
    %173 = vector.shape_cast %172 : vector<16xf32> to vector<16x1xf32>
    %174 = vector.broadcast %173 : vector<16x1xf32> to vector<16x32xf32>
    %175 = arith.subf %171, %174 : vector<16x32xf32>
    %176 = math.exp %175 : vector<16x32xf32>
    %cst_79 = arith.constant dense<0.000000e+00> : vector<16xf32>
    %177 = vector.multi_reduction <add>, %176, %cst_79 [1] : vector<16x32xf32> to vector<16xf32>
    %178 = vector.shape_cast %177 : vector<16xf32> to vector<16x1xf32>
    %179 = tpu.reciprocal %178 {approx = true} : vector<16x1xf32> -> vector<16x1xf32>
    %180 = vector.broadcast %179 : vector<16x1xf32> to vector<16x32xf32>
    %181 = arith.mulf %176, %180 : vector<16x32xf32>
    %182 = vector.extract_strided_slice %17 {offsets = [0, 8], sizes = [32, 8], strides = [1, 1]} : vector<32x32xf32> to vector<32x8xf32>
    %cst_80 = arith.constant dense<0.000000e+00> : vector<16x8xf32>
    %183 = tpu.matmul %181, %182, %cst_80 {dimension_numbers = #tpu.dot_dimension_numbers<[1], [0], [0], [1], [0, 0, 1, 1], [], []>} : vector<16x32xf32>, vector<32x8xf32>, vector<16x8xf32> -> vector<16x8xf32>
    %184 = vector.extract_strided_slice %143 {offsets = [0, 16], sizes = [16, 8], strides = [1, 1]} : vector<16x32xf32> to vector<16x8xf32>
    %cst_81 = arith.constant 0.353553385 : f32
    %185 = vector.broadcast %cst_81 : f32 to vector<16x8xf32>
    %186 = arith.mulf %184, %185 : vector<16x8xf32>
    %187 = vector.extract_strided_slice %12 {offsets = [0, 16], sizes = [32, 8], strides = [1, 1]} : vector<32x32xf32> to vector<32x8xf32>
    %188 = tpu.transpose %187, [1, 0] : vector<32x8xf32> -> vector<8x32xf32>
    %cst_82 = arith.constant dense<0.000000e+00> : vector<16x32xf32>
    %189 = tpu.matmul %186, %188, %cst_82 {dimension_numbers = #tpu.dot_dimension_numbers<[1], [0], [0], [1], [0, 0, 1, 1], [], []>} : vector<16x8xf32>, vector<8x32xf32>, vector<16x32xf32> -> vector<16x32xf32>
    %190 = arith.addf %189, %5 : vector<16x32xf32>
    %cst_83 = arith.constant dense<0xFF800000> : vector<16xf32>
    %191 = vector.multi_reduction <maximumf>, %190, %cst_83 [1] : vector<16x32xf32> to vector<16xf32>
    %192 = vector.shape_cast %191 : vector<16xf32> to vector<16x1xf32>
    %193 = vector.broadcast %192 : vector<16x1xf32> to vector<16x32xf32>
    %194 = arith.subf %190, %193 : vector<16x32xf32>
    %195 = math.exp %194 : vector<16x32xf32>
    %cst_84 = arith.constant dense<0.000000e+00> : vector<16xf32>
    %196 = vector.multi_reduction <add>, %195, %cst_84 [1] : vector<16x32xf32> to vector<16xf32>
    %197 = vector.shape_cast %196 : vector<16xf32> to vector<16x1xf32>
    %198 = tpu.reciprocal %197 {approx = true} : vector<16x1xf32> -> vector<16x1xf32>
    %199 = vector.broadcast %198 : vector<16x1xf32> to vector<16x32xf32>
    %200 = arith.mulf %195, %199 : vector<16x32xf32>
    %201 = vector.extract_strided_slice %17 {offsets = [0, 16], sizes = [32, 8], strides = [1, 1]} : vector<32x32xf32> to vector<32x8xf32>
    %cst_85 = arith.constant dense<0.000000e+00> : vector<16x8xf32>
    %202 = tpu.matmul %200, %201, %cst_85 {dimension_numbers = #tpu.dot_dimension_numbers<[1], [0], [0], [1], [0, 0, 1, 1], [], []>} : vector<16x32xf32>, vector<32x8xf32>, vector<16x8xf32> -> vector<16x8xf32>
    %203 = vector.extract_strided_slice %143 {offsets = [0, 24], sizes = [16, 8], strides = [1, 1]} : vector<16x32xf32> to vector<16x8xf32>
    %cst_86 = arith.constant 0.353553385 : f32
    %204 = vector.broadcast %cst_86 : f32 to vector<16x8xf32>
    %205 = arith.mulf %203, %204 : vector<16x8xf32>
    %206 = vector.extract_strided_slice %12 {offsets = [0, 24], sizes = [32, 8], strides = [1, 1]} : vector<32x32xf32> to vector<32x8xf32>
    %207 = tpu.transpose %206, [1, 0] : vector<32x8xf32> -> vector<8x32xf32>
    %cst_87 = arith.constant dense<0.000000e+00> : vector<16x32xf32>
    %208 = tpu.matmul %205, %207, %cst_87 {dimension_numbers = #tpu.dot_dimension_numbers<[1], [0], [0], [1], [0, 0, 1, 1], [], []>} : vector<16x8xf32>, vector<8x32xf32>, vector<16x32xf32> -> vector<16x32xf32>
    %209 = arith.addf %208, %5 : vector<16x32xf32>
    %cst_88 = arith.constant dense<0xFF800000> : vector<16xf32>
    %210 = vector.multi_reduction <maximumf>, %209, %cst_88 [1] : vector<16x32xf32> to vector<16xf32>
    %211 = vector.shape_cast %210 : vector<16xf32> to vector<16x1xf32>
    %212 = vector.broadcast %211 : vector<16x1xf32> to vector<16x32xf32>
    %213 = arith.subf %209, %212 : vector<16x32xf32>
    %214 = math.exp %213 : vector<16x32xf32>
    %cst_89 = arith.constant dense<0.000000e+00> : vector<16xf32>
    %215 = vector.multi_reduction <add>, %214, %cst_89 [1] : vector<16x32xf32> to vector<16xf32>
    %216 = vector.shape_cast %215 : vector<16xf32> to vector<16x1xf32>
    %217 = tpu.reciprocal %216 {approx = true} : vector<16x1xf32> -> vector<16x1xf32>
    %218 = vector.broadcast %217 : vector<16x1xf32> to vector<16x32xf32>
    %219 = arith.mulf %214, %218 : vector<16x32xf32>
    %220 = vector.extract_strided_slice %17 {offsets = [0, 24], sizes = [32, 8], strides = [1, 1]} : vector<32x32xf32> to vector<32x8xf32>
    %cst_90 = arith.constant dense<0.000000e+00> : vector<16x8xf32>
    %221 = tpu.matmul %219, %220, %cst_90 {dimension_numbers = #tpu.dot_dimension_numbers<[1], [0], [0], [1], [0, 0, 1, 1], [], []>} : vector<16x32xf32>, vector<32x8xf32>, vector<16x8xf32> -> vector<16x8xf32>
    %222 = tpu.concatenate %164, %183, %202, %221 in 1 : vector<16x8xf32>, vector<16x8xf32>, vector<16x8xf32>, vector<16x8xf32> -> vector<16x32xf32>
    %cst_91 = arith.constant dense<0.000000e+00> : vector<16x32xf32>
    %223 = tpu.matmul %222, %144, %cst_91 {dimension_numbers = #tpu.dot_dimension_numbers<[1], [0], [0], [1], [0, 0, 1, 1], [], []>} : vector<16x32xf32>, vector<32x32xf32>, vector<16x32xf32> -> vector<16x32xf32>
    %224 = vector.broadcast %145 : vector<1x32xf32> to vector<16x32xf32>
    %225 = arith.addf %223, %224 : vector<16x32xf32>
    %226 = arith.addf %137, %225 : vector<16x32xf32>
    %227 = vector.extract_strided_slice %6 {offsets = [2, 0], sizes = [1, 32], strides = [1, 1]} : vector<8x32xf32> to vector<1x32xf32>
    %228 = vector.extract_strided_slice %6 {offsets = [3, 0], sizes = [1, 32], strides = [1, 1]} : vector<8x32xf32> to vector<1x32xf32>
    %cst_92 = arith.constant dense<0.000000e+00> : vector<16xf32>
    %229 = vector.multi_reduction <add>, %226, %cst_92 [1] : vector<16x32xf32> to vector<16xf32>
    %230 = vector.shape_cast %229 : vector<16xf32> to vector<16x1xf32>
    %cst_93 = arith.constant 3.200000e+01 : f32
    %231 = vector.broadcast %cst_93 : f32 to vector<16x1xf32>
    %232 = arith.divf %230, %231 : vector<16x1xf32>
    %233 = vector.broadcast %232 : vector<16x1xf32> to vector<16x32xf32>
    %234 = arith.subf %226, %233 : vector<16x32xf32>
    %235 = arith.mulf %234, %234 : vector<16x32xf32>
    %cst_94 = arith.constant dense<0.000000e+00> : vector<16xf32>
    %236 = vector.multi_reduction <add>, %235, %cst_94 [1] : vector<16x32xf32> to vector<16xf32>
    %237 = vector.shape_cast %236 : vector<16xf32> to vector<16x1xf32>
    %cst_95 = arith.constant 3.200000e+01 : f32
    %238 = vector.broadcast %cst_95 : f32 to vector<16x1xf32>
    %239 = arith.divf %237, %238 : vector<16x1xf32>
    %240 = vector.broadcast %232 : vector<16x1xf32> to vector<16x32xf32>
    %241 = arith.subf %226, %240 : vector<16x32xf32>
    %cst_96 = arith.constant 9.99999974E-6 : f32
    %242 = vector.broadcast %cst_96 : f32 to vector<16x1xf32>
    %243 = arith.addf %239, %242 : vector<16x1xf32>
    %244 = math.rsqrt %243 : vector<16x1xf32>
    %245 = vector.broadcast %244 : vector<16x1xf32> to vector<16x32xf32>
    %246 = arith.mulf %241, %245 : vector<16x32xf32>
    %247 = vector.broadcast %227 : vector<1x32xf32> to vector<16x32xf32>
    %248 = arith.mulf %246, %247 : vector<16x32xf32>
    %249 = vector.broadcast %228 : vector<1x32xf32> to vector<16x32xf32>
    %250 = arith.addf %248, %249 : vector<16x32xf32>
    %c0_97 = arith.constant 0 : index
    %c0_98 = arith.constant 0 : index
    %251 = vector.load %arg21[%c0_97, %c0_98] : memref<32x64xf32, #tpu.memory_space<vmem>>, vector<32x64xf32>
    %cst_99 = arith.constant dense<0.000000e+00> : vector<16x64xf32>
    %252 = tpu.matmul %250, %251, %cst_99 {dimension_numbers = #tpu.dot_dimension_numbers<[1], [0], [0], [1], [0, 0, 1, 1], [], []>} : vector<16x32xf32>, vector<32x64xf32>, vector<16x64xf32> -> vector<16x64xf32>
    %c0_100 = arith.constant 0 : index
    %c0_101 = arith.constant 0 : index
    %253 = vector.load %arg22[%c0_100, %c0_101] : memref<1x64xf32, #tpu.memory_space<vmem>>, vector<1x64xf32>
    %254 = vector.broadcast %253 : vector<1x64xf32> to vector<16x64xf32>
    %255 = arith.addf %252, %254 : vector<16x64xf32>
    %cst_102 = arith.constant 0.000000e+00 : f32
    %256 = vector.broadcast %cst_102 : f32 to vector<16x64xf32>
    %257 = arith.maximumf %255, %256 : vector<16x64xf32>
    %c0_103 = arith.constant 0 : index
    %c0_104 = arith.constant 0 : index
    %258 = vector.load %arg23[%c0_103, %c0_104] : memref<64x32xf32, #tpu.memory_space<vmem>>, vector<64x32xf32>
    %cst_105 = arith.constant dense<0.000000e+00> : vector<16x32xf32>
    %259 = tpu.matmul %257, %258, %cst_105 {dimension_numbers = #tpu.dot_dimension_numbers<[1], [0], [0], [1], [0, 0, 1, 1], [], []>} : vector<16x64xf32>, vector<64x32xf32>, vector<16x32xf32> -> vector<16x32xf32>
    %c0_106 = arith.constant 0 : index
    %c0_107 = arith.constant 0 : index
    %260 = vector.load %arg24[%c0_106, %c0_107] : memref<1x32xf32, #tpu.memory_space<vmem>>, vector<1x32xf32>
    %261 = vector.broadcast %260 : vector<1x32xf32> to vector<16x32xf32>
    %262 = arith.addf %259, %261 : vector<16x32xf32>
    %263 = arith.addf %250, %262 : vector<16x32xf32>
    %264 = vector.extract_strided_slice %6 {offsets = [4, 0], sizes = [1, 32], strides = [1, 1]} : vector<8x32xf32> to vector<1x32xf32>
    %265 = vector.extract_strided_slice %6 {offsets = [5, 0], sizes = [1, 32], strides = [1, 1]} : vector<8x32xf32> to vector<1x32xf32>
    %cst_108 = arith.constant dense<0.000000e+00> : vector<16xf32>
    %266 = vector.multi_reduction <add>, %263, %cst_108 [1] : vector<16x32xf32> to vector<16xf32>
    %267 = vector.shape_cast %266 : vector<16xf32> to vector<16x1xf32>
    %cst_109 = arith.constant 3.200000e+01 : f32
    %268 = vector.broadcast %cst_109 : f32 to vector<16x1xf32>
    %269 = arith.divf %267, %268 : vector<16x1xf32>
    %270 = vector.broadcast %269 : vector<16x1xf32> to vector<16x32xf32>
    %271 = arith.subf %263, %270 : vector<16x32xf32>
    %272 = arith.mulf %271, %271 : vector<16x32xf32>
    %cst_110 = arith.constant dense<0.000000e+00> : vector<16xf32>
    %273 = vector.multi_reduction <add>, %272, %cst_110 [1] : vector<16x32xf32> to vector<16xf32>
    %274 = vector.shape_cast %273 : vector<16xf32> to vector<16x1xf32>
    %cst_111 = arith.constant 3.200000e+01 : f32
    %275 = vector.broadcast %cst_111 : f32 to vector<16x1xf32>
    %276 = arith.divf %274, %275 : vector<16x1xf32>
    %277 = vector.broadcast %269 : vector<16x1xf32> to vector<16x32xf32>
    %278 = arith.subf %263, %277 : vector<16x32xf32>
    %cst_112 = arith.constant 9.99999974E-6 : f32
    %279 = vector.broadcast %cst_112 : f32 to vector<16x1xf32>
    %280 = arith.addf %276, %279 : vector<16x1xf32>
    %281 = math.rsqrt %280 : vector<16x1xf32>
    %282 = vector.broadcast %281 : vector<16x1xf32> to vector<16x32xf32>
    %283 = arith.mulf %278, %282 : vector<16x32xf32>
    %284 = vector.broadcast %264 : vector<1x32xf32> to vector<16x32xf32>
    %285 = arith.mulf %283, %284 : vector<16x32xf32>
    %286 = vector.broadcast %265 : vector<1x32xf32> to vector<16x32xf32>
    %287 = arith.addf %285, %286 : vector<16x32xf32>
    %288 = arith.addf %287, %2 : vector<16x32xf32>
    %c0_113 = arith.constant 0 : index
    %c0_114 = arith.constant 0 : index
    %289 = vector.load %arg6[%c0_113, %c0_114] : memref<32x64xf32, #tpu.memory_space<vmem>>, vector<32x64xf32>
    %cst_115 = arith.constant dense<0.000000e+00> : vector<16x64xf32>
    %290 = tpu.matmul %288, %289, %cst_115 {dimension_numbers = #tpu.dot_dimension_numbers<[1], [0], [0], [1], [0, 0, 1, 1], [], []>} : vector<16x32xf32>, vector<32x64xf32>, vector<16x64xf32> -> vector<16x64xf32>
    %c0_116 = arith.constant 0 : index
    %c0_117 = arith.constant 0 : index
    %291 = vector.load %arg7[%c0_116, %c0_117] : memref<1x64xf32, #tpu.memory_space<vmem>>, vector<1x64xf32>
    %292 = vector.broadcast %291 : vector<1x64xf32> to vector<16x64xf32>
    %293 = arith.addf %290, %292 : vector<16x64xf32>
    %c0_118 = arith.constant 0 : index
    %c0_119 = arith.constant 0 : index
    %294 = vector.load %arg8[%c0_118, %c0_119] : memref<32x32xf32, #tpu.memory_space<vmem>>, vector<32x32xf32>
    %cst_120 = arith.constant dense<0.000000e+00> : vector<16x32xf32>
    %295 = tpu.matmul %287, %294, %cst_120 {dimension_numbers = #tpu.dot_dimension_numbers<[1], [0], [0], [1], [0, 0, 1, 1], [], []>} : vector<16x32xf32>, vector<32x32xf32>, vector<16x32xf32> -> vector<16x32xf32>
    %c0_121 = arith.constant 0 : index
    %c0_122 = arith.constant 0 : index
    %296 = vector.load %arg9[%c0_121, %c0_122] : memref<1x32xf32, #tpu.memory_space<vmem>>, vector<1x32xf32>
    %297 = vector.broadcast %296 : vector<1x32xf32> to vector<16x32xf32>
    %298 = arith.addf %295, %297 : vector<16x32xf32>
    %299 = vector.extract_strided_slice %293 {offsets = [0, 0], sizes = [16, 32], strides = [1, 1]} : vector<16x64xf32> to vector<16x32xf32>
    %300 = vector.extract_strided_slice %293 {offsets = [0, 32], sizes = [16, 32], strides = [1, 1]} : vector<16x64xf32> to vector<16x32xf32>
    %c0_123 = arith.constant 0 : index
    %c0_124 = arith.constant 0 : index
    %301 = vector.load %arg10[%c0_123, %c0_124] : memref<32x32xf32, #tpu.memory_space<vmem>>, vector<32x32xf32>
    %c0_125 = arith.constant 0 : index
    %c0_126 = arith.constant 0 : index
    %302 = vector.load %arg11[%c0_125, %c0_126] : memref<1x32xf32, #tpu.memory_space<vmem>>, vector<1x32xf32>
    %303 = vector.extract_strided_slice %299 {offsets = [0, 0], sizes = [16, 8], strides = [1, 1]} : vector<16x32xf32> to vector<16x8xf32>
    %cst_127 = arith.constant 0.353553385 : f32
    %304 = vector.broadcast %cst_127 : f32 to vector<16x8xf32>
    %305 = arith.mulf %303, %304 : vector<16x8xf32>
    %306 = vector.extract_strided_slice %300 {offsets = [0, 0], sizes = [16, 8], strides = [1, 1]} : vector<16x32xf32> to vector<16x8xf32>
    %307 = tpu.transpose %306, [1, 0] : vector<16x8xf32> -> vector<8x16xf32>
    %cst_128 = arith.constant dense<0.000000e+00> : vector<16x16xf32>
    %308 = tpu.matmul %305, %307, %cst_128 {dimension_numbers = #tpu.dot_dimension_numbers<[1], [0], [0], [1], [0, 0, 1, 1], [], []>} : vector<16x8xf32>, vector<8x16xf32>, vector<16x16xf32> -> vector<16x16xf32>
    %309 = arith.addf %308, %4 : vector<16x16xf32>
    %cst_129 = arith.constant dense<0xFF800000> : vector<16xf32>
    %310 = vector.multi_reduction <maximumf>, %309, %cst_129 [1] : vector<16x16xf32> to vector<16xf32>
    %311 = vector.shape_cast %310 : vector<16xf32> to vector<16x1xf32>
    %312 = vector.broadcast %311 : vector<16x1xf32> to vector<16x16xf32>
    %313 = arith.subf %309, %312 : vector<16x16xf32>
    %314 = math.exp %313 : vector<16x16xf32>
    %cst_130 = arith.constant dense<0.000000e+00> : vector<16xf32>
    %315 = vector.multi_reduction <add>, %314, %cst_130 [1] : vector<16x16xf32> to vector<16xf32>
    %316 = vector.shape_cast %315 : vector<16xf32> to vector<16x1xf32>
    %317 = tpu.reciprocal %316 {approx = true} : vector<16x1xf32> -> vector<16x1xf32>
    %318 = vector.broadcast %317 : vector<16x1xf32> to vector<16x16xf32>
    %319 = arith.mulf %314, %318 : vector<16x16xf32>
    %320 = vector.extract_strided_slice %298 {offsets = [0, 0], sizes = [16, 8], strides = [1, 1]} : vector<16x32xf32> to vector<16x8xf32>
    %cst_131 = arith.constant dense<0.000000e+00> : vector<16x8xf32>
    %321 = tpu.matmul %319, %320, %cst_131 {dimension_numbers = #tpu.dot_dimension_numbers<[1], [0], [0], [1], [0, 0, 1, 1], [], []>} : vector<16x16xf32>, vector<16x8xf32>, vector<16x8xf32> -> vector<16x8xf32>
    %322 = vector.extract_strided_slice %299 {offsets = [0, 8], sizes = [16, 8], strides = [1, 1]} : vector<16x32xf32> to vector<16x8xf32>
    %cst_132 = arith.constant 0.353553385 : f32
    %323 = vector.broadcast %cst_132 : f32 to vector<16x8xf32>
    %324 = arith.mulf %322, %323 : vector<16x8xf32>
    %325 = vector.extract_strided_slice %300 {offsets = [0, 8], sizes = [16, 8], strides = [1, 1]} : vector<16x32xf32> to vector<16x8xf32>
    %326 = tpu.transpose %325, [1, 0] : vector<16x8xf32> -> vector<8x16xf32>
    %cst_133 = arith.constant dense<0.000000e+00> : vector<16x16xf32>
    %327 = tpu.matmul %324, %326, %cst_133 {dimension_numbers = #tpu.dot_dimension_numbers<[1], [0], [0], [1], [0, 0, 1, 1], [], []>} : vector<16x8xf32>, vector<8x16xf32>, vector<16x16xf32> -> vector<16x16xf32>
    %328 = arith.addf %327, %4 : vector<16x16xf32>
    %cst_134 = arith.constant dense<0xFF800000> : vector<16xf32>
    %329 = vector.multi_reduction <maximumf>, %328, %cst_134 [1] : vector<16x16xf32> to vector<16xf32>
    %330 = vector.shape_cast %329 : vector<16xf32> to vector<16x1xf32>
    %331 = vector.broadcast %330 : vector<16x1xf32> to vector<16x16xf32>
    %332 = arith.subf %328, %331 : vector<16x16xf32>
    %333 = math.exp %332 : vector<16x16xf32>
    %cst_135 = arith.constant dense<0.000000e+00> : vector<16xf32>
    %334 = vector.multi_reduction <add>, %333, %cst_135 [1] : vector<16x16xf32> to vector<16xf32>
    %335 = vector.shape_cast %334 : vector<16xf32> to vector<16x1xf32>
    %336 = tpu.reciprocal %335 {approx = true} : vector<16x1xf32> -> vector<16x1xf32>
    %337 = vector.broadcast %336 : vector<16x1xf32> to vector<16x16xf32>
    %338 = arith.mulf %333, %337 : vector<16x16xf32>
    %339 = vector.extract_strided_slice %298 {offsets = [0, 8], sizes = [16, 8], strides = [1, 1]} : vector<16x32xf32> to vector<16x8xf32>
    %cst_136 = arith.constant dense<0.000000e+00> : vector<16x8xf32>
    %340 = tpu.matmul %338, %339, %cst_136 {dimension_numbers = #tpu.dot_dimension_numbers<[1], [0], [0], [1], [0, 0, 1, 1], [], []>} : vector<16x16xf32>, vector<16x8xf32>, vector<16x8xf32> -> vector<16x8xf32>
    %341 = vector.extract_strided_slice %299 {offsets = [0, 16], sizes = [16, 8], strides = [1, 1]} : vector<16x32xf32> to vector<16x8xf32>
    %cst_137 = arith.constant 0.353553385 : f32
    %342 = vector.broadcast %cst_137 : f32 to vector<16x8xf32>
    %343 = arith.mulf %341, %342 : vector<16x8xf32>
    %344 = vector.extract_strided_slice %300 {offsets = [0, 16], sizes = [16, 8], strides = [1, 1]} : vector<16x32xf32> to vector<16x8xf32>
    %345 = tpu.transpose %344, [1, 0] : vector<16x8xf32> -> vector<8x16xf32>
    %cst_138 = arith.constant dense<0.000000e+00> : vector<16x16xf32>
    %346 = tpu.matmul %343, %345, %cst_138 {dimension_numbers = #tpu.dot_dimension_numbers<[1], [0], [0], [1], [0, 0, 1, 1], [], []>} : vector<16x8xf32>, vector<8x16xf32>, vector<16x16xf32> -> vector<16x16xf32>
    %347 = arith.addf %346, %4 : vector<16x16xf32>
    %cst_139 = arith.constant dense<0xFF800000> : vector<16xf32>
    %348 = vector.multi_reduction <maximumf>, %347, %cst_139 [1] : vector<16x16xf32> to vector<16xf32>
    %349 = vector.shape_cast %348 : vector<16xf32> to vector<16x1xf32>
    %350 = vector.broadcast %349 : vector<16x1xf32> to vector<16x16xf32>
    %351 = arith.subf %347, %350 : vector<16x16xf32>
    %352 = math.exp %351 : vector<16x16xf32>
    %cst_140 = arith.constant dense<0.000000e+00> : vector<16xf32>
    %353 = vector.multi_reduction <add>, %352, %cst_140 [1] : vector<16x16xf32> to vector<16xf32>
    %354 = vector.shape_cast %353 : vector<16xf32> to vector<16x1xf32>
    %355 = tpu.reciprocal %354 {approx = true} : vector<16x1xf32> -> vector<16x1xf32>
    %356 = vector.broadcast %355 : vector<16x1xf32> to vector<16x16xf32>
    %357 = arith.mulf %352, %356 : vector<16x16xf32>
    %358 = vector.extract_strided_slice %298 {offsets = [0, 16], sizes = [16, 8], strides = [1, 1]} : vector<16x32xf32> to vector<16x8xf32>
    %cst_141 = arith.constant dense<0.000000e+00> : vector<16x8xf32>
    %359 = tpu.matmul %357, %358, %cst_141 {dimension_numbers = #tpu.dot_dimension_numbers<[1], [0], [0], [1], [0, 0, 1, 1], [], []>} : vector<16x16xf32>, vector<16x8xf32>, vector<16x8xf32> -> vector<16x8xf32>
    %360 = vector.extract_strided_slice %299 {offsets = [0, 24], sizes = [16, 8], strides = [1, 1]} : vector<16x32xf32> to vector<16x8xf32>
    %cst_142 = arith.constant 0.353553385 : f32
    %361 = vector.broadcast %cst_142 : f32 to vector<16x8xf32>
    %362 = arith.mulf %360, %361 : vector<16x8xf32>
    %363 = vector.extract_strided_slice %300 {offsets = [0, 24], sizes = [16, 8], strides = [1, 1]} : vector<16x32xf32> to vector<16x8xf32>
    %364 = tpu.transpose %363, [1, 0] : vector<16x8xf32> -> vector<8x16xf32>
    %cst_143 = arith.constant dense<0.000000e+00> : vector<16x16xf32>
    %365 = tpu.matmul %362, %364, %cst_143 {dimension_numbers = #tpu.dot_dimension_numbers<[1], [0], [0], [1], [0, 0, 1, 1], [], []>} : vector<16x8xf32>, vector<8x16xf32>, vector<16x16xf32> -> vector<16x16xf32>
    %366 = arith.addf %365, %4 : vector<16x16xf32>
    %cst_144 = arith.constant dense<0xFF800000> : vector<16xf32>
    %367 = vector.multi_reduction <maximumf>, %366, %cst_144 [1] : vector<16x16xf32> to vector<16xf32>
    %368 = vector.shape_cast %367 : vector<16xf32> to vector<16x1xf32>
    %369 = vector.broadcast %368 : vector<16x1xf32> to vector<16x16xf32>
    %370 = arith.subf %366, %369 : vector<16x16xf32>
    %371 = math.exp %370 : vector<16x16xf32>
    %cst_145 = arith.constant dense<0.000000e+00> : vector<16xf32>
    %372 = vector.multi_reduction <add>, %371, %cst_145 [1] : vector<16x16xf32> to vector<16xf32>
    %373 = vector.shape_cast %372 : vector<16xf32> to vector<16x1xf32>
    %374 = tpu.reciprocal %373 {approx = true} : vector<16x1xf32> -> vector<16x1xf32>
    %375 = vector.broadcast %374 : vector<16x1xf32> to vector<16x16xf32>
    %376 = arith.mulf %371, %375 : vector<16x16xf32>
    %377 = vector.extract_strided_slice %298 {offsets = [0, 24], sizes = [16, 8], strides = [1, 1]} : vector<16x32xf32> to vector<16x8xf32>
    %cst_146 = arith.constant dense<0.000000e+00> : vector<16x8xf32>
    %378 = tpu.matmul %376, %377, %cst_146 {dimension_numbers = #tpu.dot_dimension_numbers<[1], [0], [0], [1], [0, 0, 1, 1], [], []>} : vector<16x16xf32>, vector<16x8xf32>, vector<16x8xf32> -> vector<16x8xf32>
    %379 = tpu.concatenate %321, %340, %359, %378 in 1 : vector<16x8xf32>, vector<16x8xf32>, vector<16x8xf32>, vector<16x8xf32> -> vector<16x32xf32>
    %cst_147 = arith.constant dense<0.000000e+00> : vector<16x32xf32>
    %380 = tpu.matmul %379, %301, %cst_147 {dimension_numbers = #tpu.dot_dimension_numbers<[1], [0], [0], [1], [0, 0, 1, 1], [], []>} : vector<16x32xf32>, vector<32x32xf32>, vector<16x32xf32> -> vector<16x32xf32>
    %381 = vector.broadcast %302 : vector<1x32xf32> to vector<16x32xf32>
    %382 = arith.addf %380, %381 : vector<16x32xf32>
    %383 = arith.addf %287, %382 : vector<16x32xf32>
    %384 = vector.extract_strided_slice %6 {offsets = [0, 0], sizes = [1, 32], strides = [1, 1]} : vector<8x32xf32> to vector<1x32xf32>
    %385 = vector.extract_strided_slice %6 {offsets = [1, 0], sizes = [1, 32], strides = [1, 1]} : vector<8x32xf32> to vector<1x32xf32>
    %cst_148 = arith.constant dense<0.000000e+00> : vector<16xf32>
    %386 = vector.multi_reduction <add>, %383, %cst_148 [1] : vector<16x32xf32> to vector<16xf32>
    %387 = vector.shape_cast %386 : vector<16xf32> to vector<16x1xf32>
    %cst_149 = arith.constant 3.200000e+01 : f32
    %388 = vector.broadcast %cst_149 : f32 to vector<16x1xf32>
    %389 = arith.divf %387, %388 : vector<16x1xf32>
    %390 = vector.broadcast %389 : vector<16x1xf32> to vector<16x32xf32>
    %391 = arith.subf %383, %390 : vector<16x32xf32>
    %392 = arith.mulf %391, %391 : vector<16x32xf32>
    %cst_150 = arith.constant dense<0.000000e+00> : vector<16xf32>
    %393 = vector.multi_reduction <add>, %392, %cst_150 [1] : vector<16x32xf32> to vector<16xf32>
    %394 = vector.shape_cast %393 : vector<16xf32> to vector<16x1xf32>
    %cst_151 = arith.constant 3.200000e+01 : f32
    %395 = vector.broadcast %cst_151 : f32 to vector<16x1xf32>
    %396 = arith.divf %394, %395 : vector<16x1xf32>
    %397 = vector.broadcast %389 : vector<16x1xf32> to vector<16x32xf32>
    %398 = arith.subf %383, %397 : vector<16x32xf32>
    %cst_152 = arith.constant 9.99999974E-6 : f32
    %399 = vector.broadcast %cst_152 : f32 to vector<16x1xf32>
    %400 = arith.addf %396, %399 : vector<16x1xf32>
    %401 = math.rsqrt %400 : vector<16x1xf32>
    %402 = vector.broadcast %401 : vector<16x1xf32> to vector<16x32xf32>
    %403 = arith.mulf %398, %402 : vector<16x32xf32>
    %404 = vector.broadcast %384 : vector<1x32xf32> to vector<16x32xf32>
    %405 = arith.mulf %403, %404 : vector<16x32xf32>
    %406 = vector.broadcast %385 : vector<1x32xf32> to vector<16x32xf32>
    %407 = arith.addf %405, %406 : vector<16x32xf32>
    %408 = arith.addf %407, %2 : vector<16x32xf32>
    %c0_153 = arith.constant 0 : index
    %c0_154 = arith.constant 0 : index
    %409 = vector.load %arg12[%c0_153, %c0_154] : memref<32x32xf32, #tpu.memory_space<vmem>>, vector<32x32xf32>
    %cst_155 = arith.constant dense<0.000000e+00> : vector<16x32xf32>
    %410 = tpu.matmul %408, %409, %cst_155 {dimension_numbers = #tpu.dot_dimension_numbers<[1], [0], [0], [1], [0, 0, 1, 1], [], []>} : vector<16x32xf32>, vector<32x32xf32>, vector<16x32xf32> -> vector<16x32xf32>
    %c0_156 = arith.constant 0 : index
    %c0_157 = arith.constant 0 : index
    %411 = vector.load %arg13[%c0_156, %c0_157] : memref<1x32xf32, #tpu.memory_space<vmem>>, vector<1x32xf32>
    %412 = vector.broadcast %411 : vector<1x32xf32> to vector<16x32xf32>
    %413 = arith.addf %410, %412 : vector<16x32xf32>
    %c0_158 = arith.constant 0 : index
    %c0_159 = arith.constant 0 : index
    %414 = vector.load %arg18[%c0_158, %c0_159] : memref<32x32xf32, #tpu.memory_space<vmem>>, vector<32x32xf32>
    %c0_160 = arith.constant 0 : index
    %c0_161 = arith.constant 0 : index
    %415 = vector.load %arg19[%c0_160, %c0_161] : memref<1x32xf32, #tpu.memory_space<vmem>>, vector<1x32xf32>
    %416 = vector.extract_strided_slice %413 {offsets = [0, 0], sizes = [16, 8], strides = [1, 1]} : vector<16x32xf32> to vector<16x8xf32>
    %cst_162 = arith.constant 0.353553385 : f32
    %417 = vector.broadcast %cst_162 : f32 to vector<16x8xf32>
    %418 = arith.mulf %416, %417 : vector<16x8xf32>
    %419 = vector.extract_strided_slice %12 {offsets = [0, 0], sizes = [32, 8], strides = [1, 1]} : vector<32x32xf32> to vector<32x8xf32>
    %420 = tpu.transpose %419, [1, 0] : vector<32x8xf32> -> vector<8x32xf32>
    %cst_163 = arith.constant dense<0.000000e+00> : vector<16x32xf32>
    %421 = tpu.matmul %418, %420, %cst_163 {dimension_numbers = #tpu.dot_dimension_numbers<[1], [0], [0], [1], [0, 0, 1, 1], [], []>} : vector<16x8xf32>, vector<8x32xf32>, vector<16x32xf32> -> vector<16x32xf32>
    %422 = arith.addf %421, %5 : vector<16x32xf32>
    %cst_164 = arith.constant dense<0xFF800000> : vector<16xf32>
    %423 = vector.multi_reduction <maximumf>, %422, %cst_164 [1] : vector<16x32xf32> to vector<16xf32>
    %424 = vector.shape_cast %423 : vector<16xf32> to vector<16x1xf32>
    %425 = vector.broadcast %424 : vector<16x1xf32> to vector<16x32xf32>
    %426 = arith.subf %422, %425 : vector<16x32xf32>
    %427 = math.exp %426 : vector<16x32xf32>
    %cst_165 = arith.constant dense<0.000000e+00> : vector<16xf32>
    %428 = vector.multi_reduction <add>, %427, %cst_165 [1] : vector<16x32xf32> to vector<16xf32>
    %429 = vector.shape_cast %428 : vector<16xf32> to vector<16x1xf32>
    %430 = tpu.reciprocal %429 {approx = true} : vector<16x1xf32> -> vector<16x1xf32>
    %431 = vector.broadcast %430 : vector<16x1xf32> to vector<16x32xf32>
    %432 = arith.mulf %427, %431 : vector<16x32xf32>
    %433 = vector.extract_strided_slice %17 {offsets = [0, 0], sizes = [32, 8], strides = [1, 1]} : vector<32x32xf32> to vector<32x8xf32>
    %cst_166 = arith.constant dense<0.000000e+00> : vector<16x8xf32>
    %434 = tpu.matmul %432, %433, %cst_166 {dimension_numbers = #tpu.dot_dimension_numbers<[1], [0], [0], [1], [0, 0, 1, 1], [], []>} : vector<16x32xf32>, vector<32x8xf32>, vector<16x8xf32> -> vector<16x8xf32>
    %435 = vector.extract_strided_slice %413 {offsets = [0, 8], sizes = [16, 8], strides = [1, 1]} : vector<16x32xf32> to vector<16x8xf32>
    %cst_167 = arith.constant 0.353553385 : f32
    %436 = vector.broadcast %cst_167 : f32 to vector<16x8xf32>
    %437 = arith.mulf %435, %436 : vector<16x8xf32>
    %438 = vector.extract_strided_slice %12 {offsets = [0, 8], sizes = [32, 8], strides = [1, 1]} : vector<32x32xf32> to vector<32x8xf32>
    %439 = tpu.transpose %438, [1, 0] : vector<32x8xf32> -> vector<8x32xf32>
    %cst_168 = arith.constant dense<0.000000e+00> : vector<16x32xf32>
    %440 = tpu.matmul %437, %439, %cst_168 {dimension_numbers = #tpu.dot_dimension_numbers<[1], [0], [0], [1], [0, 0, 1, 1], [], []>} : vector<16x8xf32>, vector<8x32xf32>, vector<16x32xf32> -> vector<16x32xf32>
    %441 = arith.addf %440, %5 : vector<16x32xf32>
    %cst_169 = arith.constant dense<0xFF800000> : vector<16xf32>
    %442 = vector.multi_reduction <maximumf>, %441, %cst_169 [1] : vector<16x32xf32> to vector<16xf32>
    %443 = vector.shape_cast %442 : vector<16xf32> to vector<16x1xf32>
    %444 = vector.broadcast %443 : vector<16x1xf32> to vector<16x32xf32>
    %445 = arith.subf %441, %444 : vector<16x32xf32>
    %446 = math.exp %445 : vector<16x32xf32>
    %cst_170 = arith.constant dense<0.000000e+00> : vector<16xf32>
    %447 = vector.multi_reduction <add>, %446, %cst_170 [1] : vector<16x32xf32> to vector<16xf32>
    %448 = vector.shape_cast %447 : vector<16xf32> to vector<16x1xf32>
    %449 = tpu.reciprocal %448 {approx = true} : vector<16x1xf32> -> vector<16x1xf32>
    %450 = vector.broadcast %449 : vector<16x1xf32> to vector<16x32xf32>
    %451 = arith.mulf %446, %450 : vector<16x32xf32>
    %452 = vector.extract_strided_slice %17 {offsets = [0, 8], sizes = [32, 8], strides = [1, 1]} : vector<32x32xf32> to vector<32x8xf32>
    %cst_171 = arith.constant dense<0.000000e+00> : vector<16x8xf32>
    %453 = tpu.matmul %451, %452, %cst_171 {dimension_numbers = #tpu.dot_dimension_numbers<[1], [0], [0], [1], [0, 0, 1, 1], [], []>} : vector<16x32xf32>, vector<32x8xf32>, vector<16x8xf32> -> vector<16x8xf32>
    %454 = vector.extract_strided_slice %413 {offsets = [0, 16], sizes = [16, 8], strides = [1, 1]} : vector<16x32xf32> to vector<16x8xf32>
    %cst_172 = arith.constant 0.353553385 : f32
    %455 = vector.broadcast %cst_172 : f32 to vector<16x8xf32>
    %456 = arith.mulf %454, %455 : vector<16x8xf32>
    %457 = vector.extract_strided_slice %12 {offsets = [0, 16], sizes = [32, 8], strides = [1, 1]} : vector<32x32xf32> to vector<32x8xf32>
    %458 = tpu.transpose %457, [1, 0] : vector<32x8xf32> -> vector<8x32xf32>
    %cst_173 = arith.constant dense<0.000000e+00> : vector<16x32xf32>
    %459 = tpu.matmul %456, %458, %cst_173 {dimension_numbers = #tpu.dot_dimension_numbers<[1], [0], [0], [1], [0, 0, 1, 1], [], []>} : vector<16x8xf32>, vector<8x32xf32>, vector<16x32xf32> -> vector<16x32xf32>
    %460 = arith.addf %459, %5 : vector<16x32xf32>
    %cst_174 = arith.constant dense<0xFF800000> : vector<16xf32>
    %461 = vector.multi_reduction <maximumf>, %460, %cst_174 [1] : vector<16x32xf32> to vector<16xf32>
    %462 = vector.shape_cast %461 : vector<16xf32> to vector<16x1xf32>
    %463 = vector.broadcast %462 : vector<16x1xf32> to vector<16x32xf32>
    %464 = arith.subf %460, %463 : vector<16x32xf32>
    %465 = math.exp %464 : vector<16x32xf32>
    %cst_175 = arith.constant dense<0.000000e+00> : vector<16xf32>
    %466 = vector.multi_reduction <add>, %465, %cst_175 [1] : vector<16x32xf32> to vector<16xf32>
    %467 = vector.shape_cast %466 : vector<16xf32> to vector<16x1xf32>
    %468 = tpu.reciprocal %467 {approx = true} : vector<16x1xf32> -> vector<16x1xf32>
    %469 = vector.broadcast %468 : vector<16x1xf32> to vector<16x32xf32>
    %470 = arith.mulf %465, %469 : vector<16x32xf32>
    %471 = vector.extract_strided_slice %17 {offsets = [0, 16], sizes = [32, 8], strides = [1, 1]} : vector<32x32xf32> to vector<32x8xf32>
    %cst_176 = arith.constant dense<0.000000e+00> : vector<16x8xf32>
    %472 = tpu.matmul %470, %471, %cst_176 {dimension_numbers = #tpu.dot_dimension_numbers<[1], [0], [0], [1], [0, 0, 1, 1], [], []>} : vector<16x32xf32>, vector<32x8xf32>, vector<16x8xf32> -> vector<16x8xf32>
    %473 = vector.extract_strided_slice %413 {offsets = [0, 24], sizes = [16, 8], strides = [1, 1]} : vector<16x32xf32> to vector<16x8xf32>
    %cst_177 = arith.constant 0.353553385 : f32
    %474 = vector.broadcast %cst_177 : f32 to vector<16x8xf32>
    %475 = arith.mulf %473, %474 : vector<16x8xf32>
    %476 = vector.extract_strided_slice %12 {offsets = [0, 24], sizes = [32, 8], strides = [1, 1]} : vector<32x32xf32> to vector<32x8xf32>
    %477 = tpu.transpose %476, [1, 0] : vector<32x8xf32> -> vector<8x32xf32>
    %cst_178 = arith.constant dense<0.000000e+00> : vector<16x32xf32>
    %478 = tpu.matmul %475, %477, %cst_178 {dimension_numbers = #tpu.dot_dimension_numbers<[1], [0], [0], [1], [0, 0, 1, 1], [], []>} : vector<16x8xf32>, vector<8x32xf32>, vector<16x32xf32> -> vector<16x32xf32>
    %479 = arith.addf %478, %5 : vector<16x32xf32>
    %cst_179 = arith.constant dense<0xFF800000> : vector<16xf32>
    %480 = vector.multi_reduction <maximumf>, %479, %cst_179 [1] : vector<16x32xf32> to vector<16xf32>
    %481 = vector.shape_cast %480 : vector<16xf32> to vector<16x1xf32>
    %482 = vector.broadcast %481 : vector<16x1xf32> to vector<16x32xf32>
    %483 = arith.subf %479, %482 : vector<16x32xf32>
    %484 = math.exp %483 : vector<16x32xf32>
    %cst_180 = arith.constant dense<0.000000e+00> : vector<16xf32>
    %485 = vector.multi_reduction <add>, %484, %cst_180 [1] : vector<16x32xf32> to vector<16xf32>
    %486 = vector.shape_cast %485 : vector<16xf32> to vector<16x1xf32>
    %487 = tpu.reciprocal %486 {approx = true} : vector<16x1xf32> -> vector<16x1xf32>
    %488 = vector.broadcast %487 : vector<16x1xf32> to vector<16x32xf32>
    %489 = arith.mulf %484, %488 : vector<16x32xf32>
    %490 = vector.extract_strided_slice %17 {offsets = [0, 24], sizes = [32, 8], strides = [1, 1]} : vector<32x32xf32> to vector<32x8xf32>
    %cst_181 = arith.constant dense<0.000000e+00> : vector<16x8xf32>
    %491 = tpu.matmul %489, %490, %cst_181 {dimension_numbers = #tpu.dot_dimension_numbers<[1], [0], [0], [1], [0, 0, 1, 1], [], []>} : vector<16x32xf32>, vector<32x8xf32>, vector<16x8xf32> -> vector<16x8xf32>
    %492 = tpu.concatenate %434, %453, %472, %491 in 1 : vector<16x8xf32>, vector<16x8xf32>, vector<16x8xf32>, vector<16x8xf32> -> vector<16x32xf32>
    %cst_182 = arith.constant dense<0.000000e+00> : vector<16x32xf32>
    %493 = tpu.matmul %492, %414, %cst_182 {dimension_numbers = #tpu.dot_dimension_numbers<[1], [0], [0], [1], [0, 0, 1, 1], [], []>} : vector<16x32xf32>, vector<32x32xf32>, vector<16x32xf32> -> vector<16x32xf32>
    %494 = vector.broadcast %415 : vector<1x32xf32> to vector<16x32xf32>
    %495 = arith.addf %493, %494 : vector<16x32xf32>
    %496 = arith.addf %407, %495 : vector<16x32xf32>
    %497 = vector.extract_strided_slice %6 {offsets = [2, 0], sizes = [1, 32], strides = [1, 1]} : vector<8x32xf32> to vector<1x32xf32>
    %498 = vector.extract_strided_slice %6 {offsets = [3, 0], sizes = [1, 32], strides = [1, 1]} : vector<8x32xf32> to vector<1x32xf32>
    %cst_183 = arith.constant dense<0.000000e+00> : vector<16xf32>
    %499 = vector.multi_reduction <add>, %496, %cst_183 [1] : vector<16x32xf32> to vector<16xf32>
    %500 = vector.shape_cast %499 : vector<16xf32> to vector<16x1xf32>
    %cst_184 = arith.constant 3.200000e+01 : f32
    %501 = vector.broadcast %cst_184 : f32 to vector<16x1xf32>
    %502 = arith.divf %500, %501 : vector<16x1xf32>
    %503 = vector.broadcast %502 : vector<16x1xf32> to vector<16x32xf32>
    %504 = arith.subf %496, %503 : vector<16x32xf32>
    %505 = arith.mulf %504, %504 : vector<16x32xf32>
    %cst_185 = arith.constant dense<0.000000e+00> : vector<16xf32>
    %506 = vector.multi_reduction <add>, %505, %cst_185 [1] : vector<16x32xf32> to vector<16xf32>
    %507 = vector.shape_cast %506 : vector<16xf32> to vector<16x1xf32>
    %cst_186 = arith.constant 3.200000e+01 : f32
    %508 = vector.broadcast %cst_186 : f32 to vector<16x1xf32>
    %509 = arith.divf %507, %508 : vector<16x1xf32>
    %510 = vector.broadcast %502 : vector<16x1xf32> to vector<16x32xf32>
    %511 = arith.subf %496, %510 : vector<16x32xf32>
    %cst_187 = arith.constant 9.99999974E-6 : f32
    %512 = vector.broadcast %cst_187 : f32 to vector<16x1xf32>
    %513 = arith.addf %509, %512 : vector<16x1xf32>
    %514 = math.rsqrt %513 : vector<16x1xf32>
    %515 = vector.broadcast %514 : vector<16x1xf32> to vector<16x32xf32>
    %516 = arith.mulf %511, %515 : vector<16x32xf32>
    %517 = vector.broadcast %497 : vector<1x32xf32> to vector<16x32xf32>
    %518 = arith.mulf %516, %517 : vector<16x32xf32>
    %519 = vector.broadcast %498 : vector<1x32xf32> to vector<16x32xf32>
    %520 = arith.addf %518, %519 : vector<16x32xf32>
    %c0_188 = arith.constant 0 : index
    %c0_189 = arith.constant 0 : index
    %521 = vector.load %arg21[%c0_188, %c0_189] : memref<32x64xf32, #tpu.memory_space<vmem>>, vector<32x64xf32>
    %cst_190 = arith.constant dense<0.000000e+00> : vector<16x64xf32>
    %522 = tpu.matmul %520, %521, %cst_190 {dimension_numbers = #tpu.dot_dimension_numbers<[1], [0], [0], [1], [0, 0, 1, 1], [], []>} : vector<16x32xf32>, vector<32x64xf32>, vector<16x64xf32> -> vector<16x64xf32>
    %c0_191 = arith.constant 0 : index
    %c0_192 = arith.constant 0 : index
    %523 = vector.load %arg22[%c0_191, %c0_192] : memref<1x64xf32, #tpu.memory_space<vmem>>, vector<1x64xf32>
    %524 = vector.broadcast %523 : vector<1x64xf32> to vector<16x64xf32>
    %525 = arith.addf %522, %524 : vector<16x64xf32>
    %cst_193 = arith.constant 0.000000e+00 : f32
    %526 = vector.broadcast %cst_193 : f32 to vector<16x64xf32>
    %527 = arith.maximumf %525, %526 : vector<16x64xf32>
    %c0_194 = arith.constant 0 : index
    %c0_195 = arith.constant 0 : index
    %528 = vector.load %arg23[%c0_194, %c0_195] : memref<64x32xf32, #tpu.memory_space<vmem>>, vector<64x32xf32>
    %cst_196 = arith.constant dense<0.000000e+00> : vector<16x32xf32>
    %529 = tpu.matmul %527, %528, %cst_196 {dimension_numbers = #tpu.dot_dimension_numbers<[1], [0], [0], [1], [0, 0, 1, 1], [], []>} : vector<16x64xf32>, vector<64x32xf32>, vector<16x32xf32> -> vector<16x32xf32>
    %c0_197 = arith.constant 0 : index
    %c0_198 = arith.constant 0 : index
    %530 = vector.load %arg24[%c0_197, %c0_198] : memref<1x32xf32, #tpu.memory_space<vmem>>, vector<1x32xf32>
    %531 = vector.broadcast %530 : vector<1x32xf32> to vector<16x32xf32>
    %532 = arith.addf %529, %531 : vector<16x32xf32>
    %533 = arith.addf %520, %532 : vector<16x32xf32>
    %534 = vector.extract_strided_slice %6 {offsets = [4, 0], sizes = [1, 32], strides = [1, 1]} : vector<8x32xf32> to vector<1x32xf32>
    %535 = vector.extract_strided_slice %6 {offsets = [5, 0], sizes = [1, 32], strides = [1, 1]} : vector<8x32xf32> to vector<1x32xf32>
    %cst_199 = arith.constant dense<0.000000e+00> : vector<16xf32>
    %536 = vector.multi_reduction <add>, %533, %cst_199 [1] : vector<16x32xf32> to vector<16xf32>
    %537 = vector.shape_cast %536 : vector<16xf32> to vector<16x1xf32>
    %cst_200 = arith.constant 3.200000e+01 : f32
    %538 = vector.broadcast %cst_200 : f32 to vector<16x1xf32>
    %539 = arith.divf %537, %538 : vector<16x1xf32>
    %540 = vector.broadcast %539 : vector<16x1xf32> to vector<16x32xf32>
    %541 = arith.subf %533, %540 : vector<16x32xf32>
    %542 = arith.mulf %541, %541 : vector<16x32xf32>
    %cst_201 = arith.constant dense<0.000000e+00> : vector<16xf32>
    %543 = vector.multi_reduction <add>, %542, %cst_201 [1] : vector<16x32xf32> to vector<16xf32>
    %544 = vector.shape_cast %543 : vector<16xf32> to vector<16x1xf32>
    %cst_202 = arith.constant 3.200000e+01 : f32
    %545 = vector.broadcast %cst_202 : f32 to vector<16x1xf32>
    %546 = arith.divf %544, %545 : vector<16x1xf32>
    %547 = vector.broadcast %539 : vector<16x1xf32> to vector<16x32xf32>
    %548 = arith.subf %533, %547 : vector<16x32xf32>
    %cst_203 = arith.constant 9.99999974E-6 : f32
    %549 = vector.broadcast %cst_203 : f32 to vector<16x1xf32>
    %550 = arith.addf %546, %549 : vector<16x1xf32>
    %551 = math.rsqrt %550 : vector<16x1xf32>
    %552 = vector.broadcast %551 : vector<16x1xf32> to vector<16x32xf32>
    %553 = arith.mulf %548, %552 : vector<16x32xf32>
    %554 = vector.broadcast %534 : vector<1x32xf32> to vector<16x32xf32>
    %555 = arith.mulf %553, %554 : vector<16x32xf32>
    %556 = vector.broadcast %535 : vector<1x32xf32> to vector<16x32xf32>
    %557 = arith.addf %555, %556 : vector<16x32xf32>
    %558 = vector.extract_strided_slice %6 {offsets = [6, 0], sizes = [1, 32], strides = [1, 1]} : vector<8x32xf32> to vector<1x32xf32>
    %559 = vector.extract_strided_slice %6 {offsets = [7, 0], sizes = [1, 32], strides = [1, 1]} : vector<8x32xf32> to vector<1x32xf32>
    %cst_204 = arith.constant dense<0.000000e+00> : vector<16xf32>
    %560 = vector.multi_reduction <add>, %557, %cst_204 [1] : vector<16x32xf32> to vector<16xf32>
    %561 = vector.shape_cast %560 : vector<16xf32> to vector<16x1xf32>
    %cst_205 = arith.constant 3.200000e+01 : f32
    %562 = vector.broadcast %cst_205 : f32 to vector<16x1xf32>
    %563 = arith.divf %561, %562 : vector<16x1xf32>
    %564 = vector.broadcast %563 : vector<16x1xf32> to vector<16x32xf32>
    %565 = arith.subf %557, %564 : vector<16x32xf32>
    %566 = arith.mulf %565, %565 : vector<16x32xf32>
    %cst_206 = arith.constant dense<0.000000e+00> : vector<16xf32>
    %567 = vector.multi_reduction <add>, %566, %cst_206 [1] : vector<16x32xf32> to vector<16xf32>
    %568 = vector.shape_cast %567 : vector<16xf32> to vector<16x1xf32>
    %cst_207 = arith.constant 3.200000e+01 : f32
    %569 = vector.broadcast %cst_207 : f32 to vector<16x1xf32>
    %570 = arith.divf %568, %569 : vector<16x1xf32>
    %571 = vector.broadcast %563 : vector<16x1xf32> to vector<16x32xf32>
    %572 = arith.subf %557, %571 : vector<16x32xf32>
    %cst_208 = arith.constant 9.99999974E-6 : f32
    %573 = vector.broadcast %cst_208 : f32 to vector<16x1xf32>
    %574 = arith.addf %570, %573 : vector<16x1xf32>
    %575 = math.rsqrt %574 : vector<16x1xf32>
    %576 = vector.broadcast %575 : vector<16x1xf32> to vector<16x32xf32>
    %577 = arith.mulf %572, %576 : vector<16x32xf32>
    %578 = vector.broadcast %558 : vector<1x32xf32> to vector<16x32xf32>
    %579 = arith.mulf %577, %578 : vector<16x32xf32>
    %580 = vector.broadcast %559 : vector<1x32xf32> to vector<16x32xf32>
    %581 = arith.addf %579, %580 : vector<16x32xf32>
    %c0_209 = arith.constant 0 : index
    %c0_210 = arith.constant 0 : index
    %582 = vector.load %arg25[%c0_209, %c0_210] : memref<16x32xf32, #tpu.memory_space<vmem>>, vector<16x32xf32>
    tpu.vector_store %arg25[%c0_209, %c0_210], %581 {strides = array<i32>} : memref<16x32xf32, #tpu.memory_space<vmem>>, vector<16x32xf32>,
    return
  }
}

</mosaic_0001>

<bundles_post_ra>
// kernel: tpu_custom_call.1
= control target key start
LH: loop header
LB: loop body
LE: loop exit
PB: predicated region body
PF: predicated region fallthrough
CT: control target
= control target key end

     0   :  { %s8774_s0 = inlined_call_operand.hbm [shape: f32[16,32], index: 0, kind: input, shape index: {}]   ;;  %s8775_s1 = inlined_call_operand.vmem [shape: f32[32,32], index: 1, kind: input, shape index: {}]   ;;  %s8776_s2 = inlined_call_operand.hbm [shape: f32[16,32], index: 2, kind: input, shape index: {}]   ;;  %s8777_s3 = inlined_call_operand.vmem [shape: f32[32,32], index: 3, kind: input, shape index: {}]   ;;  %s8778_s4 = inlined_call_operand.hbm [shape: f32[16,16], index: 4, kind: input, shape index: {}]   ;;  %s8779_s5 = inlined_call_operand.hbm [shape: f32[16,32], index: 5, kind: input, shape index: {}]   ;;  %s8780_s6 = inlined_call_operand.vmem [shape: f32[32,64], index: 6, kind: input, shape index: {}]   ;;  %s8781_s7 = inlined_call_operand.hbm [shape: f32[1,64], index: 7, kind: input, shape index: {}]   ;;  %s8782_s8 = inlined_call_operand.hbm [shape: f32[32,32], index: 8, kind: input, shape index: {}]   ;;  %s8783_s9 = inlined_call_operand.hbm [shape: f32[1,32], index: 9, kind: input, shape index: {}]   ;;  %s8784_s10 = inlined_call_operand.vmem [shape: f32[32,32], index: 10, kind: input, shape index: {}]   ;;  %s8785_s11 = inlined_call_operand.hbm [shape: f32[1,32], index: 11, kind: input, shape index: {}]   ;;  %s8786_s12 = inlined_call_operand.hbm [shape: f32[32,32], index: 12, kind: input, shape index: {}]   ;;  %s8787_s13 = inlined_call_operand.hbm [shape: f32[1,32], index: 13, kind: input, shape index: {}]   ;;  %s8788_s14 = inlined_call_operand.hbm [shape: f32[32,32], index: 14, kind: input, shape index: {}]   ;;  %s8789_s15 = inlined_call_operand.hbm [shape: f32[1,32], index: 15, kind: input, shape index: {}]   ;;  %s8790_s16 = inlined_call_operand.hbm [shape: f32[32,32], index: 16, kind: input, shape index: {}]   ;;  %s8791_s17 = inlined_call_operand.hbm [shape: f32[1,32], index: 17, kind: input, shape index: {}]   ;;  %s8792_s18 = inlined_call_operand.hbm [shape: f32[32,32], index: 18, kind: input, shape index: {}]   ;;  %s8793_s19 = inlined_call_operand.vmem [shape: f32[1,32], index: 19, kind: input, shape index: {}]   ;;  %s8794_s20 = inlined_call_operand.vmem [shape: f32[8,32], index: 20, kind: input, shape index: {}]   ;;  %s8795_s21 = inlined_call_operand.hbm [shape: f32[32,64], index: 21, kind: input, shape index: {}]   ;;  %s8796_s22 = inlined_call_operand.vmem [shape: f32[1,64], index: 22, kind: input, shape index: {}]   ;;  %s8797_s23 = inlined_call_operand.vmem [shape: f32[64,32], index: 23, kind: input, shape index: {}]   ;;  %s8798_s24 = inlined_call_operand.vmem [shape: f32[1,32], index: 24, kind: input, shape index: {}]   ;;  %s8799_s25 = inlined_call_operand.hbm [shape: f32[16,32], index: 25, kind: output, shape index: {}]  }
   0x1   :  { %8813 = sst [smem:[#allocation39_spill]] %s8774_s0 }
   0x2   :  { %8814 = sst [smem:[#allocation40_spill]] %s8775_s1 }
   0x3   :  { %8815 = sst [smem:[#allocation41_spill]] %s8776_s2 }
   0x4   :  { %8816 = sst [smem:[#allocation42_spill]] %s8777_s3 }
   0x5   :  { %8817 = sst [smem:[#allocation43_spill]] %s8778_s4 }
   0x6   :  { %8818 = sst [smem:[#allocation44_spill]] %s8779_s5 }
   0x7   :  { %8819 = sst [smem:[#allocation45_spill]] %s8780_s6 }
   0x8   :  { %8820 = sst [smem:[#allocation46_spill]] %s8781_s7 }
   0x9   :  { %8821 = sst [smem:[#allocation47_spill]] %s8782_s8 }
   0xa   :  { %8822 = sst [smem:[#allocation48_spill]] %s8783_s9 }
   0xb   :  { %8823 = sst [smem:[#allocation49_spill]] %s8796_s22 }
   0xc   :  { %8824 = sst [smem:[#allocation50_spill]] %s8798_s24 }
   0xd   :  { %8825 = sst [smem:[#allocation51_spill]] %s8799_s25 }
   0xe   :  { %30 = vsyncpa [#allocation3], 0 }
   0xf   :  { %31 = vsyncpa [#allocation6], 0 }
  0x10   :  { %32 = vsyncpa [#allocation9], 0 }
  0x11   :  { %33 = vsyncpa [#allocation12], 0 }
  0x12   :  { %34 = vsyncpa [#allocation15], 0 }
  0x13   :  { %35 = vsyncpa [#allocation18], 0 }
  0x14   :  { %36 = vsyncpa [#allocation21], 0 }
  0x15   :  { %37 = vsyncpa [#allocation24], 0 }
  0x16   :  { %38 = vsyncpa [#allocation27], 0 }
  0x17   :  { %39 = vsyncpa [#allocation4], 0  ;;  %s7358_s29 = smov [#allocation5]   ;;  %s7359_s6 = smov [#allocation8]  }
  0x18   :  { %s59_s2 = sshll.u32 %s7358_s29, 4  ;;  %s85_s30 = sshll.u32 %s7359_s6, 4  ;;  %s60_s2 = int_to_ptr.vmem [resolvable:$true] %s59_s2  ;;  %s7516_s30 = int_to_ptr.vmem [resolvable:$true] %s85_s30 }
  0x19   :  { %s8826_s26 = sld [smem:[#allocation41_spill]] }
  0x1f   :  { %s6964_s1 = scalar_lea.hbm %s8826_s26, 256 }
  0x20   :  { %p6965_p0 = scmp.ne.s32.totalorder %s8826_s26, %s6964_s1  ;;  %p6968_p1 = scmp.lt.u32.totalorder %s6964_s1, %s8826_s26 }
  0x22   :  { %p6970_p2 = pnand %p6968_p1, %p6965_p0 }
  0x24   :  { %6973 = shalt.err (!%p6970_p2)
}
  0x25   :  { %s6974_s9 = scalar_lea.vmem %s60_s2, 256  ;;  %p6979_p4 = scmp.lt.s32.totalorder %s60_s2, %s60_s2 }
  0x26   :  { %p6975_p3 = scmp.ne.s32.totalorder %s60_s2, %s6974_s9  ;;  %p6980_p5 = scmp.lt.s32.totalorder %s6974_s9, %s6974_s9 }
  0x28   :  { %p6981_p6 = por %p6980_p5, %p6979_p4 }
  0x2a   :  { %p6982_p7 = pnand %p6981_p6, %p6975_p3 }
  0x2c   :  { %6985 = shalt.err (!%p6982_p7)
}
  0x2d   :  { %s7360_s5 = smov 128   ;;  %s7361_s0 = smov 8  }
  0x2e   :  { %65 = dma.hbm_to_vmem [thread:$0]  %s8826_s26, 256, %s60_s2, [#allocation6], %s7360_s5, %s7360_s5, %s7361_s0  }
  0x2f   :  { %s8827_s1 = sld [smem:[#allocation44_spill]] }
  0x35   :  { %s6986_s8 = scalar_lea.hbm %s8827_s1, 256 }
  0x36   :  { %p6987_p8 = scmp.ne.s32.totalorder %s8827_s1, %s6986_s8  ;;  %p6990_p9 = scmp.lt.u32.totalorder %s6986_s8, %s8827_s1 }
  0x38   :  { %p6992_p10 = pnand %p6990_p9, %p6987_p8 }
  0x3a   :  { %6995 = shalt.err (!%p6992_p10)
}
  0x3b   :  { %s6996_s25 = scalar_lea.vmem %s7516_s30, 256  ;;  %p7001_p12 = scmp.lt.s32.totalorder %s7516_s30, %s7516_s30 }
  0x3c   :  { %p6997_p11 = scmp.ne.s32.totalorder %s7516_s30, %s6996_s25  ;;  %p7002_p13 = scmp.lt.s32.totalorder %s6996_s25, %s6996_s25 }
  0x3e   :  { %p7003_p0 = por %p7002_p13, %p7001_p12 }
  0x40   :  { %p7004_p1 = pnand %p7003_p0, %p6997_p11 }
  0x42   :  { %7007 = shalt.err (!%p7004_p1)
}
  0x43   :  { %91 = dma.hbm_to_vmem [thread:$0]  %s8827_s1, 256, %s7516_s30, [#allocation9], %s7360_s5, %s7360_s5, %s7361_s0  }
  0x44   :  { %s7362_s29 = smov [#allocation11]   ;;  %s7363_s7 = smov [#allocation14]  }
  0x45   :  { %s109_s6 = sshll.u32 %s7362_s29, 4  ;;  %s134_s3 = sshll.u32 %s7363_s7, 4  ;;  %s110_s6 = int_to_ptr.vmem [resolvable:$true] %s109_s6  ;;  %s135_s3 = int_to_ptr.vmem [resolvable:$true] %s134_s3 }
  0x46   :  { %s8828_s25 = sld [smem:[#allocation47_spill]] }
  0x4c   :  { %s7008_s4 = scalar_lea.hbm %s8828_s25, 512 }
  0x4d   :  { %p7009_p2 = scmp.ne.s32.totalorder %s8828_s25, %s7008_s4  ;;  %p7012_p3 = scmp.lt.u32.totalorder %s7008_s4, %s8828_s25 }
  0x4f   :  { %p7014_p4 = pnand %p7012_p3, %p7009_p2 }
  0x51   :  { %7017 = shalt.err (!%p7014_p4)
}
  0x52   :  { %s7018_s30 = scalar_lea.vmem %s110_s6, 512  ;;  %p7023_p6 = scmp.lt.s32.totalorder %s110_s6, %s110_s6 }
  0x53   :  { %p7019_p5 = scmp.ne.s32.totalorder %s110_s6, %s7018_s30  ;;  %p7024_p7 = scmp.lt.s32.totalorder %s7018_s30, %s7018_s30 }
  0x55   :  { %p7025_p8 = por %p7024_p7, %p7023_p6 }
  0x57   :  { %p7026_p9 = pnand %p7025_p8, %p7019_p5 }
  0x59   :  { %7029 = shalt.err (!%p7026_p9)
}
  0x5a   :  { %115 = dma.hbm_to_vmem [thread:$0]  %s8828_s25, 512, %s110_s6, [#allocation12], %s7360_s5, %s7360_s5, %s7361_s0  }
  0x5b   :  { %s7030_s22 = scalar_lea.hbm %s8785_s11, 16 }
  0x5c   :  { %p7031_p10 = scmp.ne.s32.totalorder %s8785_s11, %s7030_s22  ;;  %p7034_p11 = scmp.lt.u32.totalorder %s7030_s22, %s8785_s11 }
  0x5e   :  { %p7036_p12 = pnand %p7034_p11, %p7031_p10 }
  0x60   :  { %7039 = shalt.err (!%p7036_p12)
}
  0x61   :  { %s7040_s4 = scalar_lea.vmem %s135_s3, 16  ;;  %s7044_s28 = scalar_lea.vmem %s135_s3, 32 }
  0x62   :  { %p7041_p13 = scmp.ne.s32.totalorder %s135_s3, %s7040_s4  ;;  %p7045_p0 = scmp.lt.s32.totalorder %s135_s3, %s135_s3 }
  0x63   :  { %p7046_p1 = scmp.lt.s32.totalorder %s7044_s28, %s7040_s4 }
  0x65   :  { %p7047_p2 = por %p7046_p1, %p7045_p0 }
  0x67   :  { %p7048_p3 = pnand %p7047_p2, %p7041_p13 }
  0x69   :  { %7051 = shalt.err (!%p7048_p3)
}
  0x6a   :  { %137 = dma.hbm_to_vmem [thread:$0]  %s8785_s11, 16, %s135_s3, [#allocation15]  }
  0x6b   :  { %s7364_s9 = smov [#allocation17]   ;;  %s7365_s1 = smov [#allocation20]  }
  0x6c   :  { %s156_s30 = sshll.u32 %s7364_s9, 4  ;;  %s178_s2 = sshll.u32 %s7365_s1, 4  ;;  %s157_s30 = int_to_ptr.vmem [resolvable:$true] %s156_s30  ;;  %s179_s2 = int_to_ptr.vmem [resolvable:$true] %s178_s2 }
  0x6d   :  { %s7052_s22 = scalar_lea.hbm %s8787_s13, 16 }
  0x6e   :  { %p7053_p4 = scmp.ne.s32.totalorder %s8787_s13, %s7052_s22  ;;  %p7056_p5 = scmp.lt.u32.totalorder %s7052_s22, %s8787_s13 }
  0x70   :  { %p7058_p6 = pnand %p7056_p5, %p7053_p4 }
  0x72   :  { %7061 = shalt.err (!%p7058_p6)
}
  0x73   :  { %s7062_s11 = scalar_lea.vmem %s157_s30, 16  ;;  %s7066_s3 = scalar_lea.vmem %s157_s30, 32 }
  0x74   :  { %p7063_p7 = scmp.ne.s32.totalorder %s157_s30, %s7062_s11  ;;  %p7067_p8 = scmp.lt.s32.totalorder %s157_s30, %s157_s30 }
  0x75   :  { %p7068_p9 = scmp.lt.s32.totalorder %s7066_s3, %s7062_s11 }
  0x77   :  { %p7069_p10 = por %p7068_p9, %p7067_p8 }
  0x79   :  { %p7070_p11 = pnand %p7069_p10, %p7063_p7 }
  0x7b   :  { %7073 = shalt.err (!%p7070_p11)
}
  0x7c   :  { %159 = dma.hbm_to_vmem [thread:$0]  %s8787_s13, 16, %s157_s30, [#allocation18]  }
  0x7d   :  { %s7074_s9 = scalar_lea.hbm %s8789_s15, 16 }
  0x7e   :  { %p7075_p12 = scmp.ne.s32.totalorder %s8789_s15, %s7074_s9  ;;  %p7078_p13 = scmp.lt.u32.totalorder %s7074_s9, %s8789_s15 }
  0x80   :  { %p7080_p0 = pnand %p7078_p13, %p7075_p12 }
  0x82   :  { %7083 = shalt.err (!%p7080_p0)
}
  0x83   :  { %s7084_s24 = scalar_lea.vmem %s179_s2, 16  ;;  %s7088_s7 = scalar_lea.vmem %s179_s2, 32 }
  0x84   :  { %p7085_p1 = scmp.ne.s32.totalorder %s179_s2, %s7084_s24  ;;  %p7089_p2 = scmp.lt.s32.totalorder %s179_s2, %s179_s2 }
  0x85   :  { %p7090_p3 = scmp.lt.s32.totalorder %s7088_s7, %s7084_s24 }
  0x87   :  { %p7091_p4 = por %p7090_p3, %p7089_p2 }
  0x89   :  { %p7092_p5 = pnand %p7091_p4, %p7085_p1 }
  0x8b   :  { %7095 = shalt.err (!%p7092_p5)
}
  0x8c   :  { %181 = dma.hbm_to_vmem [thread:$0]  %s8789_s15, 16, %s179_s2, [#allocation21]  }
  0x8d   :  { %s7366_s8 = smov [#allocation23]   ;;  %s7367_s11 = smov [#allocation2]  }
  0x8e   :  { %s200_s27 = sshll.u32 %s7366_s8, 4  ;;  %s45_s3 = sshll.u32 %s7367_s11, 4  ;;  %s201_s27 = int_to_ptr.vmem [resolvable:$true] %s200_s27  ;;  %s7604_s3 = int_to_ptr.vmem [resolvable:$true] %s45_s3 }
  0x8f   :  { %s7096_s6 = scalar_lea.hbm %s8791_s17, 16 }
  0x90   :  { %p7097_p6 = scmp.ne.s32.totalorder %s8791_s17, %s7096_s6  ;;  %p7100_p7 = scmp.lt.u32.totalorder %s7096_s6, %s8791_s17 }
  0x92   :  { %p7102_p8 = pnand %p7100_p7, %p7097_p6 }
  0x94   :  { %7105 = shalt.err (!%p7102_p8)
}
  0x95   :  { %s7106_s15 = scalar_lea.vmem %s201_s27, 16  ;;  %s7110_s2 = scalar_lea.vmem %s201_s27, 32 }
  0x96   :  { %p7107_p9 = scmp.ne.s32.totalorder %s201_s27, %s7106_s15  ;;  %p7111_p10 = scmp.lt.s32.totalorder %s201_s27, %s201_s27 }
  0x97   :  { %p7112_p11 = scmp.lt.s32.totalorder %s7110_s2, %s7106_s15 }
  0x99   :  { %p7113_p12 = por %p7112_p11, %p7111_p10 }
  0x9b   :  { %p7114_p13 = pnand %p7113_p12, %p7107_p9 }
  0x9d   :  { %7117 = shalt.err (!%p7114_p13)
}
  0x9e   :  { %203 = dma.hbm_to_vmem [thread:$0]  %s8791_s17, 16, %s201_s27, [#allocation24]  }
  0x9f   :  { %s8829_s13 = sld [smem:[#allocation39_spill]] }
  0xa5   :  { %s7118_s30 = scalar_lea.hbm %s8829_s13, 256 }
  0xa6   :  { %p7119_p0 = scmp.ne.s32.totalorder %s8829_s13, %s7118_s30  ;;  %p7122_p1 = scmp.lt.u32.totalorder %s7118_s30, %s8829_s13 }
  0xa8   :  { %p7124_p2 = pnand %p7122_p1, %p7119_p0 }
  0xaa   :  { %7127 = shalt.err (!%p7124_p2)
}
  0xab   :  { %s7128_s6 = scalar_lea.vmem %s7604_s3, 256  ;;  %p7133_p4 = scmp.lt.s32.totalorder %s7604_s3, %s7604_s3 }
  0xac   :  { %p7129_p3 = scmp.ne.s32.totalorder %s7604_s3, %s7128_s6  ;;  %p7134_p5 = scmp.lt.s32.totalorder %s7128_s6, %s7128_s6 }
  0xae   :  { %p7135_p6 = por %p7134_p5, %p7133_p4 }
  0xb0   :  { %p7136_p7 = pnand %p7135_p6, %p7129_p3 }
  0xb2   :  { %7139 = shalt.err (!%p7136_p7)
}
  0xb3   :  { %51 = dma.hbm_to_vmem [thread:$0]  %s8829_s13, 256, %s7604_s3, [#allocation3], %s7360_s5, %s7360_s5, %s7361_s0  }
  0xb4   :  { %s7368_s25 = smov [#allocation7]   ;;  %s7369_s1 = smov [#allocation10]  }
  0xb5   :  { %s73_s9 = sshll.u32 %s7368_s25, 4  ;;  %s100_s26 = sshll.u32 %s7369_s1, 4  ;;  %s74_s9 = int_to_ptr.vmem [resolvable:$true] %s73_s9  ;;  %s101_s26 = int_to_ptr.vmem [resolvable:$true] %s100_s26 }
  0xb6   :  { %s8830_s29 = sld [smem:[#allocation43_spill]] }
  0xbc   :  { %s7140_s22 = scalar_lea.hbm %s8830_s29, 256 }
  0xbd   :  { %p7141_p8 = scmp.ne.s32.totalorder %s8830_s29, %s7140_s22  ;;  %p7144_p9 = scmp.lt.u32.totalorder %s7140_s22, %s8830_s29 }
  0xbf   :  { %p7146_p10 = pnand %p7144_p9, %p7141_p8 }
  0xc1   :  { %7149 = shalt.err (!%p7146_p10)
}
  0xc2   :  { %s7150_s3 = scalar_lea.vmem %s74_s9, 256  ;;  %p7155_p12 = scmp.lt.s32.totalorder %s74_s9, %s74_s9 }
  0xc3   :  { %p7151_p11 = scmp.ne.s32.totalorder %s74_s9, %s7150_s3  ;;  %p7156_p13 = scmp.lt.s32.totalorder %s7150_s3, %s7150_s3 }
  0xc5   :  { %p7157_p0 = por %p7156_p13, %p7155_p12 }
  0xc7   :  { %p7158_p1 = pnand %p7157_p0, %p7151_p11 }
  0xc9   :  { %7161 = shalt.err (!%p7158_p1)
}
  0xca   :  { %79 = dma.hbm_to_vmem [thread:$0]  %s8830_s29, 256, %s74_s9, [#allocation6], %s7360_s5, %s7360_s5, %s7361_s0  }
  0xcb   :  { %s8831_s6 = sld [smem:[#allocation46_spill]] }
  0xd1   :  { %s7162_s17 = scalar_lea.hbm %s8831_s6, 16 }
  0xd2   :  { %p7163_p2 = scmp.ne.s32.totalorder %s8831_s6, %s7162_s17  ;;  %p7166_p3 = scmp.lt.u32.totalorder %s7162_s17, %s8831_s6 }
  0xd4   :  { %p7168_p4 = pnand %p7166_p3, %p7163_p2 }
  0xd6   :  { %7171 = shalt.err (!%p7168_p4)
}
  0xd7   :  { %s7172_s2 = scalar_lea.vmem %s101_s26, 16  ;;  %s7176_s22 = scalar_lea.vmem %s101_s26, 32 }
  0xd8   :  { %p7173_p5 = scmp.ne.s32.totalorder %s101_s26, %s7172_s2  ;;  %p7177_p6 = scmp.lt.s32.totalorder %s101_s26, %s101_s26 }
  0xd9   :  { %p7178_p7 = scmp.lt.s32.totalorder %s7176_s22, %s7172_s2 }
  0xdb   :  { %p7179_p8 = por %p7178_p7, %p7177_p6 }
  0xdd   :  { %p7180_p9 = pnand %p7179_p8, %p7173_p5 }
  0xdf   :  { %7183 = shalt.err (!%p7180_p9)
}
  0xe0   :  { %103 = dma.hbm_to_vmem [thread:$0]  %s8831_s6, 16, %s101_s26, [#allocation9]  }
  0xe1   :  { %s7370_s24 = smov [#allocation13]   ;;  %s7371_s30 = smov [#allocation16]  }
  0xe2   :  { %s122_s7 = sshll.u32 %s7370_s24, 4  ;;  %s143_s8 = sshll.u32 %s7371_s30, 4  ;;  %s123_s7 = int_to_ptr.vmem [resolvable:$true] %s122_s7  ;;  %s7665_s8 = int_to_ptr.vmem [resolvable:$true] %s143_s8 }
  0xe3   :  { %s8832_s11 = sld [smem:[#allocation48_spill]] }
  0xe9   :  { %s7184_s4 = scalar_lea.hbm %s8832_s11, 16 }
  0xea   :  { %p7185_p10 = scmp.ne.s32.totalorder %s8832_s11, %s7184_s4  ;;  %p7188_p11 = scmp.lt.u32.totalorder %s7184_s4, %s8832_s11 }
  0xec   :  { %p7190_p12 = pnand %p7188_p11, %p7185_p10 }
  0xee   :  { %7193 = shalt.err (!%p7190_p12)
}
  0xef   :  { %s7194_s26 = scalar_lea.vmem %s123_s7, 16  ;;  %s7198_s6 = scalar_lea.vmem %s123_s7, 32 }
  0xf0   :  { %p7195_p13 = scmp.ne.s32.totalorder %s123_s7, %s7194_s26  ;;  %p7199_p0 = scmp.lt.s32.totalorder %s123_s7, %s123_s7 }
  0xf1   :  { %p7200_p1 = scmp.lt.s32.totalorder %s7198_s6, %s7194_s26 }
  0xf3   :  { %p7201_p2 = por %p7200_p1, %p7199_p0 }
  0xf5   :  { %p7202_p3 = pnand %p7201_p2, %p7195_p13 }
  0xf7   :  { %7205 = shalt.err (!%p7202_p3)
}
  0xf8   :  { %125 = dma.hbm_to_vmem [thread:$0]  %s8832_s11, 16, %s123_s7, [#allocation12]  }
  0xf9   :  { %s7206_s9 = scalar_lea.hbm %s8786_s12, 512 }
  0xfa   :  { %p7207_p4 = scmp.ne.s32.totalorder %s8786_s12, %s7206_s9  ;;  %p7210_p5 = scmp.lt.u32.totalorder %s7206_s9, %s8786_s12 }
  0xfc   :  { %p7212_p6 = pnand %p7210_p5, %p7207_p4 }
  0xfe   :  { %7215 = shalt.err (!%p7212_p6)
}
  0xff   :  { %s7216_s13 = scalar_lea.vmem %s7665_s8, 512  ;;  %p7221_p8 = scmp.lt.s32.totalorder %s7665_s8, %s7665_s8 }
 0x100   :  { %p7217_p7 = scmp.ne.s32.totalorder %s7665_s8, %s7216_s13  ;;  %p7222_p9 = scmp.lt.s32.totalorder %s7216_s13, %s7216_s13 }
 0x102   :  { %p7223_p10 = por %p7222_p9, %p7221_p8 }
 0x104   :  { %p7224_p11 = pnand %p7223_p10, %p7217_p7 }
 0x106   :  { %7227 = shalt.err (!%p7224_p11)
}
 0x107   :  { %149 = dma.hbm_to_vmem [thread:$0]  %s8786_s12, 512, %s7665_s8, [#allocation15], %s7360_s5, %s7360_s5, %s7361_s0  }
 0x108   :  { %s7372_s4 = smov [#allocation19]   ;;  %s7373_s17 = smov [#allocation22]  }
 0x109   :  { %s165_s28 = sshll.u32 %s7372_s4, 4  ;;  %s187_s27 = sshll.u32 %s7373_s17, 4  ;;  %s166_s28 = int_to_ptr.vmem [resolvable:$true] %s165_s28  ;;  %s7699_s27 = int_to_ptr.vmem [resolvable:$true] %s187_s27 }
 0x10a   :  { %s7228_s6 = scalar_lea.hbm %s8788_s14, 512 }
 0x10b   :  { %p7229_p12 = scmp.ne.s32.totalorder %s8788_s14, %s7228_s6  ;;  %p7232_p13 = scmp.lt.u32.totalorder %s7228_s6, %s8788_s14 }
 0x10d   :  { %p7234_p0 = pnand %p7232_p13, %p7229_p12 }
 0x10f   :  { %7237 = shalt.err (!%p7234_p0)
}
 0x110   :  { %s7238_s12 = scalar_lea.vmem %s166_s28, 512  ;;  %p7243_p2 = scmp.lt.s32.totalorder %s166_s28, %s166_s28 }
 0x111   :  { %p7239_p1 = scmp.ne.s32.totalorder %s166_s28, %s7238_s12  ;;  %p7244_p3 = scmp.lt.s32.totalorder %s7238_s12, %s7238_s12 }
 0x113   :  { %p7245_p4 = por %p7244_p3, %p7243_p2 }
 0x115   :  { %p7246_p5 = pnand %p7245_p4, %p7239_p1 }
 0x117   :  { %7249 = shalt.err (!%p7246_p5)
}
 0x118   :  { %171 = dma.hbm_to_vmem [thread:$0]  %s8788_s14, 512, %s166_s28, [#allocation18], %s7360_s5, %s7360_s5, %s7361_s0  }
 0x119   :  { %s7250_s30 = scalar_lea.hbm %s8790_s16, 512 }
 0x11a   :  { %p7251_p6 = scmp.ne.s32.totalorder %s8790_s16, %s7250_s30  ;;  %p7254_p7 = scmp.lt.u32.totalorder %s7250_s30, %s8790_s16 }
 0x11c   :  { %p7256_p8 = pnand %p7254_p7, %p7251_p6 }
 0x11e   :  { %7259 = shalt.err (!%p7256_p8)
}
 0x11f   :  { %s7260_s4 = scalar_lea.vmem %s7699_s27, 512  ;;  %p7265_p10 = scmp.lt.s32.totalorder %s7699_s27, %s7699_s27 }
 0x120   :  { %p7261_p9 = scmp.ne.s32.totalorder %s7699_s27, %s7260_s4  ;;  %p7266_p11 = scmp.lt.s32.totalorder %s7260_s4, %s7260_s4 }
 0x122   :  { %p7267_p12 = por %p7266_p11, %p7265_p10 }
 0x124   :  { %p7268_p13 = pnand %p7267_p12, %p7261_p9 }
 0x126   :  { %7271 = shalt.err (!%p7268_p13)
}
 0x127   :  { %193 = dma.hbm_to_vmem [thread:$0]  %s8790_s16, 512, %s7699_s27, [#allocation21], %s7360_s5, %s7360_s5, %s7361_s0  }
 0x128   :  { %s7374_s17 = smov [#allocation25]   ;;  %s7375_s26 = smov [#allocation26]  }
 0x129   :  { %s209_s25 = sshll.u32 %s7374_s17, 4  ;;  %s225_s6 = sshll.u32 %s7375_s26, 4  ;;  %s210_s25 = int_to_ptr.vmem [resolvable:$true] %s209_s25  ;;  %s7736_s6 = int_to_ptr.vmem [resolvable:$true] %s225_s6 }
 0x12a   :  { %s7272_s2 = scalar_lea.hbm %s8792_s18, 512 }
 0x12b   :  { %p7273_p0 = scmp.ne.s32.totalorder %s8792_s18, %s7272_s2  ;;  %p7276_p1 = scmp.lt.u32.totalorder %s7272_s2, %s8792_s18 }
 0x12d   :  { %p7278_p2 = pnand %p7276_p1, %p7273_p0 }
 0x12f   :  { %7281 = shalt.err (!%p7278_p2)
}
 0x130   :  { %s7282_s16 = scalar_lea.vmem %s210_s25, 512  ;;  %p7287_p4 = scmp.lt.s32.totalorder %s210_s25, %s210_s25 }
 0x131   :  { %p7283_p3 = scmp.ne.s32.totalorder %s210_s25, %s7282_s16  ;;  %p7288_p5 = scmp.lt.s32.totalorder %s7282_s16, %s7282_s16 }
 0x133   :  { %p7289_p6 = por %p7288_p5, %p7287_p4 }
 0x135   :  { %p7290_p7 = pnand %p7289_p6, %p7283_p3 }
 0x137   :  { %7293 = shalt.err (!%p7290_p7)
}
 0x138   :  { %215 = dma.hbm_to_vmem [thread:$0]  %s8792_s18, 512, %s210_s25, [#allocation24], %s7360_s5, %s7360_s5, %s7361_s0  }
 0x139   :  { %s7294_s3 = scalar_lea.hbm %s8795_s21, 512 }
 0x13a   :  { %p7295_p8 = scmp.ne.s32.totalorder %s8795_s21, %s7294_s3  ;;  %p7298_p9 = scmp.lt.u32.totalorder %s7294_s3, %s8795_s21 }
 0x13c   :  { %p7300_p10 = pnand %p7298_p9, %p7295_p8 }
 0x13e   :  { %7303 = shalt.err (!%p7300_p10)
}
 0x13f   :  { %s7304_s14 = scalar_lea.vmem %s7736_s6, 512  ;;  %p7309_p12 = scmp.lt.s32.totalorder %s7736_s6, %s7736_s6 }
 0x140   :  { %p7305_p11 = scmp.ne.s32.totalorder %s7736_s6, %s7304_s14  ;;  %p7310_p13 = scmp.lt.s32.totalorder %s7304_s14, %s7304_s14 }
 0x142   :  { %p7311_p0 = por %p7310_p13, %p7309_p12 }
 0x144   :  { %p7312_p1 = pnand %p7311_p0, %p7305_p11 }
 0x146   :  { %7315 = shalt.err (!%p7312_p1)
}
 0x147   :  { %231 = dma.hbm_to_vmem [thread:$0]  %s8795_s21, 512, %s7736_s6, [#allocation27], %s7360_s5, %s7360_s5, %s7361_s0  }
 0x148   :  { %7338 = dma.done.wait [#allocation3], 256  }
 0x149   :  { %7339 = vsyncadd [#allocation3], 4294967040 }
 0x14a   :  { %7340 = dma.done.wait [#allocation6], 512  }
 0x14b   :  { %7341 = vsyncadd [#allocation6], 4294966784 }
 0x14c   :  { %7342 = dma.done.wait [#allocation9], 272  }
 0x14d   :  { %7343 = vsyncadd [#allocation9], 4294967024 }
 0x14e   :  { %7344 = dma.done.wait [#allocation12], 528  }
 0x14f   :  { %7345 = vsyncadd [#allocation12], 4294966768 }
 0x150   :  { %7346 = dma.done.wait [#allocation15], 528  }
 0x151   :  { %7347 = vsyncadd [#allocation15], 4294966768 }
 0x152   :  { %7348 = dma.done.wait [#allocation18], 528  }
 0x153   :  { %7349 = vsyncadd [#allocation18], 4294966768 }
 0x154   :  { %7350 = dma.done.wait [#allocation21], 528  }
 0x155   :  { %7351 = vsyncadd [#allocation21], 4294966768 }
 0x156   :  { %7352 = dma.done.wait [#allocation24], 528  }
 0x157   :  { %7353 = vsyncadd [#allocation24], 4294966768 }
 0x158   :  { %7354 = dma.done.wait [#allocation27], 512  }
 0x159   :  { %7355 = vsyncadd [#allocation27], 4294966784  ;;  %s8833_s25 = sld [smem:[#allocation45_spill]]  ;;  %v7787_v5 = vld [vmem:[#allocation2] sm:$0xff]  ;;  %v7789_v6 = vld [vmem:[#allocation5] sm:$0xff]  ;;  %vm318_vm0 = vcmask 261120  }
 0x15a   :  { %v524_v8 = vadd.f32 %v7789_v6, %v7787_v5  ;;  %v7798_v9 = vld [vmem:[#allocation2 + $0x8] sm:$0xff]  ;;  %v7800_v10 = vld [vmem:[#allocation5 + $0x8] sm:$0xff]  ;;  %v5351_v12 = vld [vmem:[#allocation10] ss:$0 sm:$0xff]  ;;  %vm723_vm1 = vcmask 64512   ;;  %s7376_s12 = smov 96  }
 0x15b   :  { %v525_v11 = vadd.f32 %v7800_v10, %v7798_v9  ;;  %v307_v19 = vld [vmem:[#allocation19] sm:$0xff]  ;;  %v308_v20 = vld [vmem:[#allocation19 + $0x8] sm:$0xff]  ;;  %v309_v21 = vld [vmem:[#allocation19 + $0x10] sm:$0xff]  ;;  %s8834_s16 = sld [smem:[#allocation40_spill]]  ;;  %s8835_s24 = sld [smem:[#allocation42_spill]]  ;;  %vm809_vm3 = vcmask 130048  }
 0x15c   :  { %5802 = vmatprep.mubr.msk.f32.mxu0 %vm318_vm0, %v524_v8  ;;  %v6252_v22 = vpack.c.bf16 %v308_v20, %v307_v19  ;;  %v310_v23 = vld [vmem:[#allocation19 + $0x18] sm:$0xff]  ;;  %v416_v28 = vld [vmem:[#allocation22] sm:$0xff]  ;;  %v417_v29 = vld [vmem:[#allocation22 + $0x8] sm:$0xff]  ;;  %s7377_s26 = smov 88   ;;  %s7378_s6 = smov 120   ;;  %vm1543_vm4 = vcmask 195584  }
 0x15d   :  { %v6256_v26 = vpack.c.bf16 %v310_v23, %v309_v21  ;;  %v6260_v32 = vpack.c.bf16 %v417_v29, %v416_v28  ;;  %v418_v35 = vld [vmem:[#allocation22 + $0x10] sm:$0xff]  ;;  %v419_v36 = vld [vmem:[#allocation22 + $0x18] sm:$0xff]  ;;  %v619_v43 = vld [vmem:[#allocation11 + $0x8] sm:$0xff]  ;;  %s7379_s1 = smov 112   ;;  %s7380_s15 = smov 80   ;;  %vm2883_vm5 = vcmask 523264  }
 0x15e   :  { %6253 = vmatprep.subr.bf16.mxu1 %v6252_v22  ;;  %v6264_v41 = vpack.c.bf16 %v419_v36, %v418_v35  ;;  %v618_v42 = vld [vmem:[#allocation11] sm:$0xff]  ;;  %v620_v46 = vld [vmem:[#allocation11 + $0x10] sm:$0xff]  ;;  %v621_v47 = vld [vmem:[#allocation11 + $0x18] sm:$0xff]  ;;  %s7381_s2 = smov 72   ;;  %s7382_s22 = smov 104  }
 0x15f   :  { %v526_v0 = vld [vmem:[%s8833_s25] sm:$0xff]  ;;  %v527_v1 = vld [vmem:[%s8833_s25 + $0x8] sm:$0xff]  ;;  %v528_v2 = vld [vmem:[%s8833_s25 + $0x10] sm:$0xff]  ;;  %6255 = vmatpush3.bf16.msra.mxu1 %v6252_v22  ;;  %v7845_v45 = vpack.c.bf16 %v619_v43, %v618_v42  ;;  %v7850_v48 = vpack.c.bf16 %v621_v47, %v620_v46  ;;  %s7383_s8 = smov 16   ;;  %s8838_s28 = sld [smem:[#allocation49_spill]] }
 0x160   :  { %v7782_v3 = vpack.c.bf16 %v527_v1, %v526_v0  ;;  %v529_v4 = vld [vmem:[%s8833_s25 + $0x18] sm:$0xff]  ;;  %6257 = vmatprep.subr.bf16.mxu1 %v6256_v26  ;;  %vm7864_vm2 = vmpackc.low %vm723_vm1, %vm723_vm1  ;;  %v5341_v57 = vld [vmem:[#allocation20] ss:$0 sm:$0xff]  ;;  %s8839_s21 = sld [smem:[#allocation50_spill]] }
 0x161   :  { %v7791_v7 = vpack.c.bf16 %v529_v4, %v528_v2  ;;  %v288_v24 = vld [vmem:[%s8834_s16] sm:$0xff]  ;;  %v289_v30 = vld [vmem:[%s8834_s16 + $0x8] sm:$0xff]  ;;  %v290_v33 = vld [vmem:[%s8834_s16 + $0x10] sm:$0xff] }
 0x162   :  { %6269 = vmatprep.subr.bf16.mxu0 %v7782_v3  ;;  %v294_v25 = vld [vmem:[%s8835_s24] sm:$0xff]  ;;  %v295_v31 = vld [vmem:[%s8835_s24 + $0x8] sm:$0xff]  ;;  %v296_v34 = vld [vmem:[%s8835_s24 + $0x10] sm:$0xff] }
 0x163   :  { %6271 = vmatpush3.bf16.msra.mxu0 %v7782_v3  ;;  %v303_v27 = vadd.f32 %v294_v25, %v288_v24  ;;  %v304_v37 = vadd.f32 %v295_v31, %v289_v30  ;;  %6259 = vmatpush3.bf16.msra.mxu1 %v6256_v26  ;;  %v305_v38 = vadd.f32 %v296_v34, %v290_v33  ;;  %v291_v39 = vld [vmem:[%s8834_s16 + $0x18] sm:$0xff]  ;;  %v5346_v0 = vld [vmem:[#allocation23] ss:$0 sm:$0xff]  ;;  %v5354_v22 = vld [vmem:[#allocation13] ss:$0 sm:$0xff] }
 0x164   :  { %6273 = vmatprep.subr.bf16.mxu0 %v7791_v7  ;;  %v297_v40 = vld [vmem:[%s8835_s24 + $0x18] sm:$0xff]  ;;  %6261 = vmatprep.subr.bf16.mxu1 %v6260_v32 }
 0x165   :  { %5774 = vmatprep.mubr.msk.f32.mxu1 %vm318_vm0, %v303_v27  ;;  %v306_v44 = vadd.f32 %v297_v40, %v291_v39 }
 0x166   :  { %5775 = vmatmul.mubr.msk.f32.vlgmr.msra.gmra.mrb[0].mxu1 %vm318_vm0, %v304_v37 }
 0x167   :  { %6275 = vmatpush3.bf16.msra.mxu0 %v7791_v7  ;;  %6263 = vmatpush3.bf16.msra.mxu1 %v6260_v32 }
 0x168   :  { %5777 = vmatprep.mubr.msk.f32.mxu1 %vm318_vm0, %v305_v38  ;;  %6265 = vmatprep.subr.bf16.mxu1 %v6264_v41 }
 0x16a   :  { %5803 = vmatmul.mubr.msk.f32.vlgmr.msra.gmra.mrb[0].mxu0 %vm318_vm0, %v525_v11  ;;  %5778 = vmatmul.mubr.msk.f32.gmra.mrb[2].mxu1 %vm318_vm0, %v306_v44  ;;  %v7877_v11 = vld [vmem:[#allocation7 + $0x8] sm:$0xff] }
 0x16b   :  { %6267 = vmatpush3.bf16.msra.mxu1 %v6264_v41  ;;  %5788 = vmatprep.mubr.msk.f32.mxu1 %vm318_vm0, %v288_v24 }
 0x16c   :  { %6277 = vmatprep.subr.bf16.mxu1 %v7845_v45 }
 0x16e   :  { %5789 = vmatmul.mubr.msk.f32.vlgmr.msra.gmra.mrb[4].mxu1 %vm318_vm0, %v289_v30 }
 0x16f   :  { %6279 = vmatpush3.bf16.msra.mxu1 %v7845_v45  ;;  %5791 = vmatprep.mubr.msk.f32.mxu1 %vm318_vm0, %v290_v33 }
 0x170   :  { %6281 = vmatprep.subr.bf16.mxu1 %v7850_v48 }
 0x172   :  { %5792 = vmatmul.mubr.msk.f32.gmra.mrb[6].mxu1 %vm318_vm0, %v291_v39 }
 0x173   :  { %6283 = vmatpush3.bf16.msra.mxu1 %v7850_v48  ;;  %5813 = vmatprep.mubr.msk.f32.mxu1 %vm318_vm0, %v7787_v5 }
 0x176   :  { %5814 = vmatmul.mubr.msk.f32.vlgmr.msra.gmra.mrb[8].mxu1 %vm318_vm0, %v7798_v9 }
 0x239   :  { %v5776_v55 = vpop.f32.mrb[0].mxu1 }
 0x23a   :  { %v397_v56 = vpop.f32.mrb[1].mxu1  ;;  %v403_v40 = vadd.f32 %v5776_v55, %v5341_v57 }
 0x23b   :  { %v398_v41 = vadd.f32 %v5341_v57, %v397_v56 }
 0x23d   :  { %v5804_v13 = vpop.f32.mrb[0].mxu0  ;;  %v5779_v58 = vpop.f32.mrb[2].mxu1  ;;  %v7899_v43 = vpack.c.bf16 %v403_v40, %v398_v41  ;;  %v7901_v44 = vpack.i.bf16 %v403_v40, %v398_v41 }
 0x23e   :  { %v7807_v14 = vadd.f32 %v5804_v13, %v5351_v12  ;;  %v609_v15 = vpop.f32.mrb[1].mxu0  ;;  %v413_v59 = vadd.f32 %v5779_v58, %v5341_v57  ;;  %v407_v60 = vpop.f32.mrb[3].mxu1 }
 0x23f   :  { %v610_v16 = vadd.f32 %v5351_v12, %v609_v15  ;;  %v408_v61 = vadd.f32 %v5341_v57, %v407_v60  ;;  %v7879_v12 = vld [vmem:[#allocation7] sm:$0xff] }
 0x240   :  { %v7873_v54 = vmul.f32 0.35355338, %v7807_v14 }
 0x241   :  { %v7810_v17 = vpack.i.bf16 %v7807_v14, %v610_v16  ;;  %v7812_v18 = vmul.f32 0.35355338, %v610_v16  ;;  %v5790_v62 = vpop.f32.mrb[4].mxu1 }
 0x242   :  { %v505_v63 = vpop.f32.mrb[5].mxu1  ;;  %v511_v46 = vadd.f32 %v5790_v62, %v5346_v0 }
 0x243   :  { %6665 = vrot.lane.b32.xlu0 %v7810_v17, %s7376_s12  ;;  %5820 = vmatprep.mubr.msk.f32.mxu0 %vm723_vm1, %v7812_v18  ;;  %v506_v47 = vadd.f32 %v5346_v0, %v505_v63 }
 0x245   :  { %v5793_v1 = vpop.f32.mrb[6].mxu1 }
 0x246   :  { %v521_v2 = vadd.f32 %v5793_v1, %v5346_v0  ;;  %v515_v4 = vpop.f32.mrb[7].mxu1 }
 0x247   :  { %v516_v8 = vadd.f32 %v5346_v0, %v515_v4 }
 0x249   :  { %v5815_v21 = vpop.f32.mrb[8].mxu1  ;;  %v7911_v58 = vpack.c.bf16 %v521_v2, %v516_v8  ;;  %v7913_v55 = vpack.i.bf16 %v521_v2, %v516_v8 }
 0x24a   :  { %v701_v23 = vpop.f32.mrb[9].mxu1  ;;  %v7885_v24 = vadd.f32 %v5815_v21, %v5354_v22 }
 0x24b   :  { %v7887_v25 = vadd.f32 %v5354_v22, %v701_v23 }
 0x24d   :  { %v6290_v26 = vpack.c.bf16 %v7885_v24, %v7887_v25 }
 0x24f   :  { %6291 = vmatprep.subr.bf16.mxu1 %v6290_v26 }
 0x250   :  { %6293 = vmatpush3.bf16.msra.mxu1 %v6290_v26 }
 0x2b5   :  { %v6666_v49 = vpop.permute.xlu0 %6665 }
 0x2b6   :  { %v6668_v50 = vunpack.i.h.bf16 %v6666_v49  ;;  %v6667_v51 = vunpack.i.l.bf16 %v6666_v49  ;;  %v7903_v49 = vpack.c.bf16 %v413_v59, %v408_v61 }
 0x2b8   :  { %v6284_v53 = vpack.c.bf16 %v6668_v50, %v6667_v51  ;;  %v7905_v50 = vpack.i.bf16 %v413_v59, %v408_v61  ;;  %v7907_v51 = vpack.c.bf16 %v511_v46, %v506_v47 }
 0x2ba   :  { %6286 = vmatprep.subr.msk.bf16.mxu0 %vm7864_vm2, %v6284_v53 }
 0x2bb   :  { %6289 = vmatpush3.bf16.xpose.msk.msra.mxu0 %vm7864_vm2, %v6284_v53  ;;  %v7909_v53 = vpack.i.bf16 %v511_v46, %v506_v47 }
 0x2c2   :  { %5821 = vmatmul.mubr.msk.f32.vlgmr.msra.gmra.mrb[2].mxu0 %vm723_vm1, %v7873_v54 }
 0x395   :  { %v5822_v13 = vpop.f32.mrb[2].mxu0 }
 0x396   :  { %v806_v14 = vadd.f32 %v5822_v13, %v7877_v11  ;;  %v800_v15 = vpop.f32.mrb[3].mxu0 }
 0x397   :  { %v801_v16 = vadd.f32 %v800_v15, %v7879_v12 }
 0x398   :  { %v813_v19 = vsel %vm809_vm3, %v806_v14, -inf }
 0x399   :  { %814 = vmax.xlane.f32.xlu1 %v813_v19  ;;  %v810_v20 = vsel %vm809_vm3, %v801_v16, -inf  ;;  %v7935_v19 = vpack.i.bf16 %v7885_v24, %v7887_v25 }
 0x39a   :  { %811 = vmax.xlane.f32.xlu0 %v810_v20 }
 0x3aa   :  { %6670 = vrot.lane.b32.xlu1 %v7810_v17, %s7377_s26 }
 0x3ae   :  { %913 = vrot.lane.b32.xlu1 %v7812_v18, %s7378_s6 }
 0x426   :  { %v815_v27 = vpop.xlane.xlu1 %814 }
 0x427   :  { %v817_v28 = vsub.f32 %v806_v14, %v815_v27  ;;  %v812_v29 = vpop.xlane.xlu0 %811 }
 0x428   :  { %v816_v30 = vsub.f32 %v801_v16, %v812_v29 }
 0x429   :  { %v820_v31 = vmul.f32 1.442695, %v817_v28 }
 0x42a   :  { %v818_v32 = vmul.f32 1.442695, %v816_v30  ;;  %v6671_v33 = vpop.permute.xlu1 %6670 }
 0x42b   :  { %6794 = vpow2.f32 %v820_v31  ;;  %v6673_v34 = vunpack.i.h.bf16 %v6671_v33  ;;  %v6672_v35 = vunpack.i.l.bf16 %v6671_v33 }
 0x42c   :  { %6796 = vpow2.f32 %v818_v32 }
 0x42d   :  { %v6294_v36 = vpack.c.bf16 %v6673_v34, %v6672_v35 }
 0x42e   :  { %v914_v56 = vpop.permute.xlu1 %913 }
 0x42f   :  { %6296 = vmatprep.subr.msk.bf16.mxu1 %vm7864_vm2, %v6294_v36 }
 0x435   :  { %v6795_v37 = vpop.eup %6794 }
 0x436   :  { %v825_v38 = vsel %vm809_vm3, %v6795_v37, 0.0  ;;  %v6797_v39 = vpop.eup %6796 }
 0x437   :  { %826 = vadd.xlane.f32.xlu1 %v825_v38  ;;  %v822_v42 = vsel %vm809_vm3, %v6797_v39, 0.0 }
 0x43b   :  { %823 = vadd.xlane.f32.xlu1 %v822_v42 }
 0x44c   :  { %915 = vrot.lane.b32.xlu1 %v7873_v54, %s7378_s6 }
 0x4c4   :  { %v827_v57 = vpop.xlane.xlu1 %826 }
 0x4c5   :  { %6798 = vrcp.f32 %v827_v57 }
 0x4c8   :  { %v824_v60 = vpop.xlane.xlu1 %823 }
 0x4c9   :  { %6800 = vrcp.f32 %v824_v60 }
 0x4cc   :  { %v916_v0 = vpop.permute.xlu1 %915 }
 0x4cf   :  { %v6799_v62 = vpop.eup %6798 }
 0x4d0   :  { %v831_v61 = vmul.f32 %v6799_v62, %v6795_v37 }
 0x4d3   :  { %v6801_v63 = vpop.eup %6800 }
 0x4d4   :  { %v830_v59 = vmul.f32 %v6801_v63, %v6797_v39 }
 0x4d6   :  { %5827 = vmatprep.mubr.msk.f32.mxu1 %vm809_vm3, %v830_v59 }
 0x4d7   :  { %5828 = vmatmul.mubr.msk.f32.vlgmr.msra.gmra.mrb[10].mxu1 %vm809_vm3, %v831_v61 }
 0x4d8   :  { %6299 = vmatpush3.bf16.xpose.msk.msra.mxu1 %vm7864_vm2, %v6294_v36  ;;  %5834 = vmatprep.mubr.msk.f32.mxu1 %vm723_vm1, %v914_v56 }
 0x4df   :  { %5835 = vmatmul.mubr.msk.f32.vlgmr.msra.gmra.mrb[12].mxu1 %vm723_vm1, %v916_v0 }
 0x5aa   :  { %v7923_v1 = vpop.f32.mrb[10].mxu1 }
 0x5ab   :  { %v7925_v2 = vpop.f32.mrb[11].mxu1 }
 0x5b2   :  { %v5836_v4 = vpop.f32.mrb[12].mxu1 }
 0x5b3   :  { %v1001_v8 = vadd.f32 %v5836_v4, %v7877_v11  ;;  %v995_v13 = vpop.f32.mrb[13].mxu1 }
 0x5b4   :  { %v996_v14 = vadd.f32 %v995_v13, %v7879_v12 }
 0x5b5   :  { %v1007_v15 = vsel %vm809_vm3, %v1001_v8, -inf }
 0x5b6   :  { %1008 = vmax.xlane.f32.xlu1 %v1007_v15  ;;  %v1004_v16 = vsel %vm809_vm3, %v996_v14, -inf }
 0x5b7   :  { %1005 = vmax.xlane.f32.xlu0 %v1004_v16 }
 0x5c7   :  { %1117 = vrot.lane.b32.xlu1 %v7873_v54, %s7379_s1 }
 0x5cd   :  { %6675 = vrot.lane.b32.xlu0 %v7935_v19, %s7378_s6 }
 0x643   :  { %v1009_v20 = vpop.xlane.xlu1 %1008 }
 0x644   :  { %v1011_v21 = vsub.f32 %v1001_v8, %v1009_v20  ;;  %v1006_v22 = vpop.xlane.xlu0 %1005 }
 0x645   :  { %v1010_v23 = vsub.f32 %v996_v14, %v1006_v22 }
 0x646   :  { %v1014_v26 = vmul.f32 1.442695, %v1011_v21 }
 0x647   :  { %v1012_v27 = vmul.f32 1.442695, %v1010_v23  ;;  %v1118_v56 = vpop.permute.xlu1 %1117 }
 0x648   :  { %6802 = vpow2.f32 %v1014_v26  ;;  %v6676_v28 = vpop.permute.xlu0 %6675 }
 0x649   :  { %v6678_v29 = vunpack.i.h.bf16 %v6676_v28  ;;  %v6677_v30 = vunpack.i.l.bf16 %v6676_v28  ;;  %6804 = vpow2.f32 %v1012_v27 }
 0x64b   :  { %v6300_v31 = vpack.c.bf16 %v6678_v29, %v6677_v30 }
 0x64d   :  { %6301 = vmatprep.subr.bf16.mxu0 %v6300_v31 }
 0x64e   :  { %6303 = vmatpush3.bf16.msra.mxu0 %v6300_v31 }
 0x652   :  { %v6803_v32 = vpop.eup %6802 }
 0x653   :  { %v1019_v24 = vsel %vm809_vm3, %v6803_v32, 0.0  ;;  %v6805_v25 = vpop.eup %6804 }
 0x654   :  { %1020 = vadd.xlane.f32.xlu0 %v1019_v24  ;;  %v1016_v33 = vsel %vm809_vm3, %v6805_v25, 0.0 }
 0x658   :  { %1017 = vadd.xlane.f32.xlu0 %v1016_v33 }
 0x66e   :  { %6680 = vrot.lane.b32.xlu0 %v7810_v17, %s7380_s15 }
 0x672   :  { %1115 = vrot.lane.b32.xlu0 %v7812_v18, %s7379_s1 }
 0x6e1   :  { %v1021_v34 = vpop.xlane.xlu0 %1020 }
 0x6e2   :  { %6806 = vrcp.f32 %v1021_v34 }
 0x6e5   :  { %v1018_v35 = vpop.xlane.xlu0 %1017 }
 0x6e6   :  { %6808 = vrcp.f32 %v1018_v35  ;;  %v1676_v35 = vld [vmem:[#allocation16] sm:$0xff] }
 0x6e9   :  { %v6681_v36 = vpop.permute.xlu0 %6680 }
 0x6ea   :  { %v6683_v37 = vunpack.i.h.bf16 %v6681_v36  ;;  %v6682_v38 = vunpack.i.l.bf16 %v6681_v36  ;;  %v1677_v36 = vld [vmem:[#allocation16 + $0x8] sm:$0xff] }
 0x6ec   :  { %v6304_v39 = vpack.c.bf16 %v6683_v37, %v6682_v38  ;;  %v6807_v40 = vpop.eup %6806 }
 0x6ed   :  { %v1025_v46 = vmul.f32 %v6807_v40, %v6803_v32  ;;  %v1116_v47 = vpop.permute.xlu0 %1115  ;;  %v7973_v40 = vpack.c.bf16 %v1677_v36, %v1676_v35 }
 0x6ee   :  { %6306 = vmatprep.subr.msk.bf16.mxu0 %vm7864_vm2, %v6304_v39 }
 0x6f0   :  { %v6809_v41 = vpop.eup %6808 }
 0x6f1   :  { %v1024_v42 = vmul.f32 %v6809_v41, %v6805_v25 }
 0x6f3   :  { %5841 = vmatprep.mubr.msk.f32.mxu0 %vm809_vm3, %v1024_v42 }
 0x6f4   :  { %5842 = vmatmul.mubr.msk.f32.vlgmr.msra.gmra.mrb[4].mxu0 %vm809_vm3, %v1025_v46 }
 0x6f5   :  { %6309 = vmatpush3.bf16.xpose.msk.msra.mxu0 %vm7864_vm2, %v6304_v39  ;;  %5848 = vmatprep.mubr.msk.f32.mxu0 %vm723_vm1, %v1116_v47 }
 0x6fc   :  { %5849 = vmatmul.mubr.msk.f32.vlgmr.msra.gmra.mrb[6].mxu0 %vm723_vm1, %v1118_v56 }
 0x7c7   :  { %v7953_v57 = vpop.f32.mrb[4].mxu0 }
 0x7c8   :  { %v7955_v60 = vpop.f32.mrb[5].mxu0 }
 0x7cf   :  { %v5850_v62 = vpop.f32.mrb[6].mxu0 }
 0x7d0   :  { %v1203_v63 = vadd.f32 %v5850_v62, %v7877_v11  ;;  %v1197_v59 = vpop.f32.mrb[7].mxu0 }
 0x7d1   :  { %v1198_v61 = vadd.f32 %v1197_v59, %v7879_v12 }
 0x7d2   :  { %v1209_v0 = vsel %vm809_vm3, %v1203_v63, -inf }
 0x7d3   :  { %1210 = vmax.xlane.f32.xlu1 %v1209_v0  ;;  %v1206_v4 = vsel %vm809_vm3, %v1198_v61, -inf }
 0x7d4   :  { %1207 = vmax.xlane.f32.xlu0 %v1206_v4 }
 0x7e4   :  { %6690 = vrot.lane.b32.xlu1 %v7810_v17, %s7381_s2 }
 0x7ea   :  { %6685 = vrot.lane.b32.xlu0 %v7935_v19, %s7379_s1 }
 0x860   :  { %v1211_v8 = vpop.xlane.xlu1 %1210 }
 0x861   :  { %v1213_v13 = vsub.f32 %v1203_v63, %v1211_v8  ;;  %v1208_v14 = vpop.xlane.xlu0 %1207 }
 0x862   :  { %v1212_v15 = vsub.f32 %v1198_v61, %v1208_v14 }
 0x863   :  { %v1216_v16 = vmul.f32 1.442695, %v1213_v13 }
 0x864   :  { %v1214_v20 = vmul.f32 1.442695, %v1212_v15  ;;  %v6691_v21 = vpop.permute.xlu1 %6690 }
 0x865   :  { %6810 = vpow2.f32 %v1216_v16  ;;  %v6686_v22 = vpop.permute.xlu0 %6685  ;;  %v6693_v23 = vunpack.i.h.bf16 %v6691_v21  ;;  %v6692_v26 = vunpack.i.l.bf16 %v6691_v21 }
 0x866   :  { %v6688_v27 = vunpack.i.h.bf16 %v6686_v22  ;;  %v6687_v28 = vunpack.i.l.bf16 %v6686_v22  ;;  %6812 = vpow2.f32 %v1214_v20 }
 0x867   :  { %v6314_v30 = vpack.c.bf16 %v6693_v23, %v6692_v26 }
 0x868   :  { %v6310_v29 = vpack.c.bf16 %v6688_v27, %v6687_v28 }
 0x86a   :  { %6311 = vmatprep.subr.bf16.mxu1 %v6310_v29 }
 0x86b   :  { %6313 = vmatpush3.bf16.msra.mxu1 %v6310_v29 }
 0x86c   :  { %6316 = vmatprep.subr.msk.bf16.mxu1 %vm7864_vm2, %v6314_v30 }
 0x86f   :  { %v6811_v17 = vpop.eup %6810 }
 0x870   :  { %v1221_v31 = vsel %vm809_vm3, %v6811_v17, 0.0  ;;  %v6813_v32 = vpop.eup %6812 }
 0x871   :  { %1222 = vadd.xlane.f32.xlu0 %v1221_v31  ;;  %v1218_v24 = vsel %vm809_vm3, %v6813_v32, 0.0  ;;  %v712_v31 = vld [vmem:[%s8784_s10 + $0x10] sm:$0xff] }
 0x875   :  { %1219 = vadd.xlane.f32.xlu0 %v1218_v24 }
 0x88b   :  { %1315 = vrot.lane.b32.xlu0 %v7812_v18, %s7382_s22  ;;  %v1678_v18 = vld [vmem:[#allocation16 + $0x10] sm:$0xff] }
 0x88f   :  { %1317 = vrot.lane.b32.xlu0 %v7873_v54, %s7382_s22  ;;  %v1679_v54 = vld [vmem:[#allocation16 + $0x18] sm:$0xff] }
 0x890   :  { %v7981_v42 = vpack.c.bf16 %v1679_v54, %v1678_v18 }
 0x8fe   :  { %v1223_v25 = vpop.xlane.xlu0 %1222 }
 0x8ff   :  { %6814 = vrcp.f32 %v1223_v25 }
 0x902   :  { %v1220_v33 = vpop.xlane.xlu0 %1219 }
 0x903   :  { %6816 = vrcp.f32 %v1220_v33 }
 0x906   :  { %v1316_v41 = vpop.permute.xlu0 %1315 }
 0x909   :  { %v6815_v34 = vpop.eup %6814 }
 0x90a   :  { %v1227_v39 = vmul.f32 %v6815_v34, %v6811_v17  ;;  %v1318_v46 = vpop.permute.xlu0 %1317 }
 0x90d   :  { %v6817_v37 = vpop.eup %6816 }
 0x90e   :  { %v1226_v38 = vmul.f32 %v6817_v37, %v6813_v32  ;;  %v713_v32 = vld [vmem:[%s8784_s10 + $0x18] sm:$0xff] }
 0x90f   :  { %v8017_v34 = vpack.c.bf16 %v713_v32, %v712_v31 }
 0x910   :  { %5855 = vmatprep.mubr.msk.f32.mxu1 %vm809_vm3, %v1226_v38 }
 0x911   :  { %5856 = vmatmul.mubr.msk.f32.vlgmr.msra.gmra.mrb[14].mxu1 %vm809_vm3, %v1227_v39 }
 0x912   :  { %6319 = vmatpush3.bf16.xpose.msk.msra.mxu1 %vm7864_vm2, %v6314_v30  ;;  %5862 = vmatprep.mubr.msk.f32.mxu1 %vm723_vm1, %v1316_v41 }
 0x913   :  { %6333 = vmatprep.subr.bf16.mxu1 %v7973_v40 }
 0x919   :  { %5863 = vmatmul.mubr.msk.f32.vlgmr.msra.gmra.mrb[16].mxu1 %vm723_vm1, %v1318_v46 }
 0x91a   :  { %6335 = vmatpush3.bf16.msra.mxu1 %v7973_v40 }
 0x91b   :  { %6337 = vmatprep.subr.bf16.mxu1 %v7981_v42 }
 0x91e   :  { %6339 = vmatpush3.bf16.msra.mxu1 %v7981_v42 }
 0x91f   :  { %6353 = vmatprep.subr.bf16.mxu1 %v7907_v51 }
 0x9e4   :  { %v5857_v47 = vpop.f32.mrb[14].mxu1 }
 0x9e5   :  { %v1306_v56 = vpop.f32.mrb[15].mxu1 }
 0x9ec   :  { %v5864_v62 = vpop.f32.mrb[16].mxu1 }
 0x9ed   :  { %v1403_v63 = vadd.f32 %v5864_v62, %v7877_v11  ;;  %v1397_v59 = vpop.f32.mrb[17].mxu1 }
 0x9ee   :  { %v1398_v61 = vadd.f32 %v1397_v59, %v7879_v12 }
 0x9ef   :  { %v1409_v0 = vsel %vm809_vm3, %v1403_v63, -inf }
 0x9f0   :  { %1410 = vmax.xlane.f32.xlu0 %v1409_v0  ;;  %v1406_v4 = vsel %vm809_vm3, %v1398_v61, -inf }
 0x9f1   :  { %1407 = vmax.xlane.f32.xlu1 %v1406_v4 }
 0xa7d   :  { %v1411_v8 = vpop.xlane.xlu0 %1410 }
 0xa7e   :  { %v1413_v13 = vsub.f32 %v1403_v63, %v1411_v8  ;;  %v1408_v14 = vpop.xlane.xlu1 %1407 }
 0xa7f   :  { %v1412_v15 = vsub.f32 %v1398_v61, %v1408_v14 }
 0xa80   :  { %v1416_v16 = vmul.f32 1.442695, %v1413_v13 }
 0xa81   :  { %v1414_v20 = vmul.f32 1.442695, %v1412_v15 }
 0xa82   :  { %6818 = vpow2.f32 %v1416_v16 }
 0xa83   :  { %6820 = vpow2.f32 %v1414_v20 }
 0xa8c   :  { %v6819_v21 = vpop.eup %6818 }
 0xa8d   :  { %v6821_v22 = vpop.eup %6820  ;;  %v1421_v11 = vsel %vm809_vm3, %v6819_v21, 0.0 }
 0xa8e   :  { %1422 = vadd.xlane.f32.xlu1 %v1421_v11  ;;  %v1418_v12 = vsel %vm809_vm3, %v6821_v22, 0.0 }
 0xa8f   :  { %1419 = vadd.xlane.f32.xlu0 %v1418_v12 }
 0xa9f   :  { %1517 = vrot.lane.b32.xlu1 %v7955_v60, %s7361_s0  ;;  %v710_v60 = vld [vmem:[%s8784_s10] sm:$0xff] }
 0xaa3   :  { %1519 = vrot.lane.b32.xlu1 %v7953_v57, %s7361_s0  ;;  %v711_v57 = vld [vmem:[%s8784_s10 + $0x8] sm:$0xff]  ;;  %s7384_s10 = smov 24  }
 0xaa4   :  { %v8008_v30 = vpack.c.bf16 %v711_v57, %v710_v60  ;;  %v1662_v57 = vlaneseq }
 0xaa5   :  { %6695 = vrot.lane.b32.xlu0 %v7935_v19, %s7382_s22 }
 0xaa7   :  { %1527 = vrot.lane.b32.xlu1 %v5857_v47, %s7383_s8 }
 0xaa9   :  { %1525 = vrot.lane.b32.xlu0 %v1306_v56, %s7383_s8 }
 0xb1b   :  { %v1423_v23 = vpop.xlane.xlu1 %1422 }
 0xb1c   :  { %6822 = vrcp.f32 %v1423_v23  ;;  %v1420_v26 = vpop.xlane.xlu0 %1419 }
 0xb1d   :  { %6824 = vrcp.f32 %v1420_v26 }
 0xb1f   :  { %v1518_v37 = vpop.permute.xlu1 %1517 }
 0xb20   :  { %v6696_v27 = vpop.permute.xlu0 %6695  ;;  %v1539_v18 = vsel %vm723_vm1, %v7925_v2, %v1518_v37 }
 0xb21   :  { %v6698_v28 = vunpack.i.h.bf16 %v6696_v27  ;;  %v6697_v19 = vunpack.i.l.bf16 %v6696_v27 }
 0xb23   :  { %v6320_v29 = vpack.c.bf16 %v6698_v28, %v6697_v19  ;;  %v1520_v38 = vpop.permute.xlu1 %1519 }
 0xb24   :  { %v1526_v41 = vpop.permute.xlu0 %1525  ;;  %v1540_v46 = vsel %vm723_vm1, %v7923_v1, %v1520_v38  ;;  %v5381_v1 = vld [vmem:[#allocation14] ss:$0 sm:$0xff] }
 0xb25   :  { %6321 = vmatprep.subr.bf16.mxu0 %v6320_v29  ;;  %v1541_v47 = vsel %vm809_vm3, %v1539_v18, %v1526_v41 }
 0xb26   :  { %v6823_v17 = vpop.eup %6822  ;;  %6323 = vmatpush3.bf16.msra.mxu0 %v6320_v29 }
 0xb27   :  { %v6825_v24 = vpop.eup %6824  ;;  %6325 = vmatprep.subr.bf16.mxu0 %v8008_v30  ;;  %v1427_v33 = vmul.f32 %v6823_v17, %v6819_v21  ;;  %v1528_v39 = vpop.permute.xlu1 %1527  ;;  %v8054_v17 = vshrl.u32 %v1662_v57, 7 }
 0xb28   :  { %v1426_v25 = vmul.f32 %v6825_v24, %v6821_v22  ;;  %v1542_v62 = vsel %vm809_vm3, %v1540_v46, %v1528_v39  ;;  %v8060_v24 = vld [vmem:[%s8794_s20] sm:$0xff] }
 0xb29   :  { %v1664_v32 = vsub.s32 0, %v8054_v17 }
 0xb2a   :  { %5869 = vmatprep.mubr.msk.f32.mxu0 %vm809_vm3, %v1426_v25  ;;  %v1670_v25 = vsub.s32 1, %v8054_v17 }
 0xb2b   :  { %5870 = vmatmul.mubr.msk.f32.vlgmr.msra.gmra.mrb[8].mxu0 %vm809_vm3, %v1427_v33  ;;  %v8064_v33 = vrot.slane %v8060_v24, %v1664_v32 }
 0xb2c   :  { %6327 = vmatpush3.bf16.msra.mxu0 %v8008_v30  ;;  %v8067_v37 = vrot.slane %v8060_v24, %v1670_v25 }
 0xb2d   :  { %6329 = vmatprep.subr.bf16.mxu0 %v8017_v34 }
 0xb30   :  { %6331 = vmatpush3.bf16.msra.mxu0 %v8017_v34 }
 0xb31   :  { %6342 = vmatprep.subr.msk.bf16.mxu0 %vm7864_vm2, %v7899_v43 }
 0xbfe   :  { %v5871_v35 = vpop.f32.mrb[8].mxu0 }
 0xbff   :  { %1535 = vrot.lane.b32.xlu1 %v5871_v35, %s7384_s10  ;;  %v1506_v36 = vpop.f32.mrb[9].mxu0 }
 0xc00   :  { %1533 = vrot.lane.b32.xlu0 %v1506_v36, %s7384_s10 }
 0xc71   :  { %v1536_v54 = vpop.permute.xlu1 %1535 }
 0xc72   :  { %v1534_v56 = vpop.permute.xlu0 %1533  ;;  %v1545_v59 = vsel %vm1543_vm4, %v1542_v62, %v1536_v54  ;;  %v5384_v62 = vld [vmem:[#allocation17] ss:$0 sm:$0xff] }
 0xc73   :  { %v1544_v63 = vsel %vm1543_vm4, %v1541_v47, %v1534_v56 }
 0xc74   :  { %5880 = vmatprep.mubr.msk.f32.mxu0 %vm318_vm0, %v1544_v63 }
 0xc75   :  { %5881 = vmatmul.mubr.msk.f32.vlgmr.msra.gmra.mrb[10].mxu0 %vm318_vm0, %v1545_v59 }
 0xc76   :  { %6345 = vmatpush3.bf16.xpose.msk.msra.mxu0 %vm7864_vm2, %v7899_v43 }
 0xc77   :  { %6348 = vmatprep.subr.msk.bf16.mxu0 %vm7864_vm2, %v7903_v49 }
 0xc7e   :  { %6351 = vmatpush3.bf16.xpose.msk.msra.mxu0 %vm7864_vm2, %v7903_v49 }
 0xd48   :  { %v5882_v2 = vpop.f32.mrb[10].mxu0 }
 0xd49   :  { %v1630_v61 = vadd.f32 %v5882_v2, %v5381_v1  ;;  %v1624_v0 = vpop.f32.mrb[11].mxu0 }
 0xd4a   :  { %v1625_v4 = vadd.f32 %v5381_v1, %v1624_v0  ;;  %v8096_v0 = vld [vmem:[#allocation8] sm:$0xff] }
 0xd4b   :  { %v1634_v8 = vadd.f32 %v1630_v61, %v7798_v9 }
 0xd4c   :  { %v1633_v13 = vadd.f32 %v1625_v4, %v7787_v5 }
 0xd4d   :  { %v1638_v14 = vsel %vm318_vm0, %v1634_v8, 0.0 }
 0xd4e   :  { %1639 = vadd.xlane.f32.xlu1 %v1638_v14  ;;  %v1635_v15 = vsel %vm318_vm0, %v1633_v13, 0.0 }
 0xd4f   :  { %1636 = vadd.xlane.f32.xlu0 %v1635_v15 }
 0xddb   :  { %v1640_v16 = vpop.xlane.xlu1 %1639 }
 0xddc   :  { %v1643_v20 = vmul.f32 0.03125, %v1640_v16  ;;  %v1637_v21 = vpop.xlane.xlu0 %1636 }
 0xddd   :  { %v1642_v22 = vmul.f32 0.03125, %v1637_v21 }
 0xdde   :  { %v1645_v11 = vsub.f32 %v1634_v8, %v1643_v20 }
 0xddf   :  { %v1644_v12 = vsub.f32 %v1633_v13, %v1642_v22 }
 0xde0   :  { %v1647_v27 = vmul.f32 %v1645_v11, %v1645_v11 }
 0xde1   :  { %v1646_v23 = vmul.f32 %v1644_v12, %v1644_v12 }
 0xde2   :  { %v1651_v9 = vsel %vm318_vm0, %v1647_v27, 0.0 }
 0xde3   :  { %v1648_v26 = vsel %vm318_vm0, %v1646_v23, 0.0 }
 0xde4   :  { %1649 = vadd.xlane.f32.xlu0 %v1648_v26 }
 0xde8   :  { %1652 = vadd.xlane.f32.xlu0 %v1651_v9 }
 0xe71   :  { %v1650_v5 = vpop.xlane.xlu0 %1649 }
 0xe72   :  { %v1654_v60 = vmul.f32 0.03125, %v1650_v5 }
 0xe74   :  { %v1656_v28 = vadd.f32 1e-05, %v1654_v60 }
 0xe75   :  { %v1653_v19 = vpop.xlane.xlu0 %1652 }
 0xe76   :  { %6826 = vrsqrt.f32 %v1656_v28  ;;  %v1655_v29 = vmul.f32 0.03125, %v1653_v19 }
 0xe78   :  { %v1657_v31 = vadd.f32 1e-05, %v1655_v29 }
 0xe7a   :  { %6828 = vrsqrt.f32 %v1657_v31 }
 0xe80   :  { %v6827_v35 = vpop.eup %6826 }
 0xe81   :  { %v1660_v36 = vmul.f32 %v6827_v35, %v1644_v12 }
 0xe83   :  { %v1666_v38 = vmul.f32 %v8064_v33, %v1660_v36 }
 0xe84   :  { %v6829_v39 = vpop.eup %6828 }
 0xe85   :  { %v1661_v41 = vmul.f32 %v6829_v39, %v1645_v11  ;;  %v8071_v18 = vadd.f32 %v8067_v37, %v1666_v38 }
 0xe87   :  { %v1667_v54 = vmul.f32 %v8064_v33, %v1661_v41  ;;  %v1674_v46 = vadd.f32 %v8071_v18, %v7789_v6 }
 0xe89   :  { %5891 = vmatprep.mubr.msk.f32.mxu1 %vm318_vm0, %v1674_v46  ;;  %v8078_v47 = vadd.f32 %v8067_v37, %v1667_v54 }
 0xe8b   :  { %v1675_v56 = vadd.f32 %v8078_v47, %v7800_v10  ;;  %v8094_v10 = vld [vmem:[#allocation8 + $0x8] sm:$0xff] }
 0xe8d   :  { %5892 = vmatmul.mubr.msk.f32.vlgmr.msra.gmra.mrb[18].mxu1 %vm318_vm0, %v1675_v56 }
 0xe8e   :  { %6355 = vmatpush3.bf16.msra.mxu1 %v7907_v51 }
 0xe8f   :  { %6357 = vmatprep.subr.bf16.mxu1 %v7911_v58 }
 0xe92   :  { %6359 = vmatpush3.bf16.msra.mxu1 %v7911_v58 }
 0xf60   :  { %v5893_v63 = vpop.f32.mrb[18].mxu1 }
 0xf61   :  { %v1765_v59 = vadd.f32 %v5893_v63, %v5384_v62  ;;  %v1759_v6 = vpop.f32.mrb[19].mxu1 }
 0xf62   :  { %v1760_v1 = vadd.f32 %v5384_v62, %v1759_v6 }
 0xf63   :  { %v8088_v61 = vmul.f32 0.35355338, %v1765_v59 }
 0xf64   :  { %v8086_v2 = vmul.f32 0.35355338, %v1760_v1 }
 0xf66   :  { %5902 = vmatprep.mubr.msk.f32.mxu0 %vm723_vm1, %v8086_v2 }
 0xf67   :  { %5903 = vmatmul.mubr.msk.f32.vlgmr.msra.gmra.mrb[12].mxu0 %vm723_vm1, %v8088_v61 }
0x103a   :  { %v5904_v4 = vpop.f32.mrb[12].mxu0 }
0x103b   :  { %v1865_v8 = vadd.f32 %v5904_v4, %v8094_v10  ;;  %v1859_v13 = vpop.f32.mrb[13].mxu0 }
0x103c   :  { %v1860_v14 = vadd.f32 %v1859_v13, %v8096_v0 }
0x103d   :  { %v1871_v15 = vsel %vm318_vm0, %v1865_v8, -inf }
0x103e   :  { %1872 = vmax.xlane.f32.xlu0 %v1871_v15  ;;  %v1868_v16 = vsel %vm318_vm0, %v1860_v14, -inf }
0x103f   :  { %1869 = vmax.xlane.f32.xlu1 %v1868_v16 }
0x10cb   :  { %v1873_v20 = vpop.xlane.xlu0 %1872 }
0x10cc   :  { %v1875_v21 = vsub.f32 %v1865_v8, %v1873_v20  ;;  %v1870_v22 = vpop.xlane.xlu1 %1869 }
0x10cd   :  { %v1874_v11 = vsub.f32 %v1860_v14, %v1870_v22 }
0x10ce   :  { %v1878_v12 = vmul.f32 1.442695, %v1875_v21 }
0x10cf   :  { %v1876_v23 = vmul.f32 1.442695, %v1874_v11 }
0x10d0   :  { %6830 = vpow2.f32 %v1878_v12 }
0x10d1   :  { %6832 = vpow2.f32 %v1876_v23 }
0x10da   :  { %v6831_v26 = vpop.eup %6830 }
0x10db   :  { %v6833_v27 = vpop.eup %6832  ;;  %v1883_v9 = vsel %vm318_vm0, %v6831_v26, 0.0 }
0x10dc   :  { %1884 = vadd.xlane.f32.xlu0 %v1883_v9  ;;  %v1880_v5 = vsel %vm318_vm0, %v6833_v27, 0.0 }
0x10dd   :  { %1881 = vadd.xlane.f32.xlu1 %v1880_v5 }
0x10ee   :  { %6700 = vrot.lane.b32.xlu1 %v7901_v44, %s7378_s6 }
0x10f2   :  { %6705 = vrot.lane.b32.xlu0 %v7905_v50, %s7378_s6  ;;  %1971 = vrot.lane.b32.xlu1 %v8086_v2, %s7378_s6 }
0x10f6   :  { %1973 = vrot.lane.b32.xlu1 %v8088_v61, %s7378_s6 }
0x1169   :  { %v1885_v60 = vpop.xlane.xlu0 %1884 }
0x116a   :  { %6834 = vrcp.f32 %v1885_v60  ;;  %v1882_v57 = vpop.xlane.xlu1 %1881 }
0x116b   :  { %6836 = vrcp.f32 %v1882_v57 }
0x116d   :  { %v6706_v32 = vpop.permute.xlu0 %6705 }
0x116e   :  { %v6701_v28 = vpop.permute.xlu1 %6700  ;;  %v6708_v36 = vunpack.i.h.bf16 %v6706_v32  ;;  %v6707_v38 = vunpack.i.l.bf16 %v6706_v32 }
0x116f   :  { %v6703_v19 = vunpack.i.h.bf16 %v6701_v28  ;;  %v6702_v29 = vunpack.i.l.bf16 %v6701_v28 }
0x1170   :  { %v8118_v54 = vpack.c.bf16 %v6708_v36, %v6707_v38 }
0x1171   :  { %v8112_v31 = vpack.c.bf16 %v6703_v19, %v6702_v29 }
0x1172   :  { %v1972_v46 = vpop.permute.xlu1 %1971 }
0x1173   :  { %6362 = vmatprep.subr.msk.bf16.mxu1 %vm7864_vm2, %v8112_v31 }
0x1174   :  { %v6835_v25 = vpop.eup %6834 }
0x1175   :  { %v6837_v35 = vpop.eup %6836  ;;  %v1889_v41 = vmul.f32 %v6835_v25, %v6831_v26 }
0x1176   :  { %v1888_v39 = vmul.f32 %v6837_v35, %v6833_v27  ;;  %v1974_v56 = vpop.permute.xlu1 %1973 }
0x1178   :  { %5913 = vmatprep.mubr.msk.f32.mxu1 %vm318_vm0, %v1888_v39 }
0x1179   :  { %5914 = vmatmul.mubr.msk.f32.vlgmr.msra.gmra.mrb[20].mxu1 %vm318_vm0, %v1889_v41 }
0x117a   :  { %6365 = vmatpush3.bf16.xpose.msk.msra.mxu1 %vm7864_vm2, %v8112_v31  ;;  %5924 = vmatprep.mubr.msk.f32.mxu1 %vm723_vm1, %v1972_v46 }
0x117b   :  { %6368 = vmatprep.subr.msk.bf16.mxu1 %vm7864_vm2, %v8118_v54 }
0x1182   :  { %6371 = vmatpush3.bf16.xpose.msk.msra.mxu1 %vm7864_vm2, %v8118_v54 }
0x1189   :  { %5925 = vmatmul.mubr.msk.f32.vlgmr.msra.gmra.mrb[22].mxu1 %vm723_vm1, %v1974_v56 }
0x124c   :  { %v8132_v62 = vpop.f32.mrb[20].mxu1 }
0x124d   :  { %v8134_v63 = vpop.f32.mrb[21].mxu1 }
0x125c   :  { %v5926_v59 = vpop.f32.mrb[22].mxu1 }
0x125d   :  { %v2067_v6 = vadd.f32 %v5926_v59, %v8094_v10  ;;  %v2061_v1 = vpop.f32.mrb[23].mxu1 }
0x125e   :  { %v2062_v4 = vadd.f32 %v2061_v1, %v8096_v0 }
0x125f   :  { %v2073_v8 = vsel %vm318_vm0, %v2067_v6, -inf }
0x1260   :  { %2074 = vmax.xlane.f32.xlu1 %v2073_v8  ;;  %v2070_v13 = vsel %vm318_vm0, %v2062_v4, -inf }
0x1261   :  { %2071 = vmax.xlane.f32.xlu0 %v2070_v13 }
0x1271   :  { %6710 = vrot.lane.b32.xlu1 %v7909_v53, %s7378_s6 }
0x1275   :  { %6720 = vrot.lane.b32.xlu1 %v7901_v44, %s7379_s1 }
0x1279   :  { %6725 = vrot.lane.b32.xlu1 %v7905_v50, %s7379_s1 }
0x127d   :  { %2191 = vrot.lane.b32.xlu1 %v8088_v61, %s7379_s1 }
0x12ed   :  { %v2075_v14 = vpop.xlane.xlu1 %2074 }
0x12ee   :  { %v2077_v15 = vsub.f32 %v2067_v6, %v2075_v14  ;;  %v2072_v16 = vpop.xlane.xlu0 %2071 }
0x12ef   :  { %v2076_v20 = vsub.f32 %v2062_v4, %v2072_v16 }
0x12f0   :  { %v2080_v21 = vmul.f32 1.442695, %v2077_v15 }
0x12f1   :  { %v2078_v22 = vmul.f32 1.442695, %v2076_v20  ;;  %v6711_v11 = vpop.permute.xlu1 %6710 }
0x12f2   :  { %6838 = vpow2.f32 %v2080_v21  ;;  %v6713_v12 = vunpack.i.h.bf16 %v6711_v11  ;;  %v6712_v23 = vunpack.i.l.bf16 %v6711_v11 }
0x12f3   :  { %6840 = vpow2.f32 %v2078_v22 }
0x12f4   :  { %v8148_v26 = vpack.c.bf16 %v6713_v12, %v6712_v23 }
0x12f5   :  { %v6721_v19 = vpop.permute.xlu1 %6720 }
0x12f6   :  { %6373 = vmatprep.subr.bf16.mxu0 %v8148_v26  ;;  %v6723_v32 = vunpack.i.h.bf16 %v6721_v19  ;;  %v6722_v25 = vunpack.i.l.bf16 %v6721_v19 }
0x12f7   :  { %6375 = vmatpush3.bf16.msra.mxu0 %v8148_v26 }
0x12f8   :  { %v8160_v39 = vpack.c.bf16 %v6723_v32, %v6722_v25 }
0x12f9   :  { %v6726_v56 = vpop.permute.xlu1 %6725 }
0x12fa   :  { %v6728_v1 = vunpack.i.h.bf16 %v6726_v56  ;;  %v6727_v4 = vunpack.i.l.bf16 %v6726_v56 }
0x12fc   :  { %v6839_v27 = vpop.eup %6838  ;;  %v8170_v13 = vpack.c.bf16 %v6728_v1, %v6727_v4 }
0x12fd   :  { %v2085_v9 = vsel %vm318_vm0, %v6839_v27, 0.0  ;;  %v6841_v5 = vpop.eup %6840  ;;  %v2192_v14 = vpop.permute.xlu1 %2191 }
0x12fe   :  { %2086 = vadd.xlane.f32.xlu0 %v2085_v9  ;;  %v2082_v60 = vsel %vm318_vm0, %v6841_v5, 0.0 }
0x1302   :  { %2083 = vadd.xlane.f32.xlu0 %v2082_v60 }
0x1318   :  { %6715 = vrot.lane.b32.xlu0 %v7913_v55, %s7378_s6 }
0x131c   :  { %2189 = vrot.lane.b32.xlu0 %v8086_v2, %s7379_s1 }
0x138b   :  { %v2087_v57 = vpop.xlane.xlu0 %2086 }
0x138c   :  { %6842 = vrcp.f32 %v2087_v57 }
0x138f   :  { %v2084_v28 = vpop.xlane.xlu0 %2083 }
0x1390   :  { %6844 = vrcp.f32 %v2084_v28 }
0x1393   :  { %v6716_v29 = vpop.permute.xlu0 %6715 }
0x1394   :  { %v6718_v35 = vunpack.i.h.bf16 %v6716_v29  ;;  %v6717_v36 = vunpack.i.l.bf16 %v6716_v29 }
0x1396   :  { %v8158_v38 = vpack.c.bf16 %v6718_v35, %v6717_v36  ;;  %v6843_v41 = vpop.eup %6842 }
0x1397   :  { %v2091_v6 = vmul.f32 %v6843_v41, %v6839_v27  ;;  %v2190_v8 = vpop.permute.xlu0 %2189 }
0x1398   :  { %6377 = vmatprep.subr.bf16.mxu0 %v8158_v38 }
0x1399   :  { %6379 = vmatpush3.bf16.msra.mxu0 %v8158_v38 }
0x139a   :  { %v6845_v46 = vpop.eup %6844  ;;  %6382 = vmatprep.subr.msk.bf16.mxu0 %vm7864_vm2, %v8160_v39 }
0x139b   :  { %v2090_v59 = vmul.f32 %v6845_v46, %v6841_v5 }
0x139d   :  { %5935 = vmatprep.mubr.msk.f32.mxu0 %vm318_vm0, %v2090_v59 }
0x139e   :  { %5936 = vmatmul.mubr.msk.f32.vlgmr.msra.gmra.mrb[14].mxu0 %vm318_vm0, %v2091_v6 }
0x139f   :  { %5946 = vmatprep.mubr.msk.f32.mxu0 %vm723_vm1, %v2190_v8 }
0x13a2   :  { %6385 = vmatpush3.bf16.xpose.msk.msra.mxu0 %vm7864_vm2, %v8160_v39 }
0x13a3   :  { %6388 = vmatprep.subr.msk.bf16.mxu0 %vm7864_vm2, %v8170_v13 }
0x13aa   :  { %6391 = vmatpush3.bf16.xpose.msk.msra.mxu0 %vm7864_vm2, %v8170_v13 }
0x13b1   :  { %5947 = vmatmul.mubr.msk.f32.vlgmr.msra.gmra.mrb[16].mxu0 %vm723_vm1, %v2192_v14 }
0x1471   :  { %v8182_v15 = vpop.f32.mrb[14].mxu0 }
0x1472   :  { %v8184_v16 = vpop.f32.mrb[15].mxu0 }
0x1484   :  { %v5948_v20 = vpop.f32.mrb[16].mxu0 }
0x1485   :  { %v2285_v21 = vadd.f32 %v5948_v20, %v8094_v10  ;;  %v2279_v22 = vpop.f32.mrb[17].mxu0 }
0x1486   :  { %v2280_v11 = vadd.f32 %v2279_v22, %v8096_v0 }
0x1487   :  { %v2291_v12 = vsel %vm318_vm0, %v2285_v21, -inf }
0x1488   :  { %2292 = vmax.xlane.f32.xlu1 %v2291_v12  ;;  %v2288_v23 = vsel %vm318_vm0, %v2280_v11, -inf }
0x1489   :  { %2289 = vmax.xlane.f32.xlu0 %v2288_v23 }
0x1499   :  { %6730 = vrot.lane.b32.xlu1 %v7909_v53, %s7379_s1 }
0x149d   :  { %6740 = vrot.lane.b32.xlu1 %v7901_v44, %s7382_s22 }
0x14a1   :  { %6745 = vrot.lane.b32.xlu1 %v7905_v50, %s7382_s22 }
0x14a5   :  { %2405 = vrot.lane.b32.xlu1 %v8088_v61, %s7382_s22 }
0x1515   :  { %v2293_v27 = vpop.xlane.xlu1 %2292 }
0x1516   :  { %v2295_v9 = vsub.f32 %v2285_v21, %v2293_v27  ;;  %v2290_v5 = vpop.xlane.xlu0 %2289 }
0x1517   :  { %v2294_v60 = vsub.f32 %v2280_v11, %v2290_v5 }
0x1518   :  { %v2298_v57 = vmul.f32 1.442695, %v2295_v9 }
0x1519   :  { %v2296_v28 = vmul.f32 1.442695, %v2294_v60  ;;  %v6731_v19 = vpop.permute.xlu1 %6730 }
0x151a   :  { %6846 = vpow2.f32 %v2298_v57  ;;  %v6733_v29 = vunpack.i.h.bf16 %v6731_v19  ;;  %v6732_v32 = vunpack.i.l.bf16 %v6731_v19 }
0x151b   :  { %6848 = vpow2.f32 %v2296_v28 }
0x151c   :  { %v8198_v25 = vpack.c.bf16 %v6733_v29, %v6732_v32 }
0x151d   :  { %v6741_v46 = vpop.permute.xlu1 %6740 }
0x151e   :  { %6393 = vmatprep.subr.bf16.mxu1 %v8198_v25  ;;  %v6743_v59 = vunpack.i.h.bf16 %v6741_v46  ;;  %v6742_v6 = vunpack.i.l.bf16 %v6741_v46 }
0x151f   :  { %6395 = vmatpush3.bf16.msra.mxu1 %v8198_v25 }
0x1520   :  { %v8210_v14 = vpack.c.bf16 %v6743_v59, %v6742_v6 }
0x1521   :  { %v6746_v21 = vpop.permute.xlu1 %6745 }
0x1522   :  { %v6748_v12 = vunpack.i.h.bf16 %v6746_v21  ;;  %v6747_v23 = vunpack.i.l.bf16 %v6746_v21 }
0x1524   :  { %v6847_v44 = vpop.eup %6846  ;;  %v8220_v9 = vpack.c.bf16 %v6748_v12, %v6747_v23 }
0x1525   :  { %v2303_v50 = vsel %vm318_vm0, %v6847_v44, 0.0  ;;  %v6849_v61 = vpop.eup %6848  ;;  %v2406_v5 = vpop.permute.xlu1 %2405 }
0x1526   :  { %2304 = vadd.xlane.f32.xlu0 %v2303_v50  ;;  %v2300_v35 = vsel %vm318_vm0, %v6849_v61, 0.0 }
0x152a   :  { %2301 = vadd.xlane.f32.xlu0 %v2300_v35 }
0x1540   :  { %6735 = vrot.lane.b32.xlu0 %v7913_v55, %s7379_s1 }
0x1544   :  { %2403 = vrot.lane.b32.xlu0 %v8086_v2, %s7382_s22 }
0x15b3   :  { %v2305_v36 = vpop.xlane.xlu0 %2304 }
0x15b4   :  { %6850 = vrcp.f32 %v2305_v36 }
0x15b7   :  { %v2302_v41 = vpop.xlane.xlu0 %2301 }
0x15b8   :  { %6852 = vrcp.f32 %v2302_v41 }
0x15bb   :  { %v6736_v56 = vpop.permute.xlu0 %6735 }
0x15bc   :  { %v6738_v1 = vunpack.i.h.bf16 %v6736_v56  ;;  %v6737_v4 = vunpack.i.l.bf16 %v6736_v56 }
0x15be   :  { %v8208_v8 = vpack.c.bf16 %v6738_v1, %v6737_v4  ;;  %v6851_v20 = vpop.eup %6850 }
0x15bf   :  { %v2309_v11 = vmul.f32 %v6851_v20, %v6847_v44  ;;  %v2404_v27 = vpop.permute.xlu0 %2403 }
0x15c0   :  { %6397 = vmatprep.subr.bf16.mxu1 %v8208_v8 }
0x15c1   :  { %6399 = vmatpush3.bf16.msra.mxu1 %v8208_v8 }
0x15c2   :  { %v6853_v2 = vpop.eup %6852  ;;  %6402 = vmatprep.subr.msk.bf16.mxu1 %vm7864_vm2, %v8210_v14 }
0x15c3   :  { %v2308_v22 = vmul.f32 %v6853_v2, %v6849_v61 }
0x15c5   :  { %5957 = vmatprep.mubr.msk.f32.mxu1 %vm318_vm0, %v2308_v22 }
0x15c6   :  { %5958 = vmatmul.mubr.msk.f32.vlgmr.msra.gmra.mrb[24].mxu1 %vm318_vm0, %v2309_v11 }
0x15c7   :  { %5968 = vmatprep.mubr.msk.f32.mxu1 %vm723_vm1, %v2404_v27 }
0x15ca   :  { %6405 = vmatpush3.bf16.xpose.msk.msra.mxu1 %vm7864_vm2, %v8210_v14 }
0x15cb   :  { %6408 = vmatprep.subr.msk.bf16.mxu1 %vm7864_vm2, %v8220_v9 }
0x15d2   :  { %6411 = vmatpush3.bf16.xpose.msk.msra.mxu1 %vm7864_vm2, %v8220_v9 }
0x15d9   :  { %5969 = vmatmul.mubr.msk.f32.vlgmr.msra.gmra.mrb[26].mxu1 %vm723_vm1, %v2406_v5 }
0x1699   :  { %v5959_v60 = vpop.f32.mrb[24].mxu1 }
0x169a   :  { %v2394_v57 = vpop.f32.mrb[25].mxu1 }
0x16ac   :  { %v5970_v28 = vpop.f32.mrb[26].mxu1 }
0x16ad   :  { %v2499_v19 = vadd.f32 %v5970_v28, %v8094_v10  ;;  %v2493_v29 = vpop.f32.mrb[27].mxu1 }
0x16ae   :  { %v2494_v32 = vadd.f32 %v2493_v29, %v8096_v0 }
0x16af   :  { %v2505_v44 = vsel %vm318_vm0, %v2499_v19, -inf }
0x16b0   :  { %2506 = vmax.xlane.f32.xlu1 %v2505_v44  ;;  %v2502_v50 = vsel %vm318_vm0, %v2494_v32, -inf }
0x16b1   :  { %2503 = vmax.xlane.f32.xlu0 %v2502_v50 }
0x16c1   :  { %6750 = vrot.lane.b32.xlu1 %v7909_v53, %s7382_s22 }
0x16c5   :  { %2619 = vrot.lane.b32.xlu1 %v8184_v16, %s7361_s0 }
0x16c9   :  { %2621 = vrot.lane.b32.xlu1 %v8182_v15, %s7361_s0 }
0x16cd   :  { %2629 = vrot.lane.b32.xlu1 %v5959_v60, %s7383_s8  ;;  %v1769_v60 = vld [vmem:[#allocation25 + $0x8] sm:$0xff] }
0x173d   :  { %v2507_v10 = vpop.xlane.xlu1 %2506 }
0x173e   :  { %v2509_v61 = vsub.f32 %v2499_v19, %v2507_v10  ;;  %v2504_v0 = vpop.xlane.xlu0 %2503  ;;  %v1771_v19 = vld [vmem:[#allocation25 + $0x18] sm:$0xff] }
0x173f   :  { %v2508_v35 = vsub.f32 %v2494_v32, %v2504_v0 }
0x1740   :  { %v2512_v36 = vmul.f32 1.442695, %v2509_v61 }
0x1741   :  { %v2510_v41 = vmul.f32 1.442695, %v2508_v35  ;;  %v6751_v46 = vpop.permute.xlu1 %6750 }
0x1742   :  { %6854 = vpow2.f32 %v2512_v36  ;;  %v6753_v56 = vunpack.i.h.bf16 %v6751_v46  ;;  %v6752_v59 = vunpack.i.l.bf16 %v6751_v46 }
0x1743   :  { %6856 = vpow2.f32 %v2510_v41 }
0x1744   :  { %v8243_v53 = vpack.c.bf16 %v6753_v56, %v6752_v59 }
0x1745   :  { %v2620_v50 = vpop.permute.xlu1 %2619 }
0x1746   :  { %6413 = vmatprep.subr.bf16.mxu0 %v8243_v53  ;;  %v2641_v35 = vsel %vm723_vm1, %v8134_v63, %v2620_v50  ;;  %v5419_v63 = vld [vmem:[%s8793_s19] ss:$0 sm:$0xff] }
0x1747   :  { %6415 = vmatpush3.bf16.msra.mxu0 %v8243_v53 }
0x1749   :  { %v2622_v10 = vpop.permute.xlu1 %2621 }
0x174a   :  { %v2642_v41 = vsel %vm723_vm1, %v8132_v62, %v2622_v10  ;;  %v2776_v10 = vld [vmem:[#allocation26 + $0x10] sm:$0xff] }
0x174c   :  { %v6855_v15 = vpop.eup %6854 }
0x174d   :  { %v2517_v16 = vsel %vm318_vm0, %v6855_v15, 0.0  ;;  %v6857_v6 = vpop.eup %6856  ;;  %v2630_v61 = vpop.permute.xlu1 %2629 }
0x174e   :  { %2518 = vadd.xlane.f32.xlu0 %v2517_v16  ;;  %v2514_v1 = vsel %vm318_vm0, %v6857_v6, 0.0  ;;  %v2644_v59 = vsel %vm809_vm3, %v2642_v41, %v2630_v61  ;;  %v2777_v61 = vld [vmem:[#allocation26 + $0x18] sm:$0xff]  ;;  %v2870_v41 = vld [vmem:[%s8797_s23 + $0x10] sm:$0xff] }
0x1752   :  { %2515 = vadd.xlane.f32.xlu0 %v2514_v1 }
0x1768   :  { %6755 = vrot.lane.b32.xlu0 %v7913_v55, %s7382_s22  ;;  %v1768_v55 = vld [vmem:[#allocation25] sm:$0xff] }
0x1769   :  { %v8258_v28 = vpack.c.bf16 %v1769_v60, %v1768_v55 }
0x176c   :  { %2627 = vrot.lane.b32.xlu0 %v2394_v57, %s7383_s8  ;;  %v1770_v57 = vld [vmem:[#allocation25 + $0x10] sm:$0xff] }
0x176d   :  { %v8260_v29 = vpack.c.bf16 %v1771_v19, %v1770_v57 }
0x17db   :  { %v2519_v4 = vpop.xlane.xlu0 %2518 }
0x17dc   :  { %6858 = vrcp.f32 %v2519_v4 }
0x17df   :  { %v2516_v20 = vpop.xlane.xlu0 %2515 }
0x17e0   :  { %6860 = vrcp.f32 %v2516_v20 }
0x17e3   :  { %v6756_v2 = vpop.permute.xlu0 %6755 }
0x17e4   :  { %v6758_v21 = vunpack.i.h.bf16 %v6756_v2  ;;  %v6757_v22 = vunpack.i.l.bf16 %v6756_v2 }
0x17e6   :  { %v8252_v11 = vpack.c.bf16 %v6758_v21, %v6757_v22  ;;  %v6859_v12 = vpop.eup %6858 }
0x17e7   :  { %v2523_v5 = vmul.f32 %v6859_v12, %v6855_v15  ;;  %v2628_v0 = vpop.permute.xlu0 %2627 }
0x17e8   :  { %6417 = vmatprep.subr.bf16.mxu0 %v8252_v11  ;;  %v2643_v46 = vsel %vm809_vm3, %v2641_v35, %v2628_v0  ;;  %v8291_v0 = vpack.c.bf16 %v2777_v61, %v2776_v10  ;;  %v2868_v35 = vld [vmem:[%s8797_s23] sm:$0xff] }
0x17e9   :  { %6419 = vmatpush3.bf16.msra.mxu0 %v8252_v11 }
0x17ea   :  { %v6861_v23 = vpop.eup %6860  ;;  %6421 = vmatprep.subr.bf16.mxu0 %v8258_v28 }
0x17eb   :  { %v2522_v27 = vmul.f32 %v6861_v23, %v6857_v6 }
0x17ed   :  { %5979 = vmatprep.mubr.msk.f32.mxu0 %vm318_vm0, %v2522_v27 }
0x17ee   :  { %5980 = vmatmul.mubr.msk.f32.vlgmr.msra.gmra.mrb[18].mxu0 %vm318_vm0, %v2523_v5 }
0x17ef   :  { %6423 = vmatpush3.bf16.msra.mxu0 %v8258_v28 }
0x17f0   :  { %6425 = vmatprep.subr.bf16.mxu0 %v8260_v29 }
0x17f3   :  { %6427 = vmatpush3.bf16.msra.mxu0 %v8260_v29 }
0x18c1   :  { %v5981_v32 = vpop.f32.mrb[18].mxu0 }
0x18c2   :  { %2637 = vrot.lane.b32.xlu1 %v5981_v32, %s7384_s10  ;;  %v2608_v44 = vpop.f32.mrb[19].mxu0 }
0x18c3   :  { %2635 = vrot.lane.b32.xlu0 %v2608_v44, %s7384_s10  ;;  %v2775_v44 = vld [vmem:[#allocation26 + $0x8] sm:$0xff] }
0x1934   :  { %v2638_v36 = vpop.permute.xlu1 %2637 }
0x1935   :  { %v2636_v56 = vpop.permute.xlu0 %2635  ;;  %v2646_v16 = vsel %vm1543_vm4, %v2644_v59, %v2638_v36  ;;  %v2869_v36 = vld [vmem:[%s8797_s23 + $0x8] sm:$0xff] }
0x1936   :  { %v2645_v15 = vsel %vm1543_vm4, %v2643_v46, %v2636_v56  ;;  %v8305_v46 = vpack.c.bf16 %v2869_v36, %v2868_v35  ;;  %v2871_v56 = vld [vmem:[%s8797_s23 + $0x18] sm:$0xff] }
0x1937   :  { %5990 = vmatprep.mubr.msk.f32.mxu0 %vm318_vm0, %v2645_v15  ;;  %v8310_v59 = vpack.c.bf16 %v2871_v56, %v2870_v41  ;;  %v2872_v15 = vld [vmem:[%s8797_s23 + $0x20] sm:$0xff] }
0x1938   :  { %5991 = vmatmul.mubr.msk.f32.vlgmr.msra.gmra.mrb[20].mxu0 %vm318_vm0, %v2646_v16  ;;  %v2873_v16 = vld [vmem:[%s8797_s23 + $0x28] sm:$0xff]  ;;  %6437 = vmatprep.subr.bf16.mxu0 %v8305_v46 }
0x1939   :  { %6439 = vmatpush3.bf16.msra.mxu0 %v8305_v46 }
0x193a   :  { %6441 = vmatprep.subr.bf16.mxu0 %v8310_v59 }
0x193d   :  { %6443 = vmatpush3.bf16.msra.mxu0 %v8310_v59 }
0x1a0b   :  { %v5992_v6 = vpop.f32.mrb[20].mxu0 }
0x1a0c   :  { %v2731_v1 = vadd.f32 %v5992_v6, %v5419_v63  ;;  %v2725_v62 = vpop.f32.mrb[21].mxu0 }
0x1a0d   :  { %v2726_v4 = vadd.f32 %v5419_v63, %v2725_v62  ;;  %v8321_v63 = vpack.c.bf16 %v2873_v16, %v2872_v15  ;;  %v5425_v15 = vld [vmem:[%s8839_s21] ss:$0 sm:$0xff] }
0x1a0e   :  { %v2735_v20 = vadd.f32 %v2731_v1, %v8078_v47 }
0x1a0f   :  { %v2734_v2 = vadd.f32 %v2726_v4, %v8071_v18  ;;  %v2774_v18 = vld [vmem:[#allocation26] sm:$0xff]  ;;  %6445 = vmatprep.subr.bf16.mxu0 %v8321_v63 }
0x1a10   :  { %v2739_v21 = vsel %vm318_vm0, %v2735_v20, 0.0  ;;  %v8287_v50 = vpack.c.bf16 %v2775_v44, %v2774_v18  ;;  %6447 = vmatpush3.bf16.msra.mxu0 %v8321_v63 }
0x1a11   :  { %2740 = vadd.xlane.f32.xlu1 %v2739_v21  ;;  %v2736_v22 = vsel %vm318_vm0, %v2734_v2, 0.0  ;;  %v2764_v21 = vsub.s32 2, %v8054_v17 }
0x1a12   :  { %2737 = vadd.xlane.f32.xlu0 %v2736_v22  ;;  %6429 = vmatprep.subr.bf16.mxu1 %v8287_v50  ;;  %v2770_v22 = vsub.s32 3, %v8054_v17 }
0x1a13   :  { %6431 = vmatpush3.bf16.msra.mxu1 %v8287_v50 }
0x1a14   :  { %6433 = vmatprep.subr.bf16.mxu1 %v8291_v0 }
0x1a17   :  { %6435 = vmatpush3.bf16.msra.mxu1 %v8291_v0 }
0x1a18   :  { %6453 = vmatprep.subr.bf16.mxu1 %v7782_v3 }
0x1a9e   :  { %v2741_v12 = vpop.xlane.xlu1 %2740 }
0x1a9f   :  { %v2743_v23 = vmul.f32 0.03125, %v2741_v12  ;;  %v2738_v27 = vpop.xlane.xlu0 %2737  ;;  %v8329_v12 = vrot.slane %v8060_v24, %v2764_v21 }
0x1aa0   :  { %v2742_v5 = vmul.f32 0.03125, %v2738_v27 }
0x1aa1   :  { %v2745_v55 = vsub.f32 %v2735_v20, %v2743_v23 }
0x1aa2   :  { %v2744_v60 = vsub.f32 %v2734_v2, %v2742_v5  ;;  %v8332_v5 = vrot.slane %v8060_v24, %v2770_v22 }
0x1aa3   :  { %v2747_v32 = vmul.f32 %v2745_v55, %v2745_v55 }
0x1aa4   :  { %v2746_v57 = vmul.f32 %v2744_v60, %v2744_v60 }
0x1aa5   :  { %v2751_v47 = vsel %vm318_vm0, %v2747_v32, 0.0 }
0x1aa6   :  { %v2748_v19 = vsel %vm318_vm0, %v2746_v57, 0.0 }
0x1aa7   :  { %2749 = vadd.xlane.f32.xlu0 %v2748_v19 }
0x1aab   :  { %2752 = vadd.xlane.f32.xlu0 %v2751_v47 }
0x1b34   :  { %v2750_v6 = vpop.xlane.xlu0 %2749 }
0x1b35   :  { %v2754_v1 = vmul.f32 0.03125, %v2750_v6 }
0x1b37   :  { %v2756_v62 = vadd.f32 1e-05, %v2754_v1 }
0x1b38   :  { %v2753_v4 = vpop.xlane.xlu0 %2752 }
0x1b39   :  { %6862 = vrsqrt.f32 %v2756_v62  ;;  %v2755_v20 = vmul.f32 0.03125, %v2753_v4 }
0x1b3b   :  { %v2757_v2 = vadd.f32 1e-05, %v2755_v20 }
0x1b3d   :  { %6864 = vrsqrt.f32 %v2757_v2 }
0x1b43   :  { %v6863_v23 = vpop.eup %6862 }
0x1b44   :  { %v2760_v27 = vmul.f32 %v6863_v23, %v2744_v60  ;;  %v2875_v60 = vld [vmem:[%s8797_s23 + $0x38] sm:$0xff] }
0x1b46   :  { %v2766_v57 = vmul.f32 %v8329_v12, %v2760_v27 }
0x1b47   :  { %v6865_v19 = vpop.eup %6864 }
0x1b48   :  { %v2761_v32 = vmul.f32 %v6865_v19, %v2745_v55  ;;  %v2772_v47 = vadd.f32 %v8332_v5, %v2766_v57  ;;  %v2874_v55 = vld [vmem:[%s8797_s23 + $0x30] sm:$0xff] }
0x1b49   :  { %v8350_v10 = vpack.c.bf16 %v2875_v60, %v2874_v55 }
0x1b4a   :  { %6001 = vmatprep.mubr.msk.f32.mxu1 %vm318_vm0, %v2772_v47  ;;  %v2767_v18 = vmul.f32 %v8329_v12, %v2761_v32 }
0x1b4b   :  { %6449 = vmatprep.subr.bf16.mxu0 %v8350_v10 }
0x1b4c   :  { %v2773_v44 = vadd.f32 %v8332_v5, %v2767_v18  ;;  %6451 = vmatpush3.bf16.msra.mxu0 %v8350_v10 }
0x1b4e   :  { %6002 = vmatmul.mubr.msk.f32.vlgmr.msra.gmra.mrb[28].mxu1 %vm318_vm0, %v2773_v44 }
0x1b4f   :  { %6455 = vmatpush3.bf16.msra.mxu1 %v7782_v3  ;;  %v5422_v3 = vld [vmem:[%s8838_s28] ss:$0 sm:$0xff] }
0x1b50   :  { %6457 = vmatprep.subr.bf16.mxu1 %v7791_v7 }
0x1b53   :  { %6459 = vmatpush3.bf16.msra.mxu1 %v7791_v7 }
0x1b54   :  { %6461 = vmatprep.subr.bf16.mxu1 %v7845_v45 }
0x1c21   :  { %v6003_v7 = vpop.f32.mrb[28].mxu1 }
0x1c22   :  { %v2863_v61 = vadd.f32 %v6003_v7, %v5422_v3  ;;  %v2857_v35 = vpop.f32.mrb[29].mxu1 }
0x1c23   :  { %v2858_v36 = vadd.f32 %v5422_v3, %v2857_v35 }
0x1c24   :  { %v2867_v56 = vmax.f32 %v2863_v61, 0.0 }
0x1c25   :  { %v2866_v41 = vmax.f32 %v2858_v36, 0.0 }
0x1c27   :  { %6020 = vmatprep.mubr.msk.f32.mxu0 %vm2883_vm5, %v2866_v41  ;;  %v2995_v41 = vsub.s32 4, %v8054_v17 }
0x1c28   :  { %6021 = vmatmul.mubr.msk.f32.vlgmr.msra.gmra.mrb[22].mxu0 %vm2883_vm5, %v2867_v56  ;;  %v3001_v56 = vsub.s32 5, %v8054_v17 }
0x1cfb   :  { %v6022_v16 = vpop.f32.mrb[22].mxu0 }
0x1cfc   :  { %v2962_v6 = vadd.f32 %v6022_v16, %v5425_v15  ;;  %v2956_v1 = vpop.f32.mrb[23].mxu0 }
0x1cfd   :  { %v2957_v62 = vadd.f32 %v5425_v15, %v2956_v1  ;;  %v8369_v15 = vrot.slane %v8060_v24, %v2995_v41 }
0x1cfe   :  { %v2966_v4 = vadd.f32 %v2962_v6, %v2773_v44 }
0x1cff   :  { %v2965_v20 = vadd.f32 %v2957_v62, %v2772_v47  ;;  %v8372_v62 = vrot.slane %v8060_v24, %v3001_v56 }
0x1d00   :  { %v2970_v2 = vsel %vm318_vm0, %v2966_v4, 0.0 }
0x1d01   :  { %2971 = vadd.xlane.f32.xlu0 %v2970_v2  ;;  %v2967_v21 = vsel %vm318_vm0, %v2965_v20, 0.0 }
0x1d02   :  { %2968 = vadd.xlane.f32.xlu1 %v2967_v21 }
0x1d8e   :  { %v2972_v22 = vpop.xlane.xlu0 %2971 }
0x1d8f   :  { %v2974_v23 = vmul.f32 0.03125, %v2972_v22  ;;  %v2969_v27 = vpop.xlane.xlu1 %2968 }
0x1d90   :  { %v2973_v57 = vmul.f32 0.03125, %v2969_v27 }
0x1d91   :  { %v2976_v19 = vsub.f32 %v2966_v4, %v2974_v23  ;;  %v8382_v23 = vld [vmem:[#allocation5] sm:$0xff] }
0x1d92   :  { %v2975_v32 = vsub.f32 %v2965_v20, %v2973_v57  ;;  %v8386_v57 = vld [vmem:[#allocation5 + $0x8] sm:$0xff] }
0x1d93   :  { %v2978_v18 = vmul.f32 %v2976_v19, %v2976_v19 }
0x1d94   :  { %v2977_v55 = vmul.f32 %v2975_v32, %v2975_v32 }
0x1d95   :  { %v2982_v60 = vsel %vm318_vm0, %v2978_v18, 0.0 }
0x1d96   :  { %2983 = vadd.xlane.f32.xlu0 %v2982_v60  ;;  %v2979_v44 = vsel %vm318_vm0, %v2977_v55, 0.0 }
0x1d97   :  { %2980 = vadd.xlane.f32.xlu1 %v2979_v44 }
0x1e23   :  { %v2984_v47 = vpop.xlane.xlu0 %2983 }
0x1e24   :  { %v2986_v3 = vmul.f32 0.03125, %v2984_v47  ;;  %v2981_v7 = vpop.xlane.xlu1 %2980 }
0x1e25   :  { %v2985_v61 = vmul.f32 0.03125, %v2981_v7 }
0x1e26   :  { %v2988_v35 = vadd.f32 1e-05, %v2986_v3 }
0x1e27   :  { %v2987_v36 = vadd.f32 1e-05, %v2985_v61 }
0x1e28   :  { %6866 = vrsqrt.f32 %v2988_v35 }
0x1e29   :  { %6868 = vrsqrt.f32 %v2987_v36 }
0x1e32   :  { %v6867_v16 = vpop.eup %6866 }
0x1e33   :  { %v6869_v6 = vpop.eup %6868  ;;  %v2992_v1 = vmul.f32 %v6867_v16, %v2976_v19 }
0x1e34   :  { %v2991_v4 = vmul.f32 %v6869_v6, %v2975_v32  ;;  %v6952_v32 = vld [vmem:[#allocation10] ss:$0 sm:$0xff] }
0x1e35   :  { %v2998_v20 = vmul.f32 %v8369_v15, %v2992_v1 }
0x1e36   :  { %v2997_v2 = vmul.f32 %v8369_v15, %v2991_v4 }
0x1e37   :  { %v8377_v21 = vadd.f32 %v8372_v62, %v2998_v20 }
0x1e38   :  { %v8380_v22 = vadd.f32 %v8372_v62, %v2997_v2 }
0x1e39   :  { %v3006_v24 = vadd.f32 %v8386_v57, %v8377_v21 }
0x1e3a   :  { %v3005_v27 = vadd.f32 %v8382_v23, %v8380_v22 }
0x1e3c   :  { %6031 = vmatprep.mubr.msk.f32.mxu1 %vm318_vm0, %v3005_v27 }
0x1e3d   :  { %6032 = vmatmul.mubr.msk.f32.vlgmr.msra.gmra.mrb[30].mxu1 %vm318_vm0, %v3006_v24 }
0x1e3e   :  { %6463 = vmatpush3.bf16.msra.mxu1 %v7845_v45  ;;  %6042 = vmatprep.mubr.msk.f32.mxu1 %vm318_vm0, %v8380_v22 }
0x1e3f   :  { %6465 = vmatprep.subr.bf16.mxu1 %v7850_v48 }
0x1e42   :  { %6467 = vmatpush3.bf16.msra.mxu1 %v7850_v48  ;;  %v6953_v48 = vld [vmem:[#allocation13] ss:$0 sm:$0xff] }
0x1e45   :  { %6043 = vmatmul.mubr.msk.f32.vlgmr.msra.gmra.mrb[32].mxu1 %vm318_vm0, %v8377_v21 }
0x1f10   :  { %v6033_v19 = vpop.f32.mrb[30].mxu1 }
0x1f11   :  { %v3085_v18 = vadd.f32 %v6952_v32, %v6033_v19  ;;  %v3079_v55 = vpop.f32.mrb[31].mxu1 }
0x1f12   :  { %v3080_v60 = vadd.f32 %v6952_v32, %v3079_v55  ;;  %v8423_v32 = vld [vmem:[#allocation7] sm:$0xff]  ;;  %v8426_v55 = vld [vmem:[#allocation7 + $0x8] sm:$0xff] }
0x1f13   :  { %v8409_v35 = vmul.f32 0.35355338, %v3085_v18 }
0x1f14   :  { %v8399_v44 = vpack.i.bf16 %v3085_v18, %v3080_v60  ;;  %v8401_v47 = vmul.f32 0.35355338, %v3080_v60 }
0x1f16   :  { %6760 = vrot.lane.b32.xlu1 %v8399_v44, %s7376_s12  ;;  %6049 = vmatprep.mubr.msk.f32.mxu0 %vm723_vm1, %v8401_v47 }
0x1f18   :  { %v6044_v45 = vpop.f32.mrb[32].mxu1 }
0x1f19   :  { %v3166_v3 = vadd.f32 %v6953_v48, %v6044_v45  ;;  %v3160_v7 = vpop.f32.mrb[33].mxu1 }
0x1f1a   :  { %v3161_v61 = vadd.f32 %v6953_v48, %v3160_v7  ;;  %6765 = vrot.lane.b32.xlu1 %v8399_v44, %s7377_s26 }
0x1f1c   :  { %v6474_v36 = vpack.c.bf16 %v3166_v3, %v3161_v61  ;;  %v8411_v41 = vpack.i.bf16 %v3166_v3, %v3161_v61 }
0x1f1e   :  { %6475 = vmatprep.subr.bf16.mxu1 %v6474_v36  ;;  %3367 = vrot.lane.b32.xlu1 %v8409_v35, %s7378_s6 }
0x1f1f   :  { %6477 = vmatpush3.bf16.msra.mxu1 %v6474_v36 }
0x1f88   :  { %v6761_v56 = vpop.permute.xlu1 %6760 }
0x1f89   :  { %v6763_v16 = vunpack.i.h.bf16 %v6761_v56  ;;  %v6762_v6 = vunpack.i.l.bf16 %v6761_v56 }
0x1f8b   :  { %v6468_v1 = vpack.c.bf16 %v6763_v16, %v6762_v6 }
0x1f8c   :  { %v6766_v4 = vpop.permute.xlu1 %6765 }
0x1f8d   :  { %v6768_v20 = vunpack.i.h.bf16 %v6766_v4  ;;  %v6767_v2 = vunpack.i.l.bf16 %v6766_v4  ;;  %6470 = vmatprep.subr.msk.bf16.mxu0 %vm7864_vm2, %v6468_v1 }
0x1f8e   :  { %6473 = vmatpush3.bf16.xpose.msk.msra.mxu0 %vm7864_vm2, %v6468_v1 }
0x1f8f   :  { %v6478_v27 = vpack.c.bf16 %v6768_v20, %v6767_v2 }
0x1f91   :  { %6480 = vmatprep.subr.msk.bf16.mxu1 %vm7864_vm2, %v6478_v27 }
0x1f95   :  { %6050 = vmatmul.mubr.msk.f32.vlgmr.msra.gmra.mrb[24].mxu0 %vm723_vm1, %v8409_v35 }
0x2068   :  { %v6051_v24 = vpop.f32.mrb[24].mxu0 }
0x2069   :  { %v3253_v19 = vpop.f32.mrb[25].mxu0  ;;  %v3259_v60 = vadd.f32 %v8426_v55, %v6051_v24 }
0x206a   :  { %v3254_v18 = vadd.f32 %v8423_v32, %v3253_v19 }
0x206b   :  { %v3265_v48 = vsel %vm809_vm3, %v3259_v60, -inf }
0x206c   :  { %v3262_v45 = vsel %vm809_vm3, %v3254_v18, -inf }
0x206d   :  { %3263 = vmax.xlane.f32.xlu0 %v3262_v45 }
0x2071   :  { %3266 = vmax.xlane.f32.xlu0 %v3265_v48 }
0x20fa   :  { %v3264_v3 = vpop.xlane.xlu0 %3263 }
0x20fb   :  { %v3268_v7 = vsub.f32 %v3254_v18, %v3264_v3  ;;  %v3368_v3 = vpop.permute.xlu1 %3367 }
0x20fd   :  { %v3270_v61 = vmul.f32 1.442695, %v3268_v7 }
0x20fe   :  { %v3267_v36 = vpop.xlane.xlu0 %3266 }
0x20ff   :  { %6870 = vpow2.f32 %v3270_v61  ;;  %v3269_v56 = vsub.f32 %v3259_v60, %v3267_v36 }
0x2101   :  { %v3272_v16 = vmul.f32 1.442695, %v3269_v56 }
0x2103   :  { %6872 = vpow2.f32 %v3272_v16 }
0x2109   :  { %v6871_v6 = vpop.eup %6870 }
0x210a   :  { %v3274_v1 = vsel %vm809_vm3, %v6871_v6, 0.0 }
0x210b   :  { %3275 = vadd.xlane.f32.xlu0 %v3274_v1 }
0x210d   :  { %v6873_v4 = vpop.eup %6872 }
0x210e   :  { %v3277_v20 = vsel %vm809_vm3, %v6873_v4, 0.0 }
0x210f   :  { %3278 = vadd.xlane.f32.xlu0 %v3277_v20 }
0x2125   :  { %3365 = vrot.lane.b32.xlu0 %v8401_v47, %s7378_s6 }
0x2198   :  { %v3276_v2 = vpop.xlane.xlu0 %3275 }
0x2199   :  { %6874 = vrcp.f32 %v3276_v2 }
0x219c   :  { %v3279_v24 = vpop.xlane.xlu0 %3278 }
0x219d   :  { %6876 = vrcp.f32 %v3279_v24 }
0x21a0   :  { %v3366_v48 = vpop.permute.xlu0 %3365 }
0x21a3   :  { %v6875_v19 = vpop.eup %6874 }
0x21a4   :  { %v3282_v18 = vmul.f32 %v6875_v19, %v6871_v6 }
0x21a6   :  { %6056 = vmatprep.mubr.msk.f32.mxu1 %vm809_vm3, %v3282_v18 }
0x21a7   :  { %v6877_v60 = vpop.eup %6876 }
0x21a8   :  { %v3283_v45 = vmul.f32 %v6877_v60, %v6873_v4 }
0x21aa   :  { %6057 = vmatmul.mubr.msk.f32.vlgmr.msra.gmra.mrb[34].mxu1 %vm809_vm3, %v3283_v45 }
0x21ab   :  { %6483 = vmatpush3.bf16.xpose.msk.msra.mxu1 %vm7864_vm2, %v6478_v27  ;;  %6063 = vmatprep.mubr.msk.f32.mxu1 %vm723_vm1, %v3366_v48 }
0x21b2   :  { %6064 = vmatmul.mubr.msk.f32.vlgmr.msra.gmra.mrb[36].mxu1 %vm723_vm1, %v3368_v3 }
0x227d   :  { %v8441_v7 = vpop.f32.mrb[34].mxu1 }
0x227e   :  { %v8443_v61 = vpop.f32.mrb[35].mxu1 }
0x2285   :  { %v6065_v36 = vpop.f32.mrb[36].mxu1 }
0x2286   :  { %v3453_v56 = vadd.f32 %v8426_v55, %v6065_v36  ;;  %v3447_v16 = vpop.f32.mrb[37].mxu1 }
0x2287   :  { %v3448_v6 = vadd.f32 %v8423_v32, %v3447_v16 }
0x2288   :  { %v3459_v1 = vsel %vm809_vm3, %v3453_v56, -inf }
0x2289   :  { %3460 = vmax.xlane.f32.xlu0 %v3459_v1  ;;  %v3456_v27 = vsel %vm809_vm3, %v3448_v6, -inf }
0x228a   :  { %3457 = vmax.xlane.f32.xlu1 %v3456_v27 }
0x229b   :  { %6770 = vrot.lane.b32.xlu1 %v8411_v41, %s7378_s6 }
0x229f   :  { %6775 = vrot.lane.b32.xlu0 %v8399_v44, %s7380_s15  ;;  %3567 = vrot.lane.b32.xlu1 %v8401_v47, %s7379_s1 }
0x2316   :  { %v3461_v4 = vpop.xlane.xlu0 %3460 }
0x2317   :  { %v3463_v20 = vsub.f32 %v3453_v56, %v3461_v4  ;;  %v3458_v2 = vpop.xlane.xlu1 %3457 }
0x2318   :  { %v3462_v24 = vsub.f32 %v3448_v6, %v3458_v2 }
0x2319   :  { %v3466_v19 = vmul.f32 1.442695, %v3463_v20 }
0x231a   :  { %v3464_v18 = vmul.f32 1.442695, %v3462_v24  ;;  %v6776_v60 = vpop.permute.xlu0 %6775 }
0x231b   :  { %6878 = vpow2.f32 %v3466_v19  ;;  %v6771_v45 = vpop.permute.xlu1 %6770  ;;  %v6778_v48 = vunpack.i.h.bf16 %v6776_v60  ;;  %v6777_v3 = vunpack.i.l.bf16 %v6776_v60 }
0x231c   :  { %v6773_v36 = vunpack.i.h.bf16 %v6771_v45  ;;  %v6772_v16 = vunpack.i.l.bf16 %v6771_v45  ;;  %6880 = vpow2.f32 %v3464_v18 }
0x231d   :  { %v6488_v27 = vpack.c.bf16 %v6778_v48, %v6777_v3 }
0x231e   :  { %v6484_v1 = vpack.c.bf16 %v6773_v36, %v6772_v16 }
0x231f   :  { %v3568_v2 = vpop.permute.xlu1 %3567 }
0x2320   :  { %6485 = vmatprep.subr.bf16.mxu0 %v6484_v1 }
0x2321   :  { %6487 = vmatpush3.bf16.msra.mxu0 %v6484_v1 }
0x2322   :  { %6490 = vmatprep.subr.msk.bf16.mxu0 %vm7864_vm2, %v6488_v27 }
0x2325   :  { %v6879_v56 = vpop.eup %6878 }
0x2326   :  { %v3471_v6 = vsel %vm809_vm3, %v6879_v56, 0.0  ;;  %v6881_v4 = vpop.eup %6880 }
0x2327   :  { %3472 = vadd.xlane.f32.xlu1 %v3471_v6  ;;  %v3468_v20 = vsel %vm809_vm3, %v6881_v4, 0.0 }
0x232b   :  { %3469 = vadd.xlane.f32.xlu1 %v3468_v20 }
0x233c   :  { %3569 = vrot.lane.b32.xlu1 %v8409_v35, %s7379_s1 }
0x23b4   :  { %v3473_v24 = vpop.xlane.xlu1 %3472 }
0x23b5   :  { %6882 = vrcp.f32 %v3473_v24 }
0x23b8   :  { %v3470_v19 = vpop.xlane.xlu1 %3469 }
0x23b9   :  { %6884 = vrcp.f32 %v3470_v19 }
0x23bc   :  { %v3570_v3 = vpop.permute.xlu1 %3569 }
0x23bf   :  { %v6883_v18 = vpop.eup %6882 }
0x23c0   :  { %v3477_v48 = vmul.f32 %v6883_v18, %v6879_v56 }
0x23c3   :  { %v6885_v60 = vpop.eup %6884 }
0x23c4   :  { %v3476_v45 = vmul.f32 %v6885_v60, %v6881_v4 }
0x23c6   :  { %6070 = vmatprep.mubr.msk.f32.mxu0 %vm809_vm3, %v3476_v45 }
0x23c7   :  { %6071 = vmatmul.mubr.msk.f32.vlgmr.msra.gmra.mrb[26].mxu0 %vm809_vm3, %v3477_v48 }
0x23c8   :  { %6493 = vmatpush3.bf16.xpose.msk.msra.mxu0 %vm7864_vm2, %v6488_v27  ;;  %6077 = vmatprep.mubr.msk.f32.mxu0 %vm723_vm1, %v3568_v2 }
0x23cf   :  { %6078 = vmatmul.mubr.msk.f32.vlgmr.msra.gmra.mrb[28].mxu0 %vm723_vm1, %v3570_v3 }
0x249a   :  { %v8467_v36 = vpop.f32.mrb[26].mxu0 }
0x249b   :  { %v8469_v16 = vpop.f32.mrb[27].mxu0 }
0x24a2   :  { %v6079_v1 = vpop.f32.mrb[28].mxu0 }
0x24a3   :  { %v3655_v6 = vadd.f32 %v8426_v55, %v6079_v1  ;;  %v3649_v56 = vpop.f32.mrb[29].mxu0 }
0x24a4   :  { %v3650_v4 = vadd.f32 %v8423_v32, %v3649_v56 }
0x24a5   :  { %v3661_v20 = vsel %vm809_vm3, %v3655_v6, -inf }
0x24a6   :  { %3662 = vmax.xlane.f32.xlu1 %v3661_v20  ;;  %v3658_v27 = vsel %vm809_vm3, %v3650_v4, -inf }
0x24a7   :  { %3659 = vmax.xlane.f32.xlu0 %v3658_v27 }
0x24b7   :  { %6780 = vrot.lane.b32.xlu1 %v8411_v41, %s7379_s1 }
0x24bb   :  { %3767 = vrot.lane.b32.xlu1 %v8401_v47, %s7382_s22 }
0x24bf   :  { %3769 = vrot.lane.b32.xlu1 %v8409_v35, %s7382_s22 }
0x2533   :  { %v3663_v2 = vpop.xlane.xlu1 %3662 }
0x2534   :  { %v3665_v24 = vsub.f32 %v3655_v6, %v3663_v2  ;;  %v3660_v19 = vpop.xlane.xlu0 %3659 }
0x2535   :  { %v3664_v18 = vsub.f32 %v3650_v4, %v3660_v19 }
0x2536   :  { %v3668_v60 = vmul.f32 1.442695, %v3665_v24 }
0x2537   :  { %v3666_v45 = vmul.f32 1.442695, %v3664_v18  ;;  %v6781_v48 = vpop.permute.xlu1 %6780 }
0x2538   :  { %6886 = vpow2.f32 %v3668_v60  ;;  %v6783_v3 = vunpack.i.h.bf16 %v6781_v48  ;;  %v6782_v1 = vunpack.i.l.bf16 %v6781_v48 }
0x2539   :  { %6888 = vpow2.f32 %v3666_v45 }
0x253a   :  { %v6494_v56 = vpack.c.bf16 %v6783_v3, %v6782_v1 }
0x253b   :  { %v3768_v1 = vpop.permute.xlu1 %3767 }
0x253c   :  { %6495 = vmatprep.subr.bf16.mxu1 %v6494_v56 }
0x253d   :  { %6497 = vmatpush3.bf16.msra.mxu1 %v6494_v56 }
0x2542   :  { %v6887_v20 = vpop.eup %6886 }
0x2543   :  { %v3673_v47 = vsel %vm809_vm3, %v6887_v20, 0.0  ;;  %v6889_v27 = vpop.eup %6888 }
0x2544   :  { %3674 = vadd.xlane.f32.xlu0 %v3673_v47  ;;  %v3670_v35 = vsel %vm809_vm3, %v6889_v27, 0.0 }
0x2548   :  { %3671 = vadd.xlane.f32.xlu0 %v3670_v35 }
0x255e   :  { %6785 = vrot.lane.b32.xlu0 %v8399_v44, %s7381_s2  ;;  %v3770_v44 = vpop.permute.xlu1 %3769 }
0x25d1   :  { %v3675_v6 = vpop.xlane.xlu0 %3674 }
0x25d2   :  { %6890 = vrcp.f32 %v3675_v6 }
0x25d5   :  { %v3672_v4 = vpop.xlane.xlu0 %3671 }
0x25d6   :  { %6892 = vrcp.f32 %v3672_v4 }
0x25d9   :  { %v6786_v2 = vpop.permute.xlu0 %6785 }
0x25da   :  { %v6788_v24 = vunpack.i.h.bf16 %v6786_v2  ;;  %v6787_v19 = vunpack.i.l.bf16 %v6786_v2 }
0x25dc   :  { %v6498_v18 = vpack.c.bf16 %v6788_v24, %v6787_v19  ;;  %v6891_v60 = vpop.eup %6890 }
0x25dd   :  { %v3679_v3 = vmul.f32 %v6891_v60, %v6887_v20 }
0x25de   :  { %6500 = vmatprep.subr.msk.bf16.mxu1 %vm7864_vm2, %v6498_v18 }
0x25e0   :  { %v6893_v45 = vpop.eup %6892 }
0x25e1   :  { %v3678_v48 = vmul.f32 %v6893_v45, %v6889_v27 }
0x25e3   :  { %6084 = vmatprep.mubr.msk.f32.mxu1 %vm809_vm3, %v3678_v48 }
0x25e4   :  { %6085 = vmatmul.mubr.msk.f32.vlgmr.msra.gmra.mrb[38].mxu1 %vm809_vm3, %v3679_v3 }
0x25e5   :  { %6503 = vmatpush3.bf16.xpose.msk.msra.mxu1 %vm7864_vm2, %v6498_v18  ;;  %6091 = vmatprep.mubr.msk.f32.mxu1 %vm723_vm1, %v3768_v1 }
0x25e6   :  { %6517 = vmatprep.subr.bf16.mxu1 %v7973_v40 }
0x25ec   :  { %6092 = vmatmul.mubr.msk.f32.vlgmr.msra.gmra.mrb[40].mxu1 %vm723_vm1, %v3770_v44 }
0x25ed   :  { %6519 = vmatpush3.bf16.msra.mxu1 %v7973_v40 }
0x25ee   :  { %6521 = vmatprep.subr.bf16.mxu1 %v7981_v42 }
0x25f1   :  { %6523 = vmatpush3.bf16.msra.mxu1 %v7981_v42 }
0x25f2   :  { %6537 = vmatprep.subr.bf16.mxu1 %v7907_v51 }
0x26b7   :  { %v6086_v56 = vpop.f32.mrb[38].mxu1 }
0x26b8   :  { %v3758_v20 = vpop.f32.mrb[39].mxu1 }
0x26bf   :  { %v6093_v47 = vpop.f32.mrb[40].mxu1 }
0x26c0   :  { %v3855_v27 = vadd.f32 %v8426_v55, %v6093_v47  ;;  %v3849_v35 = vpop.f32.mrb[41].mxu1 }
0x26c1   :  { %v3850_v6 = vadd.f32 %v8423_v32, %v3849_v35 }
0x26c2   :  { %v3861_v4 = vsel %vm809_vm3, %v3855_v27, -inf }
0x26c3   :  { %3862 = vmax.xlane.f32.xlu1 %v3861_v4  ;;  %v3858_v2 = vsel %vm809_vm3, %v3850_v6, -inf }
0x26c4   :  { %3859 = vmax.xlane.f32.xlu0 %v3858_v2 }
0x26d4   :  { %6790 = vrot.lane.b32.xlu1 %v8411_v41, %s7382_s22 }
0x26d8   :  { %3971 = vrot.lane.b32.xlu1 %v8467_v36, %s7361_s0 }
0x26dc   :  { %3977 = vrot.lane.b32.xlu1 %v3758_v20, %s7383_s8 }
0x2750   :  { %v3863_v40 = vpop.xlane.xlu1 %3862 }
0x2751   :  { %v3865_v42 = vsub.f32 %v3855_v27, %v3863_v40  ;;  %v3860_v55 = vpop.xlane.xlu0 %3859 }
0x2752   :  { %v3864_v24 = vsub.f32 %v3850_v6, %v3860_v55 }
0x2753   :  { %v3868_v19 = vmul.f32 1.442695, %v3865_v42 }
0x2754   :  { %v3866_v32 = vmul.f32 1.442695, %v3864_v24  ;;  %v6791_v18 = vpop.permute.xlu1 %6790 }
0x2755   :  { %v6793_v60 = vunpack.i.h.bf16 %v6791_v18  ;;  %v6792_v45 = vunpack.i.l.bf16 %v6791_v18 }
0x2756   :  { %6894 = vpow2.f32 %v3866_v32 }
0x2757   :  { %v6504_v48 = vpack.c.bf16 %v6793_v60, %v6792_v45  ;;  %6896 = vpow2.f32 %v3868_v19 }
0x2758   :  { %v3972_v2 = vpop.permute.xlu1 %3971 }
0x2759   :  { %6505 = vmatprep.subr.bf16.mxu0 %v6504_v48 }
0x275a   :  { %6507 = vmatpush3.bf16.msra.mxu0 %v6504_v48 }
0x275b   :  { %6509 = vmatprep.subr.bf16.mxu0 %v8008_v30 }
0x275c   :  { %v3978_v42 = vpop.permute.xlu1 %3977 }
0x2760   :  { %v6895_v41 = vpop.eup %6894 }
0x2761   :  { %v3870_v36 = vsel %vm809_vm3, %v6895_v41, 0.0  ;;  %v6897_v3 = vpop.eup %6896 }
0x2762   :  { %3871 = vadd.xlane.f32.xlu0 %v3870_v36  ;;  %v3873_v1 = vsel %vm809_vm3, %v6897_v3, 0.0 }
0x2766   :  { %3874 = vadd.xlane.f32.xlu0 %v3873_v1 }
0x277c   :  { %3969 = vrot.lane.b32.xlu0 %v8469_v16, %s7361_s0 }
0x2780   :  { %3979 = vrot.lane.b32.xlu0 %v6086_v56, %s7383_s8 }
0x27ef   :  { %v3872_v44 = vpop.xlane.xlu0 %3871 }
0x27f0   :  { %6898 = vrcp.f32 %v3872_v44 }
0x27f3   :  { %v3875_v20 = vpop.xlane.xlu0 %3874 }
0x27f4   :  { %6900 = vrcp.f32 %v3875_v20 }
0x27f7   :  { %v3970_v4 = vpop.permute.xlu0 %3969 }
0x27fa   :  { %v6899_v47 = vpop.eup %6898 }
0x27fb   :  { %v3878_v27 = vmul.f32 %v6899_v47, %v6895_v41  ;;  %v3980_v40 = vpop.permute.xlu0 %3979 }
0x27fd   :  { %6098 = vmatprep.mubr.msk.f32.mxu0 %vm809_vm3, %v3878_v27 }
0x27fe   :  { %v6901_v35 = vpop.eup %6900 }
0x27ff   :  { %v3879_v6 = vmul.f32 %v6901_v35, %v6897_v3 }
0x2801   :  { %6099 = vmatmul.mubr.msk.f32.vlgmr.msra.gmra.mrb[30].mxu0 %vm809_vm3, %v3879_v6 }
0x2802   :  { %6511 = vmatpush3.bf16.msra.mxu0 %v8008_v30  ;;  %v3991_v30 = vsel %vm723_vm1, %v8443_v61, %v3970_v4  ;;  %v6956_v61 = vld [vmem:[#allocation14] ss:$0 sm:$0xff] }
0x2803   :  { %6513 = vmatprep.subr.bf16.mxu0 %v8017_v34  ;;  %v3993_v19 = vsel %vm809_vm3, %v3991_v30, %v3978_v42 }
0x2806   :  { %6515 = vmatpush3.bf16.msra.mxu0 %v8017_v34  ;;  %v3992_v34 = vsel %vm723_vm1, %v8441_v7, %v3972_v2 }
0x2807   :  { %6526 = vmatprep.subr.msk.bf16.mxu0 %vm7864_vm2, %v7899_v43  ;;  %v3994_v32 = vsel %vm809_vm3, %v3992_v34, %v3980_v40 }
0x28d4   :  { %v6100_v16 = vpop.f32.mrb[30].mxu0 }
0x28d5   :  { %3987 = vrot.lane.b32.xlu0 %v6100_v16, %s7384_s10  ;;  %v3958_v56 = vpop.f32.mrb[31].mxu0 }
0x28d6   :  { %3985 = vrot.lane.b32.xlu1 %v3958_v56, %s7384_s10 }
0x2947   :  { %v3988_v55 = vpop.permute.xlu0 %3987 }
0x2948   :  { %v3986_v24 = vpop.permute.xlu1 %3985  ;;  %v3996_v60 = vsel %vm1543_vm4, %v3994_v32, %v3988_v55 }
0x2949   :  { %v3995_v18 = vsel %vm1543_vm4, %v3993_v19, %v3986_v24 }
0x294a   :  { %6109 = vmatprep.mubr.msk.f32.mxu0 %vm318_vm0, %v3995_v18 }
0x294b   :  { %6110 = vmatmul.mubr.msk.f32.vlgmr.msra.gmra.mrb[32].mxu0 %vm318_vm0, %v3996_v60 }
0x294c   :  { %6529 = vmatpush3.bf16.xpose.msk.msra.mxu0 %vm7864_vm2, %v7899_v43 }
0x294d   :  { %6532 = vmatprep.subr.msk.bf16.mxu0 %vm7864_vm2, %v7903_v49 }
0x2954   :  { %6535 = vmatpush3.bf16.xpose.msk.msra.mxu0 %vm7864_vm2, %v7903_v49 }
0x2955   :  { %6557 = vmatprep.subr.bf16.mxu0 %v8148_v26 }
0x2a1e   :  { %v6111_v7 = vpop.f32.mrb[32].mxu0 }
0x2a1f   :  { %v4075_v45 = vadd.f32 %v6956_v61, %v6111_v7  ;;  %v4069_v48 = vpop.f32.mrb[33].mxu0 }
0x2a20   :  { %v4070_v41 = vadd.f32 %v6956_v61, %v4069_v48 }
0x2a21   :  { %v4079_v36 = vadd.f32 %v4075_v45, %v8377_v21 }
0x2a22   :  { %v4078_v3 = vadd.f32 %v4070_v41, %v8380_v22 }
0x2a23   :  { %v4083_v43 = vsel %vm318_vm0, %v4079_v36, 0.0 }
0x2a24   :  { %4084 = vadd.xlane.f32.xlu0 %v4083_v43  ;;  %v4080_v1 = vsel %vm318_vm0, %v4078_v3, 0.0 }
0x2a25   :  { %4081 = vadd.xlane.f32.xlu1 %v4080_v1  ;;  %v8586_v1 = vld [vmem:[#allocation8] sm:$0xff] }
0x2ab1   :  { %v4085_v44 = vpop.xlane.xlu0 %4084 }
0x2ab2   :  { %v4087_v20 = vmul.f32 0.03125, %v4085_v44  ;;  %v4082_v49 = vpop.xlane.xlu1 %4081 }
0x2ab3   :  { %v4086_v47 = vmul.f32 0.03125, %v4082_v49 }
0x2ab4   :  { %v4089_v27 = vsub.f32 %v4079_v36, %v4087_v20 }
0x2ab5   :  { %v4088_v35 = vsub.f32 %v4078_v3, %v4086_v47 }
0x2ab6   :  { %v4091_v6 = vmul.f32 %v4089_v27, %v4089_v27 }
0x2ab7   :  { %v4090_v16 = vmul.f32 %v4088_v35, %v4088_v35 }
0x2ab8   :  { %v4095_v56 = vsel %vm318_vm0, %v4091_v6, 0.0 }
0x2ab9   :  { %4096 = vadd.xlane.f32.xlu1 %v4095_v56  ;;  %v4092_v21 = vsel %vm318_vm0, %v4090_v16, 0.0 }
0x2aba   :  { %4093 = vadd.xlane.f32.xlu0 %v4092_v21 }
0x2b46   :  { %v4097_v22 = vpop.xlane.xlu1 %4096 }
0x2b47   :  { %v4099_v4 = vmul.f32 0.03125, %v4097_v22  ;;  %v4094_v2 = vpop.xlane.xlu0 %4093 }
0x2b48   :  { %v4098_v40 = vmul.f32 0.03125, %v4094_v2 }
0x2b49   :  { %v4101_v42 = vadd.f32 1e-05, %v4099_v4 }
0x2b4a   :  { %v4100_v30 = vadd.f32 1e-05, %v4098_v40 }
0x2b4b   :  { %6902 = vrsqrt.f32 %v4101_v42 }
0x2b4c   :  { %6904 = vrsqrt.f32 %v4100_v30 }
0x2b55   :  { %v6903_v55 = vpop.eup %6902 }
0x2b56   :  { %v6905_v34 = vpop.eup %6904  ;;  %v4105_v24 = vmul.f32 %v6903_v55, %v4089_v27 }
0x2b57   :  { %v4104_v19 = vmul.f32 %v6905_v34, %v4088_v35 }
0x2b58   :  { %v4107_v32 = vmul.f32 %v4105_v24, %v8064_v33 }
0x2b59   :  { %v4106_v18 = vmul.f32 %v4104_v19, %v8064_v33 }
0x2b5a   :  { %v8552_v60 = vadd.f32 %v4107_v32, %v8067_v37 }
0x2b5b   :  { %v8555_v7 = vadd.f32 %v4106_v18, %v8067_v37  ;;  %v6957_v37 = vld [vmem:[#allocation17] ss:$0 sm:$0xff] }
0x2b5c   :  { %v4111_v45 = vadd.f32 %v8386_v57, %v8552_v60 }
0x2b5d   :  { %v4110_v61 = vadd.f32 %v8382_v23, %v8555_v7 }
0x2b5f   :  { %6120 = vmatprep.mubr.msk.f32.mxu1 %vm318_vm0, %v4110_v61 }
0x2b60   :  { %6121 = vmatmul.mubr.msk.f32.vlgmr.msra.gmra.mrb[42].mxu1 %vm318_vm0, %v4111_v45 }
0x2b61   :  { %6539 = vmatpush3.bf16.msra.mxu1 %v7907_v51 }
0x2b62   :  { %6541 = vmatprep.subr.bf16.mxu1 %v7911_v58 }
0x2b65   :  { %6543 = vmatpush3.bf16.msra.mxu1 %v7911_v58  ;;  %v8583_v58 = vld [vmem:[#allocation8 + $0x8] sm:$0xff] }
0x2b66   :  { %6546 = vmatprep.subr.msk.bf16.mxu1 %vm7864_vm2, %v8112_v31 }
0x2c33   :  { %v6122_v33 = vpop.f32.mrb[42].mxu1 }
0x2c34   :  { %v4190_v23 = vadd.f32 %v6957_v37, %v6122_v33  ;;  %v4184_v48 = vpop.f32.mrb[43].mxu1 }
0x2c35   :  { %v4185_v41 = vadd.f32 %v6957_v37, %v4184_v48 }
0x2c36   :  { %v8571_v36 = vmul.f32 0.35355338, %v4190_v23 }
0x2c37   :  { %v8569_v57 = vmul.f32 0.35355338, %v4185_v41 }
0x2c39   :  { %6131 = vmatprep.mubr.msk.f32.mxu0 %vm723_vm1, %v8569_v57 }
0x2c3a   :  { %6132 = vmatmul.mubr.msk.f32.vlgmr.msra.gmra.mrb[34].mxu0 %vm723_vm1, %v8571_v36 }
0x2c3b   :  { %6559 = vmatpush3.bf16.msra.mxu0 %v8148_v26 }
0x2c3c   :  { %6561 = vmatprep.subr.bf16.mxu0 %v8158_v38 }
0x2c3f   :  { %6563 = vmatpush3.bf16.msra.mxu0 %v8158_v38 }
0x2c40   :  { %6566 = vmatprep.subr.msk.bf16.mxu0 %vm7864_vm2, %v8160_v39 }
0x2d0d   :  { %v6133_v51 = vpop.f32.mrb[34].mxu0 }
0x2d0e   :  { %v4273_v3 = vadd.f32 %v8583_v58, %v6133_v51  ;;  %v4267_v43 = vpop.f32.mrb[35].mxu0 }
0x2d0f   :  { %v4268_v44 = vadd.f32 %v8586_v1, %v4267_v43 }
0x2d10   :  { %v4279_v26 = vsel %vm318_vm0, %v4273_v3, -inf }
0x2d11   :  { %4280 = vmax.xlane.f32.xlu1 %v4279_v26  ;;  %v4276_v20 = vsel %vm318_vm0, %v4268_v44, -inf }
0x2d12   :  { %4277 = vmax.xlane.f32.xlu0 %v4276_v20 }
0x2d9e   :  { %v4281_v38 = vpop.xlane.xlu1 %4280 }
0x2d9f   :  { %v4283_v49 = vsub.f32 %v4273_v3, %v4281_v38  ;;  %v4278_v47 = vpop.xlane.xlu0 %4277 }
0x2da0   :  { %v4282_v27 = vsub.f32 %v4268_v44, %v4278_v47 }
0x2da1   :  { %v4286_v35 = vmul.f32 1.442695, %v4283_v49 }
0x2da2   :  { %v4284_v6 = vmul.f32 1.442695, %v4282_v27 }
0x2da3   :  { %6906 = vpow2.f32 %v4286_v35 }
0x2da4   :  { %6908 = vpow2.f32 %v4284_v6 }
0x2dad   :  { %v6907_v16 = vpop.eup %6906 }
0x2dae   :  { %v6909_v56 = vpop.eup %6908  ;;  %v4291_v21 = vsel %vm318_vm0, %v6907_v16, 0.0 }
0x2daf   :  { %4292 = vadd.xlane.f32.xlu1 %v4291_v21  ;;  %v4288_v22 = vsel %vm318_vm0, %v6909_v56, 0.0 }
0x2db0   :  { %4289 = vadd.xlane.f32.xlu0 %v4288_v22 }
0x2dc0   :  { %4381 = vrot.lane.b32.xlu1 %v8571_v36, %s7378_s6 }
0x2dc6   :  { %4379 = vrot.lane.b32.xlu0 %v8569_v57, %s7378_s6 }
0x2e3c   :  { %v4293_v4 = vpop.xlane.xlu1 %4292 }
0x2e3d   :  { %6910 = vrcp.f32 %v4293_v4  ;;  %v4290_v2 = vpop.xlane.xlu0 %4289 }
0x2e3e   :  { %6912 = vrcp.f32 %v4290_v2 }
0x2e40   :  { %v4382_v24 = vpop.permute.xlu1 %4381 }
0x2e41   :  { %v4380_v34 = vpop.permute.xlu0 %4379 }
0x2e47   :  { %v6911_v40 = vpop.eup %6910 }
0x2e48   :  { %v6913_v42 = vpop.eup %6912  ;;  %v4297_v55 = vmul.f32 %v6911_v40, %v6907_v16 }
0x2e49   :  { %v4296_v30 = vmul.f32 %v6913_v42, %v6909_v56 }
0x2e4b   :  { %6142 = vmatprep.mubr.msk.f32.mxu1 %vm318_vm0, %v4296_v30 }
0x2e4c   :  { %6143 = vmatmul.mubr.msk.f32.vlgmr.msra.gmra.mrb[44].mxu1 %vm318_vm0, %v4297_v55 }
0x2e4d   :  { %6549 = vmatpush3.bf16.xpose.msk.msra.mxu1 %vm7864_vm2, %v8112_v31  ;;  %6153 = vmatprep.mubr.msk.f32.mxu1 %vm723_vm1, %v4380_v34 }
0x2e4e   :  { %6552 = vmatprep.subr.msk.bf16.mxu1 %vm7864_vm2, %v8118_v54 }
0x2e55   :  { %6555 = vmatpush3.bf16.xpose.msk.msra.mxu1 %vm7864_vm2, %v8118_v54 }
0x2e56   :  { %6577 = vmatprep.subr.bf16.mxu1 %v8198_v25 }
0x2e5c   :  { %6154 = vmatmul.mubr.msk.f32.vlgmr.msra.gmra.mrb[46].mxu1 %vm723_vm1, %v4382_v24 }
0x2e5d   :  { %6579 = vmatpush3.bf16.msra.mxu1 %v8198_v25 }
0x2e5e   :  { %6581 = vmatprep.subr.bf16.mxu1 %v8208_v8 }
0x2e61   :  { %6583 = vmatpush3.bf16.msra.mxu1 %v8208_v8 }
0x2e62   :  { %6586 = vmatprep.subr.msk.bf16.mxu1 %vm7864_vm2, %v8210_v14 }
0x2f1f   :  { %v8617_v31 = vpop.f32.mrb[44].mxu1 }
0x2f20   :  { %v8619_v19 = vpop.f32.mrb[45].mxu1 }
0x2f2f   :  { %v6155_v54 = vpop.f32.mrb[46].mxu1 }
0x2f30   :  { %v4459_v32 = vadd.f32 %v8583_v58, %v6155_v54  ;;  %v4453_v18 = vpop.f32.mrb[47].mxu1 }
0x2f31   :  { %v4454_v61 = vadd.f32 %v8586_v1, %v4453_v18 }
0x2f32   :  { %v4465_v25 = vsel %vm318_vm0, %v4459_v32, -inf }
0x2f33   :  { %4466 = vmax.xlane.f32.xlu0 %v4465_v25  ;;  %v4462_v45 = vsel %vm318_vm0, %v4454_v61, -inf }
0x2f34   :  { %4463 = vmax.xlane.f32.xlu1 %v4462_v45 }
0x2fc0   :  { %v4467_v8 = vpop.xlane.xlu0 %4466 }
0x2fc1   :  { %v4469_v33 = vsub.f32 %v4459_v32, %v4467_v8  ;;  %v4464_v37 = vpop.xlane.xlu1 %4463 }
0x2fc2   :  { %v4468_v23 = vsub.f32 %v4454_v61, %v4464_v37 }
0x2fc3   :  { %v4472_v48 = vmul.f32 1.442695, %v4469_v33 }
0x2fc4   :  { %v4470_v41 = vmul.f32 1.442695, %v4468_v23 }
0x2fc5   :  { %6914 = vpow2.f32 %v4472_v48 }
0x2fc6   :  { %6916 = vpow2.f32 %v4470_v41 }
0x2fcf   :  { %v6915_v51 = vpop.eup %6914 }
0x2fd0   :  { %v6917_v3 = vpop.eup %6916  ;;  %v4477_v43 = vsel %vm318_vm0, %v6915_v51, 0.0 }
0x2fd1   :  { %4478 = vadd.xlane.f32.xlu1 %v4477_v43  ;;  %v4474_v44 = vsel %vm318_vm0, %v6917_v3, 0.0 }
0x2fd2   :  { %4475 = vadd.xlane.f32.xlu0 %v4474_v44 }
0x2fe2   :  { %4567 = vrot.lane.b32.xlu1 %v8571_v36, %s7379_s1 }
0x2fe8   :  { %4565 = vrot.lane.b32.xlu0 %v8569_v57, %s7379_s1 }
0x305e   :  { %v4479_v26 = vpop.xlane.xlu1 %4478 }
0x305f   :  { %6918 = vrcp.f32 %v4479_v26  ;;  %v4476_v20 = vpop.xlane.xlu0 %4475 }
0x3060   :  { %6920 = vrcp.f32 %v4476_v20 }
0x3062   :  { %v4568_v6 = vpop.permute.xlu1 %4567 }
0x3063   :  { %v4566_v35 = vpop.permute.xlu0 %4565 }
0x3069   :  { %v6919_v38 = vpop.eup %6918 }
0x306a   :  { %v6921_v49 = vpop.eup %6920  ;;  %v4483_v27 = vmul.f32 %v6919_v38, %v6915_v51 }
0x306b   :  { %v4482_v47 = vmul.f32 %v6921_v49, %v6917_v3 }
0x306d   :  { %6164 = vmatprep.mubr.msk.f32.mxu0 %vm318_vm0, %v4482_v47 }
0x306e   :  { %6165 = vmatmul.mubr.msk.f32.vlgmr.msra.gmra.mrb[36].mxu0 %vm318_vm0, %v4483_v27 }
0x306f   :  { %6569 = vmatpush3.bf16.xpose.msk.msra.mxu0 %vm7864_vm2, %v8160_v39  ;;  %6175 = vmatprep.mubr.msk.f32.mxu0 %vm723_vm1, %v4566_v35 }
0x3070   :  { %6572 = vmatprep.subr.msk.bf16.mxu0 %vm7864_vm2, %v8170_v13 }
0x3077   :  { %6575 = vmatpush3.bf16.xpose.msk.msra.mxu0 %vm7864_vm2, %v8170_v13 }
0x3078   :  { %6597 = vmatprep.subr.bf16.mxu0 %v8243_v53 }
0x307e   :  { %6176 = vmatmul.mubr.msk.f32.vlgmr.msra.gmra.mrb[38].mxu0 %vm723_vm1, %v4568_v6 }
0x307f   :  { %6599 = vmatpush3.bf16.msra.mxu0 %v8243_v53 }
0x3080   :  { %6601 = vmatprep.subr.bf16.mxu0 %v8252_v11 }
0x3083   :  { %6603 = vmatpush3.bf16.msra.mxu0 %v8252_v11 }
0x3084   :  { %6605 = vmatprep.subr.bf16.mxu0 %v8258_v28 }
0x3141   :  { %v8649_v39 = vpop.f32.mrb[36].mxu0 }
0x3142   :  { %v8651_v16 = vpop.f32.mrb[37].mxu0 }
0x3151   :  { %v6177_v56 = vpop.f32.mrb[38].mxu0 }
0x3152   :  { %v4645_v13 = vadd.f32 %v8583_v58, %v6177_v56  ;;  %v4639_v21 = vpop.f32.mrb[39].mxu0 }
0x3153   :  { %v4640_v22 = vadd.f32 %v8586_v1, %v4639_v21 }
0x3154   :  { %v4651_v4 = vsel %vm318_vm0, %v4645_v13, -inf }
0x3155   :  { %4652 = vmax.xlane.f32.xlu0 %v4651_v4  ;;  %v4648_v53 = vsel %vm318_vm0, %v4640_v22, -inf }
0x3156   :  { %4649 = vmax.xlane.f32.xlu1 %v4648_v53 }
0x31e2   :  { %v4653_v2 = vpop.xlane.xlu0 %4652 }
0x31e3   :  { %v4655_v11 = vsub.f32 %v4645_v13, %v4653_v2  ;;  %v4650_v40 = vpop.xlane.xlu1 %4649 }
0x31e4   :  { %v4654_v42 = vsub.f32 %v4640_v22, %v4650_v40 }
0x31e5   :  { %v4658_v30 = vmul.f32 1.442695, %v4655_v11 }
0x31e6   :  { %v4656_v55 = vmul.f32 1.442695, %v4654_v42 }
0x31e7   :  { %6922 = vpow2.f32 %v4658_v30 }
0x31e8   :  { %6924 = vpow2.f32 %v4656_v55 }
0x31f1   :  { %v6923_v34 = vpop.eup %6922 }
0x31f2   :  { %v6925_v24 = vpop.eup %6924  ;;  %v4663_v54 = vsel %vm318_vm0, %v6923_v34, 0.0 }
0x31f3   :  { %4664 = vadd.xlane.f32.xlu1 %v4663_v54  ;;  %v4660_v32 = vsel %vm318_vm0, %v6925_v24, 0.0 }
0x31f4   :  { %4661 = vadd.xlane.f32.xlu0 %v4660_v32 }
0x3204   :  { %4753 = vrot.lane.b32.xlu1 %v8571_v36, %s7382_s22 }
0x320a   :  { %4751 = vrot.lane.b32.xlu0 %v8569_v57, %s7382_s22 }
0x3280   :  { %v4665_v18 = vpop.xlane.xlu1 %4664 }
0x3281   :  { %6926 = vrcp.f32 %v4665_v18  ;;  %v4662_v61 = vpop.xlane.xlu0 %4661 }
0x3282   :  { %6928 = vrcp.f32 %v4662_v61 }
0x3284   :  { %v4754_v57 = vpop.permute.xlu1 %4753 }
0x3285   :  { %v4752_v37 = vpop.permute.xlu0 %4751 }
0x328b   :  { %v6927_v25 = vpop.eup %6926 }
0x328c   :  { %v6929_v45 = vpop.eup %6928  ;;  %v4669_v33 = vmul.f32 %v6927_v25, %v6923_v34 }
0x328d   :  { %v4668_v8 = vmul.f32 %v6929_v45, %v6925_v24 }
0x328f   :  { %6186 = vmatprep.mubr.msk.f32.mxu1 %vm318_vm0, %v4668_v8 }
0x3290   :  { %6187 = vmatmul.mubr.msk.f32.vlgmr.msra.gmra.mrb[48].mxu1 %vm318_vm0, %v4669_v33 }
0x3291   :  { %6589 = vmatpush3.bf16.xpose.msk.msra.mxu1 %vm7864_vm2, %v8210_v14  ;;  %6197 = vmatprep.mubr.msk.f32.mxu1 %vm723_vm1, %v4752_v37 }
0x3292   :  { %6592 = vmatprep.subr.msk.bf16.mxu1 %vm7864_vm2, %v8220_v9 }
0x3299   :  { %6595 = vmatpush3.bf16.xpose.msk.msra.mxu1 %vm7864_vm2, %v8220_v9 }
0x329a   :  { %6613 = vmatprep.subr.bf16.mxu1 %v8287_v50 }
0x32a0   :  { %6198 = vmatmul.mubr.msk.f32.vlgmr.msra.gmra.mrb[50].mxu1 %vm723_vm1, %v4754_v57 }
0x32a1   :  { %6615 = vmatpush3.bf16.msra.mxu1 %v8287_v50 }
0x32a2   :  { %6617 = vmatprep.subr.bf16.mxu1 %v8291_v0 }
0x32a5   :  { %6619 = vmatpush3.bf16.msra.mxu1 %v8291_v0 }
0x3363   :  { %v6188_v14 = vpop.f32.mrb[48].mxu1 }
0x3364   :  { %v4742_v36 = vpop.f32.mrb[49].mxu1 }
0x3373   :  { %v6199_v23 = vpop.f32.mrb[50].mxu1 }
0x3374   :  { %v4831_v48 = vadd.f32 %v8583_v58, %v6199_v23  ;;  %v4825_v41 = vpop.f32.mrb[51].mxu1 }
0x3375   :  { %v4826_v52 = vadd.f32 %v8586_v1, %v4825_v41 }
0x3376   :  { %v4837_v9 = vsel %vm318_vm0, %v4831_v48, -inf }
0x3377   :  { %4838 = vmax.xlane.f32.xlu0 %v4837_v9  ;;  %v4834_v51 = vsel %vm318_vm0, %v4826_v52, -inf }
0x3378   :  { %4835 = vmax.xlane.f32.xlu1 %v4834_v51 }
0x3404   :  { %v4839_v3 = vpop.xlane.xlu0 %4838 }
0x3405   :  { %v4841_v50 = vsub.f32 %v4831_v48, %v4839_v3  ;;  %v4836_v43 = vpop.xlane.xlu1 %4835 }
0x3406   :  { %v4840_v44 = vsub.f32 %v4826_v52, %v4836_v43 }
0x3407   :  { %v4844_v26 = vmul.f32 1.442695, %v4841_v50 }
0x3408   :  { %v4842_v0 = vmul.f32 1.442695, %v4840_v44 }
0x3409   :  { %6930 = vpow2.f32 %v4844_v26 }
0x340a   :  { %6932 = vpow2.f32 %v4842_v0  ;;  %v6961_v0 = vld [vmem:[%s8838_s28] ss:$0 sm:$0xff] }
0x3413   :  { %v6931_v20 = vpop.eup %6930 }
0x3414   :  { %v6933_v38 = vpop.eup %6932  ;;  %v4849_v58 = vsel %vm318_vm0, %v6931_v20, 0.0 }
0x3415   :  { %4850 = vadd.xlane.f32.xlu1 %v4849_v58  ;;  %v4846_v1 = vsel %vm318_vm0, %v6933_v38, 0.0 }
0x3416   :  { %4847 = vadd.xlane.f32.xlu0 %v4846_v1 }
0x3426   :  { %4941 = vrot.lane.b32.xlu1 %v8649_v39, %s7361_s0 }
0x342a   :  { %4947 = vrot.lane.b32.xlu1 %v4742_v36, %s7383_s8 }
0x342c   :  { %4939 = vrot.lane.b32.xlu0 %v8651_v16, %s7361_s0 }
0x3430   :  { %4949 = vrot.lane.b32.xlu0 %v6188_v14, %s7383_s8  ;;  %s7385_s8 = smov [#allocation28]  }
0x34a2   :  { %v4851_v49 = vpop.xlane.xlu1 %4850 }
0x34a3   :  { %6934 = vrcp.f32 %v4851_v49  ;;  %v4848_v47 = vpop.xlane.xlu0 %4847 }
0x34a4   :  { %6936 = vrcp.f32 %v4848_v47 }
0x34a6   :  { %v4942_v21 = vpop.permute.xlu1 %4941 }
0x34a7   :  { %v4940_v13 = vpop.permute.xlu0 %4939  ;;  %v4962_v2 = vsel %vm723_vm1, %v8617_v31, %v4942_v21 }
0x34a8   :  { %v4961_v53 = vsel %vm723_vm1, %v8619_v19, %v4940_v13  ;;  %v6960_v19 = vld [vmem:[%s8793_s19] ss:$0 sm:$0xff] }
0x34aa   :  { %v4948_v4 = vpop.permute.xlu1 %4947 }
0x34ab   :  { %v4950_v22 = vpop.permute.xlu0 %4949 }
0x34ac   :  { %v4964_v40 = vsel %vm809_vm3, %v4962_v2, %v4950_v22 }
0x34ad   :  { %v6935_v27 = vpop.eup %6934 }
0x34ae   :  { %v6937_v35 = vpop.eup %6936  ;;  %v4855_v56 = vmul.f32 %v6935_v27, %v6931_v20 }
0x34af   :  { %v4854_v6 = vmul.f32 %v6937_v35, %v6933_v38 }
0x34b1   :  { %6208 = vmatprep.mubr.msk.f32.mxu0 %vm318_vm0, %v4854_v6 }
0x34b2   :  { %6209 = vmatmul.mubr.msk.f32.vlgmr.msra.gmra.mrb[40].mxu0 %vm318_vm0, %v4855_v56 }
0x34b3   :  { %6607 = vmatpush3.bf16.msra.mxu0 %v8258_v28 }
0x34b4   :  { %6609 = vmatprep.subr.bf16.mxu0 %v8260_v29 }
0x34b7   :  { %6611 = vmatpush3.bf16.msra.mxu0 %v8260_v29  ;;  %v4963_v29 = vsel %vm809_vm3, %v4961_v53, %v4948_v4 }
0x34b8   :  { %6621 = vmatprep.subr.bf16.mxu0 %v8305_v46 }
0x3585   :  { %v6210_v39 = vpop.f32.mrb[40].mxu0 }
0x3586   :  { %4957 = vrot.lane.b32.xlu0 %v6210_v39, %s7384_s10  ;;  %v4928_v16 = vpop.f32.mrb[41].mxu0 }
0x3587   :  { %4955 = vrot.lane.b32.xlu1 %v4928_v16, %s7384_s10  ;;  %s5321_s10 = sshll.u32 %s7385_s8, 4  ;;  %s5322_s10 = int_to_ptr.vmem [resolvable:$true] %s5321_s10 }
0x3588   :  { %s7316_s25 = scalar_lea.vmem %s5322_s10, 256  ;;  %p7321_p3 = scmp.lt.s32.totalorder %s5322_s10, %s5322_s10 }
0x3589   :  { %p7317_p2 = scmp.ne.s32.totalorder %s5322_s10, %s7316_s25  ;;  %p7322_p4 = scmp.lt.s32.totalorder %s7316_s25, %s7316_s25 }
0x358b   :  { %p7323_p5 = por %p7322_p4, %p7321_p3 }
0x358d   :  { %p7324_p6 = pnand %p7323_p5, %p7317_p2 }
0x35f8   :  { %v4958_v28 = vpop.permute.xlu0 %4957 }
0x35f9   :  { %v4956_v11 = vpop.permute.xlu1 %4955  ;;  %v4966_v30 = vsel %vm1543_vm4, %v4964_v40, %v4958_v28 }
0x35fa   :  { %v4965_v42 = vsel %vm1543_vm4, %v4963_v29, %v4956_v11 }
0x35fb   :  { %6219 = vmatprep.mubr.msk.f32.mxu0 %vm318_vm0, %v4965_v42 }
0x35fc   :  { %6220 = vmatmul.mubr.msk.f32.vlgmr.msra.gmra.mrb[42].mxu0 %vm318_vm0, %v4966_v30 }
0x35fd   :  { %6623 = vmatpush3.bf16.msra.mxu0 %v8305_v46 }
0x35fe   :  { %6625 = vmatprep.subr.bf16.mxu0 %v8310_v59 }
0x3601   :  { %6627 = vmatpush3.bf16.msra.mxu0 %v8310_v59 }
0x3602   :  { %6629 = vmatprep.subr.bf16.mxu0 %v8321_v63 }
0x3605   :  { %6631 = vmatpush3.bf16.msra.mxu0 %v8321_v63 }
0x3606   :  { %6633 = vmatprep.subr.bf16.mxu0 %v8350_v10 }
0x3609   :  { %6635 = vmatpush3.bf16.msra.mxu0 %v8350_v10 }
0x36cf   :  { %v6221_v31 = vpop.f32.mrb[42].mxu0 }
0x36d0   :  { %v5045_v55 = vadd.f32 %v6960_v19, %v6221_v31  ;;  %v5039_v34 = vpop.f32.mrb[43].mxu0 }
0x36d1   :  { %v5040_v46 = vadd.f32 %v6960_v19, %v5039_v34 }
0x36d2   :  { %v5049_v24 = vadd.f32 %v5045_v55, %v8552_v60 }
0x36d3   :  { %v5048_v59 = vadd.f32 %v5040_v46, %v8555_v7 }
0x36d4   :  { %v5053_v54 = vsel %vm318_vm0, %v5049_v24, 0.0 }
0x36d5   :  { %5054 = vadd.xlane.f32.xlu0 %v5053_v54  ;;  %v5050_v63 = vsel %vm318_vm0, %v5048_v59, 0.0 }
0x36d6   :  { %5051 = vadd.xlane.f32.xlu1 %v5050_v63 }
0x3762   :  { %v5055_v32 = vpop.xlane.xlu0 %5054 }
0x3763   :  { %v5057_v10 = vmul.f32 0.03125, %v5055_v32  ;;  %v5052_v18 = vpop.xlane.xlu1 %5051 }
0x3764   :  { %v5056_v61 = vmul.f32 0.03125, %v5052_v18 }
0x3765   :  { %v5059_v25 = vsub.f32 %v5049_v24, %v5057_v10 }
0x3766   :  { %v5058_v45 = vsub.f32 %v5048_v59, %v5056_v61 }
0x3767   :  { %v5061_v8 = vmul.f32 %v5059_v25, %v5059_v25 }
0x3768   :  { %v5060_v33 = vmul.f32 %v5058_v45, %v5058_v45 }
0x3769   :  { %v5065_v37 = vsel %vm318_vm0, %v5061_v8, 0.0 }
0x376a   :  { %5066 = vadd.xlane.f32.xlu1 %v5065_v37  ;;  %v5062_v60 = vsel %vm318_vm0, %v5060_v33, 0.0 }
0x376b   :  { %5063 = vadd.xlane.f32.xlu0 %v5062_v60 }
0x37f7   :  { %v5067_v7 = vpop.xlane.xlu1 %5066 }
0x37f8   :  { %v5069_v57 = vmul.f32 0.03125, %v5067_v7  ;;  %v5064_v14 = vpop.xlane.xlu0 %5063 }
0x37f9   :  { %v5068_v36 = vmul.f32 0.03125, %v5064_v14 }
0x37fa   :  { %v5071_v23 = vadd.f32 1e-05, %v5069_v57 }
0x37fb   :  { %v5070_v48 = vadd.f32 1e-05, %v5068_v36 }
0x37fc   :  { %6938 = vrsqrt.f32 %v5071_v23 }
0x37fd   :  { %6940 = vrsqrt.f32 %v5070_v48 }
0x3806   :  { %v6939_v41 = vpop.eup %6938 }
0x3807   :  { %v6941_v52 = vpop.eup %6940  ;;  %v5075_v9 = vmul.f32 %v6939_v41, %v5059_v25 }
0x3808   :  { %v5074_v51 = vmul.f32 %v6941_v52, %v5058_v45 }
0x3809   :  { %v5077_v3 = vmul.f32 %v5075_v9, %v8329_v12 }
0x380a   :  { %v5076_v50 = vmul.f32 %v5074_v51, %v8329_v12  ;;  %v5304_v51 = vsub.s32 6, %v8054_v17 }
0x380b   :  { %v5079_v44 = vadd.f32 %v5077_v3, %v8332_v5  ;;  %v5310_v3 = vsub.s32 7, %v8054_v17 }
0x380c   :  { %v5078_v43 = vadd.f32 %v5076_v50, %v8332_v5  ;;  %v6962_v5 = vld [vmem:[%s8839_s21] ss:$0 sm:$0xff] }
0x380d   :  { %v6963_v50 = vld [vmem:[%s8794_s20] sm:$0xff] }
0x380e   :  { %6230 = vmatprep.mubr.msk.f32.mxu1 %vm318_vm0, %v5078_v43 }
0x380f   :  { %6231 = vmatmul.mubr.msk.f32.vlgmr.msra.gmra.mrb[52].mxu1 %vm318_vm0, %v5079_v44 }
0x38e2   :  { %v6232_v26 = vpop.f32.mrb[52].mxu1 }
0x38e3   :  { %v5158_v20 = vadd.f32 %v6961_v0, %v6232_v26  ;;  %v5152_v38 = vpop.f32.mrb[53].mxu1 }
0x38e4   :  { %v5153_v58 = vadd.f32 %v6961_v0, %v5152_v38 }
0x38e5   :  { %v5162_v49 = vmax.f32 %v5158_v20, 0.0  ;;  %v5311_v20 = vrot.slane %v6963_v50, %v5310_v3 }
0x38e6   :  { %v5161_v1 = vmax.f32 %v5153_v58, 0.0 }
0x38e8   :  { %6249 = vmatprep.mubr.msk.f32.mxu0 %vm2883_vm5, %v5161_v1 }
0x38e9   :  { %6250 = vmatmul.mubr.msk.f32.vlgmr.msra.gmra.mrb[44].mxu0 %vm2883_vm5, %v5162_v49 }
0x39bc   :  { %v6251_v12 = vpop.f32.mrb[44].mxu0 }
0x39bd   :  { %v5241_v47 = vadd.f32 %v6962_v5, %v6251_v12  ;;  %v5235_v27 = vpop.f32.mrb[45].mxu0 }
0x39be   :  { %v5236_v35 = vadd.f32 %v6962_v5, %v5235_v27 }
0x39bf   :  { %v5245_v6 = vadd.f32 %v5241_v47, %v5079_v44 }
0x39c0   :  { %v5244_v56 = vadd.f32 %v5236_v35, %v5078_v43  ;;  %v5305_v43 = vrot.slane %v6963_v50, %v5304_v51 }
0x39c1   :  { %v5249_v39 = vsel %vm318_vm0, %v5245_v6, 0.0 }
0x39c2   :  { %5250 = vadd.xlane.f32.xlu1 %v5249_v39  ;;  %v5246_v16 = vsel %vm318_vm0, %v5244_v56, 0.0 }
0x39c3   :  { %5247 = vadd.xlane.f32.xlu0 %v5246_v16 }
0x3a4f   :  { %v5251_v13 = vpop.xlane.xlu1 %5250 }
0x3a50   :  { %v5253_v21 = vmul.f32 0.03125, %v5251_v13  ;;  %v5248_v22 = vpop.xlane.xlu0 %5247 }
0x3a51   :  { %v5252_v4 = vmul.f32 0.03125, %v5248_v22 }
0x3a52   :  { %v5255_v53 = vsub.f32 %v5245_v6, %v5253_v21 }
0x3a53   :  { %v5254_v28 = vsub.f32 %v5244_v56, %v5252_v4 }
0x3a54   :  { %v5257_v2 = vmul.f32 %v5255_v53, %v5255_v53 }
0x3a55   :  { %v5256_v29 = vmul.f32 %v5254_v28, %v5254_v28 }
0x3a56   :  { %v5261_v11 = vsel %vm318_vm0, %v5257_v2, 0.0 }
0x3a57   :  { %5262 = vadd.xlane.f32.xlu1 %v5261_v11  ;;  %v5258_v40 = vsel %vm318_vm0, %v5256_v29, 0.0 }
0x3a58   :  { %5259 = vadd.xlane.f32.xlu0 %v5258_v40 }
0x3ae4   :  { %v5263_v42 = vpop.xlane.xlu1 %5262 }
0x3ae5   :  { %v5265_v30 = vmul.f32 0.03125, %v5263_v42  ;;  %v5260_v31 = vpop.xlane.xlu0 %5259 }
0x3ae6   :  { %v5264_v19 = vmul.f32 0.03125, %v5260_v31 }
0x3ae7   :  { %v5267_v55 = vadd.f32 1e-05, %v5265_v30 }
0x3ae8   :  { %v5266_v34 = vadd.f32 1e-05, %v5264_v19 }
0x3ae9   :  { %6942 = vrsqrt.f32 %v5267_v55 }
0x3aea   :  { %6944 = vrsqrt.f32 %v5266_v34 }
0x3af3   :  { %v6943_v46 = vpop.eup %6942 }
0x3af4   :  { %v6945_v24 = vpop.eup %6944  ;;  %v5271_v59 = vmul.f32 %v6943_v46, %v5255_v53 }
0x3af5   :  { %v5270_v54 = vmul.f32 %v6945_v24, %v5254_v28 }
0x3af6   :  { %v5273_v63 = vmul.f32 %v5271_v59, %v8369_v15 }
0x3af7   :  { %v5272_v32 = vmul.f32 %v5270_v54, %v8369_v15 }
0x3af8   :  { %v5275_v10 = vadd.f32 %v5273_v63, %v8372_v62 }
0x3af9   :  { %v5274_v18 = vadd.f32 %v5272_v32, %v8372_v62 }
0x3afa   :  { %v5279_v61 = vsel %vm318_vm0, %v5275_v10, 0.0 }
0x3afb   :  { %5280 = vadd.xlane.f32.xlu1 %v5279_v61  ;;  %v5276_v25 = vsel %vm318_vm0, %v5274_v18, 0.0 }
0x3afc   :  { %5277 = vadd.xlane.f32.xlu0 %v5276_v25 }
0x3b88   :  { %v5281_v45 = vpop.xlane.xlu1 %5280 }
0x3b89   :  { %v5283_v8 = vmul.f32 0.03125, %v5281_v45  ;;  %v5278_v33 = vpop.xlane.xlu0 %5277 }
0x3b8a   :  { %v5282_v37 = vmul.f32 0.03125, %v5278_v33 }
0x3b8b   :  { %v5285_v60 = vsub.f32 %v5275_v10, %v5283_v8 }
0x3b8c   :  { %v5284_v7 = vsub.f32 %v5274_v18, %v5282_v37 }
0x3b8d   :  { %v5287_v57 = vmul.f32 %v5285_v60, %v5285_v60 }
0x3b8e   :  { %v5286_v14 = vmul.f32 %v5284_v7, %v5284_v7 }
0x3b8f   :  { %v5291_v15 = vsel %vm318_vm0, %v5287_v57, 0.0 }
0x3b90   :  { %5292 = vadd.xlane.f32.xlu1 %v5291_v15  ;;  %v5288_v36 = vsel %vm318_vm0, %v5286_v14, 0.0 }
0x3b91   :  { %5289 = vadd.xlane.f32.xlu0 %v5288_v36 }
0x3c1d   :  { %v5293_v62 = vpop.xlane.xlu1 %5292 }
0x3c1e   :  { %v5295_v23 = vmul.f32 0.03125, %v5293_v62  ;;  %v5290_v48 = vpop.xlane.xlu0 %5289 }
0x3c1f   :  { %v5294_v41 = vmul.f32 0.03125, %v5290_v48 }
0x3c20   :  { %v5297_v52 = vadd.f32 1e-05, %v5295_v23 }
0x3c21   :  { %v5296_v9 = vadd.f32 1e-05, %v5294_v41 }
0x3c22   :  { %6946 = vrsqrt.f32 %v5297_v52 }
0x3c23   :  { %6948 = vrsqrt.f32 %v5296_v9 }
0x3c2c   :  { %v6947_v44 = vpop.eup %6946 }
0x3c2d   :  { %v6949_v26 = vpop.eup %6948  ;;  %v5301_v0 = vmul.f32 %v6947_v44, %v5285_v60 }
0x3c2e   :  { %v5300_v38 = vmul.f32 %v6949_v26, %v5284_v7 }
0x3c2f   :  { %v5307_v58 = vmul.f32 %v5305_v43, %v5301_v0 }
0x3c30   :  { %v5306_v1 = vmul.f32 %v5305_v43, %v5300_v38 }
0x3c31   :  { %v5313_v49 = vadd.f32 %v5311_v20, %v5307_v58 }
0x3c32   :  { %v5312_v12 = vadd.f32 %v5311_v20, %v5306_v1 }
0x3c33   :  { %5315 = vst.msk [vmem:[#allocation28 + $0x8] sm:$0xff] %vm318_vm0, %v5313_v49 }
0x3c34   :  { %5314 = vst.msk [vmem:[#allocation28] sm:$0xff] %vm318_vm0, %v5312_v12 }
0x3c35   :  { %7327 = shalt.err (!%p7324_p6)
}
0x3c36   :  { %s8840_s16 = sld [smem:[#allocation51_spill]] }
0x3c3c   :  { %s7328_s27 = scalar_lea.hbm %s8840_s16, 256 }
0x3c3d   :  { %p7329_p7 = scmp.ne.s32.totalorder %s8840_s16, %s7328_s27  ;;  %p7332_p8 = scmp.lt.u32.totalorder %s7328_s27, %s8840_s16 }
0x3c3f   :  { %p7334_p9 = pnand %p7332_p8, %p7329_p7 }
0x3c41   :  { %7337 = shalt.err (!%p7334_p9)
}
0x3c42   :  { %5327 = dma.vmem_to_hbm [thread:$0]  %s5322_s10, 256, %s8840_s16, [#allocation4], %s7360_s5, %s7360_s5, %s7361_s0  }
0x3c43   :  { %7356 = dma.done.wait [#allocation4], 256  }
0x3c44   :  { %7357 = vsyncadd [#allocation4], 4294967040 }
0x3c45   :  { %5331 = vsyncpa [#allocation3], 1 }
0x3c46   :  { %5332 = vsyncpa [#allocation6], 1 }
0x3c47   :  { %5333 = vsyncpa [#allocation9], 1 }
0x3c48   :  { %5334 = vsyncpa [#allocation12], 1 }
0x3c49   :  { %5335 = vsyncpa [#allocation15], 1 }
0x3c4a   :  { %5336 = vsyncpa [#allocation18], 1 }
0x3c4b   :  { %5337 = vsyncpa [#allocation21], 1 }
0x3c4c   :  { %5338 = vsyncpa [#allocation24], 1 }
0x3c4d   :  { %5339 = vsyncpa [#allocation27], 1 }
0x3c4e   :  { %5340 = vsyncpa [#allocation4], 1 }

</bundles_post_ra>
